<compile_context>
chip_gen: v7x
topology: tpu7x:2x2x1
jax: 0.10.0
libtpu: 0.0.40
codegen_flags: <defaults>
</compile_context>

<pallas_src>
import functools

import jax
import jax.numpy as jnp
from jax.experimental import pallas as pl
from jax.experimental.pallas import tpu as pltpu


def _odeblock_kernel(x_ref, x0_ref, adj_ref, alpha_ref, w_ref, d_ref,
                     w2_ref, d2_ref, o_ref, xw2_ref, *, dt):
    """One explicit Euler step of the STGODE ODE function for one batch slab.

    Block shapes (batch dim squeezed by the BlockSpec):
      x_ref, x0_ref, o_ref, xw2_ref : (N, T, F)
      adj_ref : (N, N)   alpha_ref : (N, 1)
      w_ref   : (F, F)   d_ref     : (1, F)
      w2_ref  : (T, T)   d2_ref    : (1, T)
    """
    f32 = jnp.float32
    n, t_len, _ = x_ref.shape

    adj = adj_ref[...].astype(f32)                                     # (N, N)

    # sigmoid(alpha) / 2 per node; broadcast over lanes (F) in the loop below.
    alpha_half = 0.5 / (1.0 + jnp.exp(-alpha_ref[...].astype(f32)))    # (N, 1)

    # W_sym = (W * clamp(d, 0, 1)) @ W^T  -- feature mixing matrix (F, F).
    w = w_ref[...].astype(f32)
    wd = w * jnp.clip(d_ref[...].astype(f32), 0.0, 1.0)
    w_sym = jax.lax.dot_general(
        wd, w, dimension_numbers=(((1,), (1,)), ((), ())),
        preferred_element_type=f32)

    # W2_sym^T = W2 @ (W2 * clamp(d2, 0, 1))^T -- transposed temporal mixer.
    w2 = w2_ref[...].astype(f32)
    w2d = w2 * jnp.clip(d2_ref[...].astype(f32), 0.0, 1.0)
    w2_sym_t = jax.lax.dot_general(
        w2, w2d, dimension_numbers=(((1,), (1,)), ((), ())),
        preferred_element_type=f32)                                    # (T, T)

    # Temporal mixing for all time steps at once:
    #   xw2[n, t, f] = sum_k x[n, k, f] * W2_sym[k, t]
    # as a node-batched matmul (N, T, T) x (N, T, F) -> (N, T, F).
    x_full = x_ref[...].astype(f32)                                    # (N, T, F)
    w2_b = jnp.broadcast_to(w2_sym_t[None, :, :], (n, t_len, t_len))
    xw2_ref[...] = jax.lax.dot_general(
        w2_b, x_full,
        dimension_numbers=(((2,), (1,)), ((0,), (0,))),
        preferred_element_type=f32)

    # Graph + feature mixing per time step: clean 2-D MXU matmuls on (N, F).
    for t in range(t_len):
        x_t = x_ref[:, t, :].astype(f32)                               # (N, F)
        xa_t = jnp.dot(adj, x_t, preferred_element_type=f32)           # graph mix
        xw_t = jnp.dot(x_t, w_sym, preferred_element_type=f32)         # feature mix
        f_t = (alpha_half * xa_t - 3.0 * x_t + xw_t
               + xw2_ref[:, t, :] + x0_ref[:, t, :].astype(f32))
        o_ref[:, t, :] = (x_t + dt * f_t).astype(o_ref.dtype)


def odeblock_forward(x, adj, nodes, *, x0, alpha, w, d, w2, d2,
                     t_span=(0.0, 1.0)):
    """Pallas equivalent of ODEblock_(odefunc, t=[t0, t1]).forward(x, adj, nodes).

    x, x0 : (B, N, T, F)    adj : (N, N)    nodes : (N,) int node indices
    alpha : per-node parameter, w : (F, F), d : (F,), w2 : (T, T), d2 : (T,)
    """
    assert x.ndim == 4, "expected x of shape [B, N, T, F]"
    B, N, T, F = x.shape
    assert x0.shape == x.shape
    assert adj.shape == (N, N)
    dt = float(t_span[1]) - float(t_span[0])

    # odefunc.set_nodes(nodes): select per-node alpha for the active nodes.
    # TODO(synk): exact set_nodes() semantics depend on the repo's ODEFunc;
    # here `nodes` indexes the per-node alpha parameter (identity = full graph).
    alpha_sel = jnp.take(alpha.astype(jnp.float32), nodes, axis=0).reshape(N, 1)
    d_row = d.reshape(1, F)
    d2_row = d2.reshape(1, T)

    kernel = functools.partial(_odeblock_kernel, dt=dt)

    flops = 2 * B * T * (N * N * F + N * F * F + N * T * F)
    bytes_accessed = 4 * (3 * B * N * T * F + N * N + N + F * F + F + T * T + T)

    return pl.pallas_call(
        kernel,
        out_shape=jax.ShapeDtypeStruct((B, N, T, F), x.dtype),
        grid_spec=pltpu.PrefetchScalarGridSpec(
            num_scalar_prefetch=0,
            grid=(B,),
            in_specs=[
                pl.BlockSpec((None, N, T, F), lambda b: (b, 0, 0, 0)),  # x
                pl.BlockSpec((None, N, T, F), lambda b: (b, 0, 0, 0)),  # x0
                pl.BlockSpec((N, N), lambda b: (0, 0)),                 # adj
                pl.BlockSpec((N, 1), lambda b: (0, 0)),                 # alpha
                pl.BlockSpec((F, F), lambda b: (0, 0)),                 # w
                pl.BlockSpec((1, F), lambda b: (0, 0)),                 # d
                pl.BlockSpec((T, T), lambda b: (0, 0)),                 # w2
                pl.BlockSpec((1, T), lambda b: (0, 0)),                 # d2
            ],
            out_specs=pl.BlockSpec((None, N, T, F), lambda b: (b, 0, 0, 0)),
            scratch_shapes=[pltpu.VMEM((N, T, F), jnp.float32)],
        ),
        compiler_params=pltpu.CompilerParams(
            dimension_semantics=("parallel",),
        ),
        cost_estimate=pl.CostEstimate(
            flops=flops, transcendentals=B * N, bytes_accessed=bytes_accessed),
    )(x, x0, adj, alpha_sel, w, d_row, w2, d2_row)


def odeblock_reference(x, adj, nodes, *, x0, alpha, w, d, w2, d2,
                       t_span=(0.0, 1.0)):
    """Pure-JAX reference replicating the PyTorch math (for verification)."""
    hp = jax.lax.Precision.HIGHEST
    dt = float(t_span[1]) - float(t_span[0])
    alpha_sel = jnp.take(alpha, nodes, axis=0)
    a = jax.nn.sigmoid(alpha_sel)[None, :, None, None]
    xa = jnp.einsum('ij,bjtf->bitf', adj, x, precision=hp)
    w_sym = jnp.einsum('ab,cb->ac', w * jnp.clip(d, 0.0, 1.0), w, precision=hp)
    xw = jnp.einsum('bntf,fg->bntg', x, w_sym, precision=hp)
    w2_sym = jnp.einsum('ab,cb->ac', w2 * jnp.clip(d2, 0.0, 1.0), w2, precision=hp)
    xw2 = jnp.einsum('bntf,tm->bnmf', x, w2_sym, precision=hp)
    f = a / 2.0 * xa - 3.0 * x + xw + xw2 + x0
    return x + dt * f


if __name__ == "__main__":
    # Small shapes consistent with STGODE: [batch, nodes, time, features].
    B, N, T, F = 2, 16, 8, 32
    key = jax.random.PRNGKey(0)
    ks = jax.random.split(key, 4)

    x = jax.random.normal(ks[0], (B, N, T, F), dtype=jnp.float32)
    adj = jax.random.uniform(ks[1], (N, N), dtype=jnp.float32)
    adj = adj / jnp.sum(adj, axis=1, keepdims=True)       # row-normalized adjacency
    nodes = jnp.arange(N, dtype=jnp.int32)

    # odefunc parameters (STGODE ODEFunc-style initialisation + small noise).
    alpha = 0.8 * jnp.ones((N,), dtype=jnp.float32)
    w = jnp.eye(F, dtype=jnp.float32) + 0.02 * jax.random.normal(
        ks[2], (F, F), dtype=jnp.float32)
    d = jnp.ones((F,), dtype=jnp.float32)
    w2 = jnp.eye(T, dtype=jnp.float32) + 0.02 * jax.random.normal(
        ks[3], (T, T), dtype=jnp.float32)
    d2 = jnp.ones((T,), dtype=jnp.float32)

    x0 = x   # ODEblock_.set_x0(x) is called with the block input in STGODE.

    z = odeblock_forward(x, adj, nodes, x0=x0, alpha=alpha, w=w, d=d,
                         w2=w2, d2=d2)
    z = jax.block_until_ready(z)

    z_ref = odeblock_reference(x, adj, nodes, x0=x0, alpha=alpha, w=w, d=d,
                               w2=w2, d2=d2)

    assert z.shape == x.shape, z.shape
    assert z.dtype == x.dtype, z.dtype
    max_err = float(jnp.max(jnp.abs(z - z_ref)))
    assert jnp.allclose(z, z_ref, rtol=1e-3, atol=1e-3), f"max abs err {max_err}"
    print("KERNEL_OK")
</pallas_src>

<mosaic_0001>
module attributes {stable_mosaic.version = 11 : i64} {
  func.func @_odeblock_kernel(%arg0: i32, %arg1: memref<1x16x8x32xf32, #tpu.memory_space<vmem>>, %arg2: memref<1x16x8x32xf32, #tpu.memory_space<vmem>>, %arg3: memref<16x16xf32, #tpu.memory_space<vmem>>, %arg4: memref<16x1xf32, #tpu.memory_space<vmem>>, %arg5: memref<32x32xf32, #tpu.memory_space<vmem>>, %arg6: memref<1x32xf32, #tpu.memory_space<vmem>>, %arg7: memref<8x8xf32, #tpu.memory_space<vmem>>, %arg8: memref<1x8xf32, #tpu.memory_space<vmem>>, %arg9: memref<1x16x8x32xf32, #tpu.memory_space<vmem>>, %arg10: memref<16x8x32xf32, #tpu.memory_space<vmem>>) attributes {dimension_semantics = [#tpu.dimension_semantics<parallel>], iteration_bounds = array<i64: 2>, scalar_prefetch = 0 : i64, scratch_operands = 1 : i64, tpu.core_type = #tpu.core_type<tc>, window_params = [{transform_indices = @transform_0, window_bounds = array<i64: 1, 16, 8, 32>}, {transform_indices = @transform_1, window_bounds = array<i64: 1, 16, 8, 32>}, {pipeline_mode = #tpu.pipeline_mode<synchronous>, transform_indices = @transform_2, window_bounds = array<i64: 16, 16>}, {pipeline_mode = #tpu.pipeline_mode<synchronous>, transform_indices = @transform_3, window_bounds = array<i64: 16, 1>}, {pipeline_mode = #tpu.pipeline_mode<synchronous>, transform_indices = @transform_4, window_bounds = array<i64: 32, 32>}, {pipeline_mode = #tpu.pipeline_mode<synchronous>, transform_indices = @transform_5, window_bounds = array<i64: 1, 32>}, {pipeline_mode = #tpu.pipeline_mode<synchronous>, transform_indices = @transform_6, window_bounds = array<i64: 8, 8>}, {pipeline_mode = #tpu.pipeline_mode<synchronous>, transform_indices = @transform_7, window_bounds = array<i64: 1, 8>}, {transform_indices = @transform_8, window_bounds = array<i64: 1, 16, 8, 32>}]} {
    %c0 = arith.constant 0 : index
    %c0_0 = arith.constant 0 : index
    %0 = vector.load %arg3[%c0, %c0_0] : memref<16x16xf32, #tpu.memory_space<vmem>>, vector<16x16xf32>
    %c0_1 = arith.constant 0 : index
    %c0_2 = arith.constant 0 : index
    %1 = vector.load %arg4[%c0_1, %c0_2] : memref<16x1xf32, #tpu.memory_space<vmem>>, vector<16x1xf32>
    %cst = arith.constant 0.000000e+00 : f32
    %2 = vector.broadcast %cst : f32 to vector<16x1xf32>
    %3 = arith.subf %2, %1 : vector<16x1xf32>
    %4 = math.exp %3 : vector<16x1xf32>
    %cst_3 = arith.constant 1.000000e+00 : f32
    %5 = vector.broadcast %cst_3 : f32 to vector<16x1xf32>
    %6 = arith.addf %5, %4 : vector<16x1xf32>
    %cst_4 = arith.constant 5.000000e-01 : f32
    %7 = vector.broadcast %cst_4 : f32 to vector<16x1xf32>
    %8 = arith.divf %7, %6 : vector<16x1xf32>
    %c0_5 = arith.constant 0 : index
    %c0_6 = arith.constant 0 : index
    %9 = vector.load %arg5[%c0_5, %c0_6] : memref<32x32xf32, #tpu.memory_space<vmem>>, vector<32x32xf32>
    %c0_7 = arith.constant 0 : index
    %c0_8 = arith.constant 0 : index
    %10 = vector.load %arg6[%c0_7, %c0_8] : memref<1x32xf32, #tpu.memory_space<vmem>>, vector<1x32xf32>
    %cst_9 = arith.constant 0.000000e+00 : f32
    %cst_10 = arith.constant 1.000000e+00 : f32
    %11 = vector.broadcast %cst_9 : f32 to vector<1x32xf32>
    %12 = arith.maximumf %11, %10 : vector<1x32xf32>
    %13 = vector.broadcast %cst_10 : f32 to vector<1x32xf32>
    %14 = arith.minimumf %13, %12 : vector<1x32xf32>
    %15 = vector.broadcast %14 : vector<1x32xf32> to vector<32x32xf32>
    %16 = arith.mulf %9, %15 : vector<32x32xf32>
    %cst_11 = arith.constant dense<0.000000e+00> : vector<32x32xf32>
    %17 = tpu.matmul %16, %9, %cst_11 {dimension_numbers = #tpu.dot_dimension_numbers<[1], [1], [0], [0], [0, 0, 1, 0], [], []>} : vector<32x32xf32>, vector<32x32xf32>, vector<32x32xf32> -> vector<32x32xf32>
    %c0_12 = arith.constant 0 : index
    %c0_13 = arith.constant 0 : index
    %18 = vector.load %arg7[%c0_12, %c0_13] : memref<8x8xf32, #tpu.memory_space<vmem>>, vector<8x8xf32>
    %c0_14 = arith.constant 0 : index
    %c0_15 = arith.constant 0 : index
    %19 = vector.load %arg8[%c0_14, %c0_15] : memref<1x8xf32, #tpu.memory_space<vmem>>, vector<1x8xf32>
    %cst_16 = arith.constant 0.000000e+00 : f32
    %cst_17 = arith.constant 1.000000e+00 : f32
    %20 = vector.broadcast %cst_16 : f32 to vector<1x8xf32>
    %21 = arith.maximumf %20, %19 : vector<1x8xf32>
    %22 = vector.broadcast %cst_17 : f32 to vector<1x8xf32>
    %23 = arith.minimumf %22, %21 : vector<1x8xf32>
    %24 = vector.broadcast %23 : vector<1x8xf32> to vector<8x8xf32>
    %25 = arith.mulf %18, %24 : vector<8x8xf32>
    %cst_18 = arith.constant dense<0.000000e+00> : vector<8x8xf32>
    %26 = tpu.matmul %18, %25, %cst_18 {dimension_numbers = #tpu.dot_dimension_numbers<[1], [1], [0], [0], [0, 0, 1, 0], [], []>} : vector<8x8xf32>, vector<8x8xf32>, vector<8x8xf32> -> vector<8x8xf32>
    %c0_19 = arith.constant 0 : index
    %c0_20 = arith.constant 0 : index
    %c0_21 = arith.constant 0 : index
    %c0_22 = arith.constant 0 : index
    %27 = vector.load %arg1[%c0_19, %c0_20, %c0_21, %c0_22] : memref<1x16x8x32xf32, #tpu.memory_space<vmem>>, vector<1x16x8x32xf32>
    %28 = vector.shape_cast %27 : vector<1x16x8x32xf32> to vector<16x8x32xf32>
    %29 = vector.shape_cast %26 : vector<8x8xf32> to vector<1x8x8xf32>
    %30 = vector.shape_cast %29 : vector<1x8x8xf32> to vector<1x8x8xf32>
    %31 = vector.broadcast %30 : vector<1x8x8xf32> to vector<16x8x8xf32>
    %cst_23 = arith.constant dense<0.000000e+00> : vector<16x8x32xf32>
    %32 = tpu.matmul %31, %28, %cst_23 {dimension_numbers = #tpu.dot_dimension_numbers<[2], [1], [1], [2], [0, 0, 0, 1, 1, 2], [0], [0]>} : vector<16x8x8xf32>, vector<16x8x32xf32>, vector<16x8x32xf32> -> vector<16x8x32xf32>
    %c0_24 = arith.constant 0 : index
    %c0_25 = arith.constant 0 : index
    %c0_26 = arith.constant 0 : index
    %33 = vector.load %arg10[%c0_24, %c0_25, %c0_26] : memref<16x8x32xf32, #tpu.memory_space<vmem>>, vector<16x8x32xf32>
    tpu.vector_store %arg10[%c0_24, %c0_25, %c0_26], %32 {strides = array<i32>} : memref<16x8x32xf32, #tpu.memory_space<vmem>>, vector<16x8x32xf32>,
    %c0_27 = arith.constant 0 : index
    %c0_28 = arith.constant 0 : index
    %c0_29 = arith.constant 0 : index
    %c0_30 = arith.constant 0 : index
    %34 = vector.load %arg1[%c0_27, %c0_28, %c0_29, %c0_30] : memref<1x16x8x32xf32, #tpu.memory_space<vmem>>, vector<1x16x1x32xf32>
    %35 = vector.shape_cast %34 : vector<1x16x1x32xf32> to vector<16x32xf32>
    %cst_31 = arith.constant dense<0.000000e+00> : vector<16x32xf32>
    %36 = tpu.matmul %0, %35, %cst_31 {dimension_numbers = #tpu.dot_dimension_numbers<[1], [0], [0], [1], [0, 0, 1, 1], [], []>} : vector<16x16xf32>, vector<16x32xf32>, vector<16x32xf32> -> vector<16x32xf32>
    %cst_32 = arith.constant dense<0.000000e+00> : vector<16x32xf32>
    %37 = tpu.matmul %35, %17, %cst_32 {dimension_numbers = #tpu.dot_dimension_numbers<[1], [0], [0], [1], [0, 0, 1, 1], [], []>} : vector<16x32xf32>, vector<32x32xf32>, vector<16x32xf32> -> vector<16x32xf32>
    %38 = vector.broadcast %8 : vector<16x1xf32> to vector<16x32xf32>
    %39 = arith.mulf %38, %36 : vector<16x32xf32>
    %cst_33 = arith.constant 3.000000e+00 : f32
    %40 = vector.broadcast %cst_33 : f32 to vector<16x32xf32>
    %41 = arith.mulf %40, %35 : vector<16x32xf32>
    %42 = arith.subf %39, %41 : vector<16x32xf32>
    %43 = arith.addf %42, %37 : vector<16x32xf32>
    %c0_34 = arith.constant 0 : index
    %c0_35 = arith.constant 0 : index
    %c0_36 = arith.constant 0 : index
    %44 = vector.load %arg10[%c0_34, %c0_35, %c0_36] : memref<16x8x32xf32, #tpu.memory_space<vmem>>, vector<16x1x32xf32>
    %45 = vector.shape_cast %44 : vector<16x1x32xf32> to vector<16x32xf32>
    %46 = arith.addf %43, %45 : vector<16x32xf32>
    %c0_37 = arith.constant 0 : index
    %c0_38 = arith.constant 0 : index
    %c0_39 = arith.constant 0 : index
    %c0_40 = arith.constant 0 : index
    %47 = vector.load %arg2[%c0_37, %c0_38, %c0_39, %c0_40] : memref<1x16x8x32xf32, #tpu.memory_space<vmem>>, vector<1x16x1x32xf32>
    %48 = vector.shape_cast %47 : vector<1x16x1x32xf32> to vector<16x32xf32>
    %49 = arith.addf %46, %48 : vector<16x32xf32>
    %cst_41 = arith.constant 1.000000e+00 : f32
    %50 = vector.broadcast %cst_41 : f32 to vector<16x32xf32>
    %51 = arith.mulf %50, %49 : vector<16x32xf32>
    %52 = arith.addf %35, %51 : vector<16x32xf32>
    %c0_42 = arith.constant 0 : index
    %c0_43 = arith.constant 0 : index
    %c0_44 = arith.constant 0 : index
    %c0_45 = arith.constant 0 : index
    %53 = vector.load %arg9[%c0_42, %c0_43, %c0_44, %c0_45] : memref<1x16x8x32xf32, #tpu.memory_space<vmem>>, vector<1x16x1x32xf32>
    %54 = vector.shape_cast %53 : vector<1x16x1x32xf32> to vector<16x32xf32>
    %55 = vector.shape_cast %52 : vector<16x32xf32> to vector<1x16x1x32xf32>
    tpu.vector_store %arg9[%c0_42, %c0_43, %c0_44, %c0_45], %55 {strides = array<i32>} : memref<1x16x8x32xf32, #tpu.memory_space<vmem>>, vector<1x16x1x32xf32>,
    %c0_46 = arith.constant 0 : index
    %c0_47 = arith.constant 0 : index
    %c1 = arith.constant 1 : index
    %c0_48 = arith.constant 0 : index
    %56 = vector.load %arg1[%c0_46, %c0_47, %c1, %c0_48] : memref<1x16x8x32xf32, #tpu.memory_space<vmem>>, vector<1x16x1x32xf32>
    %57 = vector.shape_cast %56 : vector<1x16x1x32xf32> to vector<16x32xf32>
    %cst_49 = arith.constant dense<0.000000e+00> : vector<16x32xf32>
    %58 = tpu.matmul %0, %57, %cst_49 {dimension_numbers = #tpu.dot_dimension_numbers<[1], [0], [0], [1], [0, 0, 1, 1], [], []>} : vector<16x16xf32>, vector<16x32xf32>, vector<16x32xf32> -> vector<16x32xf32>
    %cst_50 = arith.constant dense<0.000000e+00> : vector<16x32xf32>
    %59 = tpu.matmul %57, %17, %cst_50 {dimension_numbers = #tpu.dot_dimension_numbers<[1], [0], [0], [1], [0, 0, 1, 1], [], []>} : vector<16x32xf32>, vector<32x32xf32>, vector<16x32xf32> -> vector<16x32xf32>
    %60 = vector.broadcast %8 : vector<16x1xf32> to vector<16x32xf32>
    %61 = arith.mulf %60, %58 : vector<16x32xf32>
    %cst_51 = arith.constant 3.000000e+00 : f32
    %62 = vector.broadcast %cst_51 : f32 to vector<16x32xf32>
    %63 = arith.mulf %62, %57 : vector<16x32xf32>
    %64 = arith.subf %61, %63 : vector<16x32xf32>
    %65 = arith.addf %64, %59 : vector<16x32xf32>
    %c0_52 = arith.constant 0 : index
    %c1_53 = arith.constant 1 : index
    %c0_54 = arith.constant 0 : index
    %66 = vector.load %arg10[%c0_52, %c1_53, %c0_54] : memref<16x8x32xf32, #tpu.memory_space<vmem>>, vector<16x1x32xf32>
    %67 = vector.shape_cast %66 : vector<16x1x32xf32> to vector<16x32xf32>
    %68 = arith.addf %65, %67 : vector<16x32xf32>
    %c0_55 = arith.constant 0 : index
    %c0_56 = arith.constant 0 : index
    %c1_57 = arith.constant 1 : index
    %c0_58 = arith.constant 0 : index
    %69 = vector.load %arg2[%c0_55, %c0_56, %c1_57, %c0_58] : memref<1x16x8x32xf32, #tpu.memory_space<vmem>>, vector<1x16x1x32xf32>
    %70 = vector.shape_cast %69 : vector<1x16x1x32xf32> to vector<16x32xf32>
    %71 = arith.addf %68, %70 : vector<16x32xf32>
    %cst_59 = arith.constant 1.000000e+00 : f32
    %72 = vector.broadcast %cst_59 : f32 to vector<16x32xf32>
    %73 = arith.mulf %72, %71 : vector<16x32xf32>
    %74 = arith.addf %57, %73 : vector<16x32xf32>
    %c0_60 = arith.constant 0 : index
    %c0_61 = arith.constant 0 : index
    %c1_62 = arith.constant 1 : index
    %c0_63 = arith.constant 0 : index
    %75 = vector.load %arg9[%c0_60, %c0_61, %c1_62, %c0_63] : memref<1x16x8x32xf32, #tpu.memory_space<vmem>>, vector<1x16x1x32xf32>
    %76 = vector.shape_cast %75 : vector<1x16x1x32xf32> to vector<16x32xf32>
    %77 = vector.shape_cast %74 : vector<16x32xf32> to vector<1x16x1x32xf32>
    tpu.vector_store %arg9[%c0_60, %c0_61, %c1_62, %c0_63], %77 {strides = array<i32>} : memref<1x16x8x32xf32, #tpu.memory_space<vmem>>, vector<1x16x1x32xf32>,
    %c0_64 = arith.constant 0 : index
    %c0_65 = arith.constant 0 : index
    %c2 = arith.constant 2 : index
    %c0_66 = arith.constant 0 : index
    %78 = vector.load %arg1[%c0_64, %c0_65, %c2, %c0_66] : memref<1x16x8x32xf32, #tpu.memory_space<vmem>>, vector<1x16x1x32xf32>
    %79 = vector.shape_cast %78 : vector<1x16x1x32xf32> to vector<16x32xf32>
    %cst_67 = arith.constant dense<0.000000e+00> : vector<16x32xf32>
    %80 = tpu.matmul %0, %79, %cst_67 {dimension_numbers = #tpu.dot_dimension_numbers<[1], [0], [0], [1], [0, 0, 1, 1], [], []>} : vector<16x16xf32>, vector<16x32xf32>, vector<16x32xf32> -> vector<16x32xf32>
    %cst_68 = arith.constant dense<0.000000e+00> : vector<16x32xf32>
    %81 = tpu.matmul %79, %17, %cst_68 {dimension_numbers = #tpu.dot_dimension_numbers<[1], [0], [0], [1], [0, 0, 1, 1], [], []>} : vector<16x32xf32>, vector<32x32xf32>, vector<16x32xf32> -> vector<16x32xf32>
    %82 = vector.broadcast %8 : vector<16x1xf32> to vector<16x32xf32>
    %83 = arith.mulf %82, %80 : vector<16x32xf32>
    %cst_69 = arith.constant 3.000000e+00 : f32
    %84 = vector.broadcast %cst_69 : f32 to vector<16x32xf32>
    %85 = arith.mulf %84, %79 : vector<16x32xf32>
    %86 = arith.subf %83, %85 : vector<16x32xf32>
    %87 = arith.addf %86, %81 : vector<16x32xf32>
    %c0_70 = arith.constant 0 : index
    %c2_71 = arith.constant 2 : index
    %c0_72 = arith.constant 0 : index
    %88 = vector.load %arg10[%c0_70, %c2_71, %c0_72] : memref<16x8x32xf32, #tpu.memory_space<vmem>>, vector<16x1x32xf32>
    %89 = vector.shape_cast %88 : vector<16x1x32xf32> to vector<16x32xf32>
    %90 = arith.addf %87, %89 : vector<16x32xf32>
    %c0_73 = arith.constant 0 : index
    %c0_74 = arith.constant 0 : index
    %c2_75 = arith.constant 2 : index
    %c0_76 = arith.constant 0 : index
    %91 = vector.load %arg2[%c0_73, %c0_74, %c2_75, %c0_76] : memref<1x16x8x32xf32, #tpu.memory_space<vmem>>, vector<1x16x1x32xf32>
    %92 = vector.shape_cast %91 : vector<1x16x1x32xf32> to vector<16x32xf32>
    %93 = arith.addf %90, %92 : vector<16x32xf32>
    %cst_77 = arith.constant 1.000000e+00 : f32
    %94 = vector.broadcast %cst_77 : f32 to vector<16x32xf32>
    %95 = arith.mulf %94, %93 : vector<16x32xf32>
    %96 = arith.addf %79, %95 : vector<16x32xf32>
    %c0_78 = arith.constant 0 : index
    %c0_79 = arith.constant 0 : index
    %c2_80 = arith.constant 2 : index
    %c0_81 = arith.constant 0 : index
    %97 = vector.load %arg9[%c0_78, %c0_79, %c2_80, %c0_81] : memref<1x16x8x32xf32, #tpu.memory_space<vmem>>, vector<1x16x1x32xf32>
    %98 = vector.shape_cast %97 : vector<1x16x1x32xf32> to vector<16x32xf32>
    %99 = vector.shape_cast %96 : vector<16x32xf32> to vector<1x16x1x32xf32>
    tpu.vector_store %arg9[%c0_78, %c0_79, %c2_80, %c0_81], %99 {strides = array<i32>} : memref<1x16x8x32xf32, #tpu.memory_space<vmem>>, vector<1x16x1x32xf32>,
    %c0_82 = arith.constant 0 : index
    %c0_83 = arith.constant 0 : index
    %c3 = arith.constant 3 : index
    %c0_84 = arith.constant 0 : index
    %100 = vector.load %arg1[%c0_82, %c0_83, %c3, %c0_84] : memref<1x16x8x32xf32, #tpu.memory_space<vmem>>, vector<1x16x1x32xf32>
    %101 = vector.shape_cast %100 : vector<1x16x1x32xf32> to vector<16x32xf32>
    %cst_85 = arith.constant dense<0.000000e+00> : vector<16x32xf32>
    %102 = tpu.matmul %0, %101, %cst_85 {dimension_numbers = #tpu.dot_dimension_numbers<[1], [0], [0], [1], [0, 0, 1, 1], [], []>} : vector<16x16xf32>, vector<16x32xf32>, vector<16x32xf32> -> vector<16x32xf32>
    %cst_86 = arith.constant dense<0.000000e+00> : vector<16x32xf32>
    %103 = tpu.matmul %101, %17, %cst_86 {dimension_numbers = #tpu.dot_dimension_numbers<[1], [0], [0], [1], [0, 0, 1, 1], [], []>} : vector<16x32xf32>, vector<32x32xf32>, vector<16x32xf32> -> vector<16x32xf32>
    %104 = vector.broadcast %8 : vector<16x1xf32> to vector<16x32xf32>
    %105 = arith.mulf %104, %102 : vector<16x32xf32>
    %cst_87 = arith.constant 3.000000e+00 : f32
    %106 = vector.broadcast %cst_87 : f32 to vector<16x32xf32>
    %107 = arith.mulf %106, %101 : vector<16x32xf32>
    %108 = arith.subf %105, %107 : vector<16x32xf32>
    %109 = arith.addf %108, %103 : vector<16x32xf32>
    %c0_88 = arith.constant 0 : index
    %c3_89 = arith.constant 3 : index
    %c0_90 = arith.constant 0 : index
    %110 = vector.load %arg10[%c0_88, %c3_89, %c0_90] : memref<16x8x32xf32, #tpu.memory_space<vmem>>, vector<16x1x32xf32>
    %111 = vector.shape_cast %110 : vector<16x1x32xf32> to vector<16x32xf32>
    %112 = arith.addf %109, %111 : vector<16x32xf32>
    %c0_91 = arith.constant 0 : index
    %c0_92 = arith.constant 0 : index
    %c3_93 = arith.constant 3 : index
    %c0_94 = arith.constant 0 : index
    %113 = vector.load %arg2[%c0_91, %c0_92, %c3_93, %c0_94] : memref<1x16x8x32xf32, #tpu.memory_space<vmem>>, vector<1x16x1x32xf32>
    %114 = vector.shape_cast %113 : vector<1x16x1x32xf32> to vector<16x32xf32>
    %115 = arith.addf %112, %114 : vector<16x32xf32>
    %cst_95 = arith.constant 1.000000e+00 : f32
    %116 = vector.broadcast %cst_95 : f32 to vector<16x32xf32>
    %117 = arith.mulf %116, %115 : vector<16x32xf32>
    %118 = arith.addf %101, %117 : vector<16x32xf32>
    %c0_96 = arith.constant 0 : index
    %c0_97 = arith.constant 0 : index
    %c3_98 = arith.constant 3 : index
    %c0_99 = arith.constant 0 : index
    %119 = vector.load %arg9[%c0_96, %c0_97, %c3_98, %c0_99] : memref<1x16x8x32xf32, #tpu.memory_space<vmem>>, vector<1x16x1x32xf32>
    %120 = vector.shape_cast %119 : vector<1x16x1x32xf32> to vector<16x32xf32>
    %121 = vector.shape_cast %118 : vector<16x32xf32> to vector<1x16x1x32xf32>
    tpu.vector_store %arg9[%c0_96, %c0_97, %c3_98, %c0_99], %121 {strides = array<i32>} : memref<1x16x8x32xf32, #tpu.memory_space<vmem>>, vector<1x16x1x32xf32>,
    %c0_100 = arith.constant 0 : index
    %c0_101 = arith.constant 0 : index
    %c4 = arith.constant 4 : index
    %c0_102 = arith.constant 0 : index
    %122 = vector.load %arg1[%c0_100, %c0_101, %c4, %c0_102] : memref<1x16x8x32xf32, #tpu.memory_space<vmem>>, vector<1x16x1x32xf32>
    %123 = vector.shape_cast %122 : vector<1x16x1x32xf32> to vector<16x32xf32>
    %cst_103 = arith.constant dense<0.000000e+00> : vector<16x32xf32>
    %124 = tpu.matmul %0, %123, %cst_103 {dimension_numbers = #tpu.dot_dimension_numbers<[1], [0], [0], [1], [0, 0, 1, 1], [], []>} : vector<16x16xf32>, vector<16x32xf32>, vector<16x32xf32> -> vector<16x32xf32>
    %cst_104 = arith.constant dense<0.000000e+00> : vector<16x32xf32>
    %125 = tpu.matmul %123, %17, %cst_104 {dimension_numbers = #tpu.dot_dimension_numbers<[1], [0], [0], [1], [0, 0, 1, 1], [], []>} : vector<16x32xf32>, vector<32x32xf32>, vector<16x32xf32> -> vector<16x32xf32>
    %126 = vector.broadcast %8 : vector<16x1xf32> to vector<16x32xf32>
    %127 = arith.mulf %126, %124 : vector<16x32xf32>
    %cst_105 = arith.constant 3.000000e+00 : f32
    %128 = vector.broadcast %cst_105 : f32 to vector<16x32xf32>
    %129 = arith.mulf %128, %123 : vector<16x32xf32>
    %130 = arith.subf %127, %129 : vector<16x32xf32>
    %131 = arith.addf %130, %125 : vector<16x32xf32>
    %c0_106 = arith.constant 0 : index
    %c4_107 = arith.constant 4 : index
    %c0_108 = arith.constant 0 : index
    %132 = vector.load %arg10[%c0_106, %c4_107, %c0_108] : memref<16x8x32xf32, #tpu.memory_space<vmem>>, vector<16x1x32xf32>
    %133 = vector.shape_cast %132 : vector<16x1x32xf32> to vector<16x32xf32>
    %134 = arith.addf %131, %133 : vector<16x32xf32>
    %c0_109 = arith.constant 0 : index
    %c0_110 = arith.constant 0 : index
    %c4_111 = arith.constant 4 : index
    %c0_112 = arith.constant 0 : index
    %135 = vector.load %arg2[%c0_109, %c0_110, %c4_111, %c0_112] : memref<1x16x8x32xf32, #tpu.memory_space<vmem>>, vector<1x16x1x32xf32>
    %136 = vector.shape_cast %135 : vector<1x16x1x32xf32> to vector<16x32xf32>
    %137 = arith.addf %134, %136 : vector<16x32xf32>
    %cst_113 = arith.constant 1.000000e+00 : f32
    %138 = vector.broadcast %cst_113 : f32 to vector<16x32xf32>
    %139 = arith.mulf %138, %137 : vector<16x32xf32>
    %140 = arith.addf %123, %139 : vector<16x32xf32>
    %c0_114 = arith.constant 0 : index
    %c0_115 = arith.constant 0 : index
    %c4_116 = arith.constant 4 : index
    %c0_117 = arith.constant 0 : index
    %141 = vector.load %arg9[%c0_114, %c0_115, %c4_116, %c0_117] : memref<1x16x8x32xf32, #tpu.memory_space<vmem>>, vector<1x16x1x32xf32>
    %142 = vector.shape_cast %141 : vector<1x16x1x32xf32> to vector<16x32xf32>
    %143 = vector.shape_cast %140 : vector<16x32xf32> to vector<1x16x1x32xf32>
    tpu.vector_store %arg9[%c0_114, %c0_115, %c4_116, %c0_117], %143 {strides = array<i32>} : memref<1x16x8x32xf32, #tpu.memory_space<vmem>>, vector<1x16x1x32xf32>,
    %c0_118 = arith.constant 0 : index
    %c0_119 = arith.constant 0 : index
    %c5 = arith.constant 5 : index
    %c0_120 = arith.constant 0 : index
    %144 = vector.load %arg1[%c0_118, %c0_119, %c5, %c0_120] : memref<1x16x8x32xf32, #tpu.memory_space<vmem>>, vector<1x16x1x32xf32>
    %145 = vector.shape_cast %144 : vector<1x16x1x32xf32> to vector<16x32xf32>
    %cst_121 = arith.constant dense<0.000000e+00> : vector<16x32xf32>
    %146 = tpu.matmul %0, %145, %cst_121 {dimension_numbers = #tpu.dot_dimension_numbers<[1], [0], [0], [1], [0, 0, 1, 1], [], []>} : vector<16x16xf32>, vector<16x32xf32>, vector<16x32xf32> -> vector<16x32xf32>
    %cst_122 = arith.constant dense<0.000000e+00> : vector<16x32xf32>
    %147 = tpu.matmul %145, %17, %cst_122 {dimension_numbers = #tpu.dot_dimension_numbers<[1], [0], [0], [1], [0, 0, 1, 1], [], []>} : vector<16x32xf32>, vector<32x32xf32>, vector<16x32xf32> -> vector<16x32xf32>
    %148 = vector.broadcast %8 : vector<16x1xf32> to vector<16x32xf32>
    %149 = arith.mulf %148, %146 : vector<16x32xf32>
    %cst_123 = arith.constant 3.000000e+00 : f32
    %150 = vector.broadcast %cst_123 : f32 to vector<16x32xf32>
    %151 = arith.mulf %150, %145 : vector<16x32xf32>
    %152 = arith.subf %149, %151 : vector<16x32xf32>
    %153 = arith.addf %152, %147 : vector<16x32xf32>
    %c0_124 = arith.constant 0 : index
    %c5_125 = arith.constant 5 : index
    %c0_126 = arith.constant 0 : index
    %154 = vector.load %arg10[%c0_124, %c5_125, %c0_126] : memref<16x8x32xf32, #tpu.memory_space<vmem>>, vector<16x1x32xf32>
    %155 = vector.shape_cast %154 : vector<16x1x32xf32> to vector<16x32xf32>
    %156 = arith.addf %153, %155 : vector<16x32xf32>
    %c0_127 = arith.constant 0 : index
    %c0_128 = arith.constant 0 : index
    %c5_129 = arith.constant 5 : index
    %c0_130 = arith.constant 0 : index
    %157 = vector.load %arg2[%c0_127, %c0_128, %c5_129, %c0_130] : memref<1x16x8x32xf32, #tpu.memory_space<vmem>>, vector<1x16x1x32xf32>
    %158 = vector.shape_cast %157 : vector<1x16x1x32xf32> to vector<16x32xf32>
    %159 = arith.addf %156, %158 : vector<16x32xf32>
    %cst_131 = arith.constant 1.000000e+00 : f32
    %160 = vector.broadcast %cst_131 : f32 to vector<16x32xf32>
    %161 = arith.mulf %160, %159 : vector<16x32xf32>
    %162 = arith.addf %145, %161 : vector<16x32xf32>
    %c0_132 = arith.constant 0 : index
    %c0_133 = arith.constant 0 : index
    %c5_134 = arith.constant 5 : index
    %c0_135 = arith.constant 0 : index
    %163 = vector.load %arg9[%c0_132, %c0_133, %c5_134, %c0_135] : memref<1x16x8x32xf32, #tpu.memory_space<vmem>>, vector<1x16x1x32xf32>
    %164 = vector.shape_cast %163 : vector<1x16x1x32xf32> to vector<16x32xf32>
    %165 = vector.shape_cast %162 : vector<16x32xf32> to vector<1x16x1x32xf32>
    tpu.vector_store %arg9[%c0_132, %c0_133, %c5_134, %c0_135], %165 {strides = array<i32>} : memref<1x16x8x32xf32, #tpu.memory_space<vmem>>, vector<1x16x1x32xf32>,
    %c0_136 = arith.constant 0 : index
    %c0_137 = arith.constant 0 : index
    %c6 = arith.constant 6 : index
    %c0_138 = arith.constant 0 : index
    %166 = vector.load %arg1[%c0_136, %c0_137, %c6, %c0_138] : memref<1x16x8x32xf32, #tpu.memory_space<vmem>>, vector<1x16x1x32xf32>
    %167 = vector.shape_cast %166 : vector<1x16x1x32xf32> to vector<16x32xf32>
    %cst_139 = arith.constant dense<0.000000e+00> : vector<16x32xf32>
    %168 = tpu.matmul %0, %167, %cst_139 {dimension_numbers = #tpu.dot_dimension_numbers<[1], [0], [0], [1], [0, 0, 1, 1], [], []>} : vector<16x16xf32>, vector<16x32xf32>, vector<16x32xf32> -> vector<16x32xf32>
    %cst_140 = arith.constant dense<0.000000e+00> : vector<16x32xf32>
    %169 = tpu.matmul %167, %17, %cst_140 {dimension_numbers = #tpu.dot_dimension_numbers<[1], [0], [0], [1], [0, 0, 1, 1], [], []>} : vector<16x32xf32>, vector<32x32xf32>, vector<16x32xf32> -> vector<16x32xf32>
    %170 = vector.broadcast %8 : vector<16x1xf32> to vector<16x32xf32>
    %171 = arith.mulf %170, %168 : vector<16x32xf32>
    %cst_141 = arith.constant 3.000000e+00 : f32
    %172 = vector.broadcast %cst_141 : f32 to vector<16x32xf32>
    %173 = arith.mulf %172, %167 : vector<16x32xf32>
    %174 = arith.subf %171, %173 : vector<16x32xf32>
    %175 = arith.addf %174, %169 : vector<16x32xf32>
    %c0_142 = arith.constant 0 : index
    %c6_143 = arith.constant 6 : index
    %c0_144 = arith.constant 0 : index
    %176 = vector.load %arg10[%c0_142, %c6_143, %c0_144] : memref<16x8x32xf32, #tpu.memory_space<vmem>>, vector<16x1x32xf32>
    %177 = vector.shape_cast %176 : vector<16x1x32xf32> to vector<16x32xf32>
    %178 = arith.addf %175, %177 : vector<16x32xf32>
    %c0_145 = arith.constant 0 : index
    %c0_146 = arith.constant 0 : index
    %c6_147 = arith.constant 6 : index
    %c0_148 = arith.constant 0 : index
    %179 = vector.load %arg2[%c0_145, %c0_146, %c6_147, %c0_148] : memref<1x16x8x32xf32, #tpu.memory_space<vmem>>, vector<1x16x1x32xf32>
    %180 = vector.shape_cast %179 : vector<1x16x1x32xf32> to vector<16x32xf32>
    %181 = arith.addf %178, %180 : vector<16x32xf32>
    %cst_149 = arith.constant 1.000000e+00 : f32
    %182 = vector.broadcast %cst_149 : f32 to vector<16x32xf32>
    %183 = arith.mulf %182, %181 : vector<16x32xf32>
    %184 = arith.addf %167, %183 : vector<16x32xf32>
    %c0_150 = arith.constant 0 : index
    %c0_151 = arith.constant 0 : index
    %c6_152 = arith.constant 6 : index
    %c0_153 = arith.constant 0 : index
    %185 = vector.load %arg9[%c0_150, %c0_151, %c6_152, %c0_153] : memref<1x16x8x32xf32, #tpu.memory_space<vmem>>, vector<1x16x1x32xf32>
    %186 = vector.shape_cast %185 : vector<1x16x1x32xf32> to vector<16x32xf32>
    %187 = vector.shape_cast %184 : vector<16x32xf32> to vector<1x16x1x32xf32>
    tpu.vector_store %arg9[%c0_150, %c0_151, %c6_152, %c0_153], %187 {strides = array<i32>} : memref<1x16x8x32xf32, #tpu.memory_space<vmem>>, vector<1x16x1x32xf32>,
    %c0_154 = arith.constant 0 : index
    %c0_155 = arith.constant 0 : index
    %c7 = arith.constant 7 : index
    %c0_156 = arith.constant 0 : index
    %188 = vector.load %arg1[%c0_154, %c0_155, %c7, %c0_156] : memref<1x16x8x32xf32, #tpu.memory_space<vmem>>, vector<1x16x1x32xf32>
    %189 = vector.shape_cast %188 : vector<1x16x1x32xf32> to vector<16x32xf32>
    %cst_157 = arith.constant dense<0.000000e+00> : vector<16x32xf32>
    %190 = tpu.matmul %0, %189, %cst_157 {dimension_numbers = #tpu.dot_dimension_numbers<[1], [0], [0], [1], [0, 0, 1, 1], [], []>} : vector<16x16xf32>, vector<16x32xf32>, vector<16x32xf32> -> vector<16x32xf32>
    %cst_158 = arith.constant dense<0.000000e+00> : vector<16x32xf32>
    %191 = tpu.matmul %189, %17, %cst_158 {dimension_numbers = #tpu.dot_dimension_numbers<[1], [0], [0], [1], [0, 0, 1, 1], [], []>} : vector<16x32xf32>, vector<32x32xf32>, vector<16x32xf32> -> vector<16x32xf32>
    %192 = vector.broadcast %8 : vector<16x1xf32> to vector<16x32xf32>
    %193 = arith.mulf %192, %190 : vector<16x32xf32>
    %cst_159 = arith.constant 3.000000e+00 : f32
    %194 = vector.broadcast %cst_159 : f32 to vector<16x32xf32>
    %195 = arith.mulf %194, %189 : vector<16x32xf32>
    %196 = arith.subf %193, %195 : vector<16x32xf32>
    %197 = arith.addf %196, %191 : vector<16x32xf32>
    %c0_160 = arith.constant 0 : index
    %c7_161 = arith.constant 7 : index
    %c0_162 = arith.constant 0 : index
    %198 = vector.load %arg10[%c0_160, %c7_161, %c0_162] : memref<16x8x32xf32, #tpu.memory_space<vmem>>, vector<16x1x32xf32>
    %199 = vector.shape_cast %198 : vector<16x1x32xf32> to vector<16x32xf32>
    %200 = arith.addf %197, %199 : vector<16x32xf32>
    %c0_163 = arith.constant 0 : index
    %c0_164 = arith.constant 0 : index
    %c7_165 = arith.constant 7 : index
    %c0_166 = arith.constant 0 : index
    %201 = vector.load %arg2[%c0_163, %c0_164, %c7_165, %c0_166] : memref<1x16x8x32xf32, #tpu.memory_space<vmem>>, vector<1x16x1x32xf32>
    %202 = vector.shape_cast %201 : vector<1x16x1x32xf32> to vector<16x32xf32>
    %203 = arith.addf %200, %202 : vector<16x32xf32>
    %cst_167 = arith.constant 1.000000e+00 : f32
    %204 = vector.broadcast %cst_167 : f32 to vector<16x32xf32>
    %205 = arith.mulf %204, %203 : vector<16x32xf32>
    %206 = arith.addf %189, %205 : vector<16x32xf32>
    %c0_168 = arith.constant 0 : index
    %c0_169 = arith.constant 0 : index
    %c7_170 = arith.constant 7 : index
    %c0_171 = arith.constant 0 : index
    %207 = vector.load %arg9[%c0_168, %c0_169, %c7_170, %c0_171] : memref<1x16x8x32xf32, #tpu.memory_space<vmem>>, vector<1x16x1x32xf32>
    %208 = vector.shape_cast %207 : vector<1x16x1x32xf32> to vector<16x32xf32>
    %209 = vector.shape_cast %206 : vector<16x32xf32> to vector<1x16x1x32xf32>
    tpu.vector_store %arg9[%c0_168, %c0_169, %c7_170, %c0_171], %209 {strides = array<i32>} : memref<1x16x8x32xf32, #tpu.memory_space<vmem>>, vector<1x16x1x32xf32>,
    return
  }
  func.func @transform_0(%arg0: i32) -> (i32, i32, i32, i32) {
    %c0_i32 = arith.constant 0 : i32
    %c0_i32_0 = arith.constant 0 : i32
    %c0_i32_1 = arith.constant 0 : i32
    %c0_i32_2 = arith.constant 0 : i32
    return %arg0, %c0_i32, %c0_i32_0, %c0_i32_1 : i32, i32, i32, i32
  }
  func.func @transform_1(%arg0: i32) -> (i32, i32, i32, i32) {
    %c0_i32 = arith.constant 0 : i32
    %c0_i32_0 = arith.constant 0 : i32
    %c0_i32_1 = arith.constant 0 : i32
    %c0_i32_2 = arith.constant 0 : i32
    return %arg0, %c0_i32, %c0_i32_0, %c0_i32_1 : i32, i32, i32, i32
  }
  func.func @transform_2(%arg0: i32) -> (i32, i32) {
    %c0_i32 = arith.constant 0 : i32
    %c0_i32_0 = arith.constant 0 : i32
    %c0_i32_1 = arith.constant 0 : i32
    return %c0_i32, %c0_i32_0 : i32, i32
  }
  func.func @transform_3(%arg0: i32) -> (i32, i32) {
    %c0_i32 = arith.constant 0 : i32
    %c0_i32_0 = arith.constant 0 : i32
    %c0_i32_1 = arith.constant 0 : i32
    return %c0_i32, %c0_i32_0 : i32, i32
  }
  func.func @transform_4(%arg0: i32) -> (i32, i32) {
    %c0_i32 = arith.constant 0 : i32
    %c0_i32_0 = arith.constant 0 : i32
    %c0_i32_1 = arith.constant 0 : i32
    return %c0_i32, %c0_i32_0 : i32, i32
  }
  func.func @transform_5(%arg0: i32) -> (i32, i32) {
    %c0_i32 = arith.constant 0 : i32
    %c0_i32_0 = arith.constant 0 : i32
    %c0_i32_1 = arith.constant 0 : i32
    return %c0_i32, %c0_i32_0 : i32, i32
  }
  func.func @transform_6(%arg0: i32) -> (i32, i32) {
    %c0_i32 = arith.constant 0 : i32
    %c0_i32_0 = arith.constant 0 : i32
    %c0_i32_1 = arith.constant 0 : i32
    return %c0_i32, %c0_i32_0 : i32, i32
  }
  func.func @transform_7(%arg0: i32) -> (i32, i32) {
    %c0_i32 = arith.constant 0 : i32
    %c0_i32_0 = arith.constant 0 : i32
    %c0_i32_1 = arith.constant 0 : i32
    return %c0_i32, %c0_i32_0 : i32, i32
  }
  func.func @transform_8(%arg0: i32) -> (i32, i32, i32, i32) {
    %c0_i32 = arith.constant 0 : i32
    %c0_i32_0 = arith.constant 0 : i32
    %c0_i32_1 = arith.constant 0 : i32
    %c0_i32_2 = arith.constant 0 : i32
    return %arg0, %c0_i32, %c0_i32_0, %c0_i32_1 : i32, i32, i32, i32
  }
}

</mosaic_0001>

<bundles_post_ra>
// kernel: tpu_custom_call.1
= control target key start
LH: loop header
LB: loop body
LE: loop exit
PB: predicated region body
PF: predicated region fallthrough
CT: control target
= control target key end

     0   :  { %s9623_s0 = inlined_call_operand.hbm [shape: f32[2,16,8,32], index: 0, kind: input, shape index: {}]   ;;  %s9624_s1 = inlined_call_operand.hbm [shape: f32[2,16,8,32], index: 1, kind: input, shape index: {}]   ;;  %s9625_s2 = inlined_call_operand.hbm [shape: f32[16,16], index: 2, kind: input, shape index: {}]   ;;  %s9626_s3 = inlined_call_operand.vmem [shape: f32[16,1], index: 3, kind: input, shape index: {}]   ;;  %s9627_s4 = inlined_call_operand.vmem [shape: f32[32,32], index: 4, kind: input, shape index: {}]   ;;  %s9628_s5 = inlined_call_operand.vmem [shape: f32[1,32], index: 5, kind: input, shape index: {}]   ;;  %s9629_s6 = inlined_call_operand.hbm [shape: f32[8,8], index: 6, kind: input, shape index: {}]   ;;  %s9630_s7 = inlined_call_operand.vmem [shape: f32[1,8], index: 7, kind: input, shape index: {}]   ;;  %s9631_s8 = inlined_call_operand.hbm [shape: f32[2,16,8,32], index: 8, kind: output, shape index: {}]  }
   0x1   :  { %9648 = sst [smem:[#allocation37_spill]] %s9623_s0 }
   0x2   :  { %9649 = sst [smem:[#allocation38_spill]] %s9625_s2 }
   0x3   :  { %9650 = sst [smem:[#allocation39_spill]] %s9629_s6 }
   0x4   :  { %13 = vsyncpa [#allocation4], 0 }
   0x5   :  { %15 = vsyncpa [#allocation4 + $0x1], 0 }
   0x6   :  { %16 = vsyncpa [#allocation7], 0 }
   0x7   :  { %18 = vsyncpa [#allocation7 + $0x1], 0 }
   0x8   :  { %19 = vsyncpa [#allocation10], 0 }
   0x9   :  { %20 = vsyncpa [#allocation5], 0 }
   0xa   :  { %22 = vsyncpa [#allocation5 + $0x1], 0  ;;  %s6847_s27 = smov 0   ;;  %s6849_s28 = smov 0  }
   0xb   :  { %s6851_s29 = smov 0   ;;  %s6853_s30 = smov 0  }
   0xc LB: > { %9651 = sst [smem:[#allocation17_spill]] %s6784_s29  ;;  %s6868_s9 = sadd.s32 4294967295, %s6788_s30   ;;  %s6788_s30 = sphi %s6853_s30, %s9782_s30   ;;  %s6784_s29 = sphi %s6851_s29, %s9779_s29   ;;  %s6780_s28 = sphi %s6849_s28, %s9781_s28   ;;  %s6776_s27 = sphi %s6847_s27, %s9780_s27  }
   0xd   : > { %s5739_s10 = sadd.s32 4294967294, %s6788_s30   ;;  %p48_p0 = scmp.ne.s32.totalorder %s6780_s28, %s6776_s27 }
   0xe   : > { %p9632_p1 = scmp.eq.s32.totalorder %s6868_s9, 0  ;;  %p230_p3 = scmp.eq.s32.totalorder %s5739_s10, 1 }
   0xf   : > { %p5740_p5 = scmp.ge.s32.totalorder %s6788_s30, 1  ;;  %p237_p7 = scmp.lt.s32.totalorder %s6788_s30, 3 }
  0x10   : > { %p6877_p4 = por %p9632_p1, %p48_p0  ;;  %p6882_p6 = por %p230_p3, %p48_p0 }
  0x11   : > { %p6887_p8 = pnand %p5740_p5, %p237_p7  ;;  %s6790_s14 = smov [#allocation8]  }
  0x12   : > { %s9652_s11 = scalar_select %p6877_p4, 1, 0 }
  0x13   : > { %s9653_s12 = scalar_select %p6882_p6, 1, 0 }
  0x14   : > { %s249_s15 = sshll.u32 %s6790_s14, 4  ;;  %p6309_p9 = pneg %p6887_p8  ;;  %s6891_s15 = int_to_ptr.vmem [resolvable:$true] %s249_s15 }
  0x15   : > { %s6791_s17 = smov [#allocation9]   ;;  %s9656_s2 = sld [smem:[#allocation38_spill]] }
  0x16   : > { %p6898_p11 = pnand %p6309_p9, %p9632_p1  ;;  %s272_s18 = sshll.u32 %s6791_s17, 4  ;;  %s6902_s18 = int_to_ptr.vmem [resolvable:$true] %s272_s18 }
  0x18   : > { %p6596_p13 = pneg %p6898_p11 }
  0x1b   : > { %s6594_s21 = scalar_lea.hbm %s9656_s2, 256 }
  0x1c   : > { %p6595_p12 = scmp.ne.s32.totalorder %s9656_s2, %s6594_s21  ;;  %p6601_p5 = scmp.lt.u32.totalorder %s6594_s21, %s9656_s2 }
  0x1e   : > { %p6597_p0 = pnand %p6596_p13, %p6595_p12 }
  0x20   : > { %p6598_p3 = pneg %p6597_p0 }
  0x22   : > { %p6603_p7 = pnand %p6601_p5, %p6598_p3 }
  0x24   : > { %6606 = shalt.err (!%p6603_p7)
}
  0x25   : > { %s6607_s26 = scalar_lea.vmem %s6891_s15, 256  ;;  %p6615_p2 = scmp.lt.s32.totalorder %s6891_s15, %s6891_s15 }
  0x26   : > { %p6608_p9 = scmp.ne.s32.totalorder %s6891_s15, %s6607_s26  ;;  %p6616_p12 = scmp.lt.s32.totalorder %s6607_s26, %s6607_s26 }
  0x28   : > { %p6610_p10 = pnand %p6608_p9, %p6596_p13  ;;  %p6617_p0 = por %p6616_p12, %p6615_p2 }
  0x2a   : > { %p6611_p1 = pneg %p6610_p10 }
  0x2c   : > { %p6618_p6 = pnand %p6617_p0, %p6611_p1 }
  0x2e   : > { %6621 = shalt.err (!%p6618_p6)
}
  0x2f   : > { %s9633_s10 = smov 128   ;;  %s9635_s14 = smov 8  }
  0x30   : > { %6312 = dma.hbm_to_vmem [thread:$0]  (!%p6898_p11), %s9656_s2, 256, %s6891_s15, [#allocation7], %s9633_s10, %s9633_s10, %s9635_s14  }
  0x31   : > { %s9657_s6 = sld [smem:[#allocation39_spill]] }
  0x37   : > { %s6622_s22 = scalar_lea.hbm %s9657_s6, 128 }
  0x38   : > { %p6623_p1 = scmp.ne.s32.totalorder %s9657_s6, %s6622_s22  ;;  %p6629_p10 = scmp.lt.u32.totalorder %s6622_s22, %s9657_s6 }
  0x3a   : > { %p6625_p2 = pnand %p6623_p1, %p6596_p13 }
  0x3c   : > { %p6626_p6 = pneg %p6625_p2 }
  0x3e   : > { %p6631_p3 = pnand %p6629_p10, %p6626_p6 }
  0x40   : > { %6634 = shalt.err (!%p6631_p3)
}
  0x41   : > { %s6635_s15 = scalar_lea.vmem %s6902_s18, 128  ;;  %p6643_p12 = scmp.lt.s32.totalorder %s6902_s18, %s6902_s18 }
  0x42   : > { %p6636_p5 = scmp.ne.s32.totalorder %s6902_s18, %s6635_s15  ;;  %p6644_p0 = scmp.lt.s32.totalorder %s6635_s15, %s6635_s15 }
  0x44   : > { %p6638_p7 = pnand %p6636_p5, %p6596_p13  ;;  %p6645_p1 = por %p6644_p0, %p6643_p12 }
  0x46   : > { %p6639_p9 = pneg %p6638_p7 }
  0x48   : > { %p6646_p2 = pnand %p6645_p1, %p6639_p9 }
  0x4a   : > { %6649 = shalt.err (!%p6646_p2)
}
  0x4b   : > { %6315 = dma.hbm_to_vmem [thread:$0]  (!%p6898_p11), %s9657_s6, 128, %s6902_s18, [#allocation10]  }
  0x4c   : > { %s6960_s20 = sadd.s32 1, %s6788_s30   ;;  %s35_s16 = sadd.s32 1, %s6784_s29 }
  0x4d   : > { %s32_s21 = ssub.s32 %s6788_s30, %s6960_s20  ;;  %p42_p13 = scmp.ne.s32.totalorder %s6784_s29, %s6780_s28 }
  0x4e   : > { %p33_p6 = scmp.eq.s32.totalorder %s32_s21, 0  ;;  %p43_p10 = scmp.eq.s32.totalorder %s6788_s30, 0 }
  0x4f   : > { %p9658_p3 = scmp.eq.s32.totalorder %s6868_s9, 1  ;;  %p6329_p7 = scmp.lt.s32.totalorder %s6788_s30, 2 }
  0x50   : > { %s6976_s23 = scalar_select %p33_p6, %s6784_s29, %s35_s16  }
  0x51   : > { %p6970_p5 = por %p9658_p3, %p42_p13  ;;  %p44_p9 = por %p43_p10, %p42_p13 }
  0x52   : > { %9660 = sst [smem:[#allocation18_spill]] %s6976_s23  ;;  %s286_s24 = sand.u32 1, %s6784_s29  }
  0x53   : > { %s9659_s22 = scalar_select %p6970_p5, 1, 0 }
  0x54   : > { %s5744_s25 = sshll.u32 %s286_s24, 7  ;;  %s5819_s18 = sshll.u32 %s6788_s30, 11 }
  0x55   : > { %s9661_s0 = sld [smem:[#allocation37_spill]]  ;;  %s290_s19 = scalar_lea.vmem [#allocation3], %s5744_s25 }
  0x56   : > { %s297_s21 = sshll.u32 %s290_s19, 4  ;;  %p6987_p11 = pnand %p6329_p7, %p44_p9  ;;  %s6985_s21 = int_to_ptr.vmem [resolvable:$true] %s297_s21 }
  0x57   : > { %s6994_s26 = scalar_lea.hbm %s9624_s1, %s5819_s18  ;;  %s311_s15 = scalar_lea.vmem [#allocation6], %s5744_s25 }
  0x58   : > { %s6996_s2 = sshll.u32 %s311_s15, 4  ;;  %s6998_s6 = scalar_lea.sflag [#allocation4], %s286_s24  ;;  %s7030_s2 = int_to_ptr.vmem [resolvable:$true] %s6996_s2 }
  0x59   : > { %p6652_p0 = pneg %p6987_p11 }
  0x5b   : > { %s6983_s17 = scalar_lea.hbm %s9661_s0, %s5819_s18  ;;  %s6655_s10 = scalar_lea.hbm %s9661_s0, 4096 }
  0x5c   : > { %s6650_s19 = scalar_lea.hbm %s6983_s17, 2048  ;;  %p6656_p13 = scmp.lt.u32.totalorder %s6983_s17, %s9661_s0 }
  0x5d   : > { %p6651_p12 = scmp.ne.s32.totalorder %s6983_s17, %s6650_s19  ;;  %p6657_p6 = scmp.lt.u32.totalorder %s6655_s10, %s6650_s19 }
  0x5e   : > { %p6659_p3 = scmp.lt.u32.totalorder %s6650_s19, %s6983_s17 }
  0x5f   : > { %p6653_p1 = pnand %p6652_p0, %p6651_p12  ;;  %p6658_p10 = por %p6657_p6, %p6656_p13 }
  0x61   : > { %p6654_p2 = pneg %p6653_p1  ;;  %p6660_p7 = por %p6659_p3, %p6658_p10 }
  0x63   : > { %p6661_p9 = pnand %p6660_p7, %p6654_p2 }
  0x65   : > { %6664 = shalt.err (!%p6661_p9)
}
  0x66   : > { %s6665_s24 = scalar_lea.vmem %s6985_s21, 2048  ;;  %s6794_s29 = smov [#allocation3]  }
  0x67   : > { %p6666_p12 = scmp.ne.s32.totalorder %s6985_s21, %s6665_s24  ;;  %s6670_s23 = sshll.u32 %s6794_s29, 4  ;;  %s6671_s23 = int_to_ptr.vmem [resolvable:$false] %s6670_s23 }
  0x68   : > { %s6672_s25 = scalar_lea.vmem %s6671_s23, 4096  ;;  %p6673_p4 = scmp.lt.s32.totalorder %s6985_s21, %s6671_s23 }
  0x69   : > { %p6668_p1 = pnand %p6666_p12, %p6652_p0  ;;  %p6674_p13 = scmp.lt.s32.totalorder %s6672_s25, %s6665_s24 }
  0x6b   : > { %p6669_p5 = pneg %p6668_p1  ;;  %p6675_p6 = por %p6674_p13, %p6673_p4 }
  0x6d   : > { %p6676_p10 = pnand %p6675_p6, %p6669_p5 }
  0x6f   : > { %6679 = shalt.err (!%p6676_p10)
}
  0x70   : > { %s9663_s15 = smov 8   ;;  %s9664_s19 = smov 128  }
  0x71   : > { %6319 = dma.hbm_to_vmem [thread:$0]  (!%p6987_p11), %s6983_s17, 2048, %s6985_s21, %s6998_s6, %s9664_s19, %s9664_s19, %s9663_s15  }
  0x72   : > { %s307_s10 = sand.u32 1, %s6788_s30   ;;  %s6680_s18 = scalar_lea.hbm %s6994_s26, 2048 }
  0x73   : > { %s7033_s14 = scalar_lea.sflag [#allocation7], %s307_s10  ;;  %p6681_p4 = scmp.ne.s32.totalorder %s6994_s26, %s6680_s18 }
  0x74   : > { %s6685_s23 = scalar_lea.hbm %s9624_s1, 4096  ;;  %p6686_p3 = scmp.lt.u32.totalorder %s6994_s26, %s9624_s1 }
  0x75   : > { %p6683_p5 = pnand %p6681_p4, %p6652_p0  ;;  %p6687_p7 = scmp.lt.u32.totalorder %s6685_s23, %s6680_s18 }
  0x76   : > { %p6689_p12 = scmp.lt.u32.totalorder %s6680_s18, %s6994_s26 }
  0x77   : > { %p6684_p2 = pneg %p6683_p5  ;;  %p6688_p9 = por %p6687_p7, %p6686_p3 }
  0x79   : > { %p6690_p1 = por %p6689_p12, %p6688_p9 }
  0x7b   : > { %p6691_p13 = pnand %p6690_p1, %p6684_p2 }
  0x7d   : > { %6694 = shalt.err (!%p6691_p13)
}
  0x7e   : > { %s6695_s6 = scalar_lea.vmem %s7030_s2, 2048  ;;  %s6795_s17 = smov [#allocation6]  }
  0x7f   : > { %p6696_p6 = scmp.ne.s32.totalorder %s7030_s2, %s6695_s6  ;;  %s6700_s21 = sshll.u32 %s6795_s17, 4  ;;  %s6701_s21 = int_to_ptr.vmem [resolvable:$false] %s6700_s21 }
  0x80   : > { %s6702_s0 = scalar_lea.vmem %s6701_s21, 4096  ;;  %p6703_p5 = scmp.lt.s32.totalorder %s7030_s2, %s6701_s21 }
  0x81   : > { %p6698_p10 = pnand %p6696_p6, %p6652_p0  ;;  %p6704_p3 = scmp.lt.s32.totalorder %s6702_s0, %s6695_s6 }
  0x83   : > { %p6699_p4 = pneg %p6698_p10  ;;  %p6705_p7 = por %p6704_p3, %p6703_p5 }
  0x85   : > { %p6706_p9 = pnand %p6705_p7, %p6699_p4 }
  0x87   : > { %6709 = shalt.err (!%p6706_p9)
}
  0x88   : > { %6322 = dma.hbm_to_vmem [thread:$0]  (!%p6987_p11), %s6994_s26, 2048, %s7030_s2, %s7033_s14, %s9664_s19, %s9664_s19, %s9663_s15  }
  0x89   : > { %330 = sbr.rel (%p6887_p8) target bundleno = 850 (0x352), region = 52 }
  0x90   : > { %s7065_s10 = sand.u32 1, %s6780_s28   ;;  %p9665_p0 = scmp.ne.s32.totalorder %s9652_s11, 0 }
  0x91   : > { %s7068_s18 = sshll.u32 %s7065_s10, 7  ;;  %s333_s16 = scalar_lea.sflag [#allocation4], %s7065_s10 }
  0x92   : > { %s7072_s24 = scalar_lea.vmem [#allocation3], %s7068_s18 }
  0x93   : > { %6755 = dma.done.wait (%p9665_p0), %s333_s16, 2048  }
  0x94   : > { %6757 = vsyncadd (%p9665_p0), %s333_s16, 4294965248  ;;  %s341_s2 = sand.u32 1, %s6868_s9   ;;  %s7080_s26 = scalar_lea.vmem [#allocation6], %s7068_s18 }
  0x95   : > { %s342_s13 = scalar_lea.sflag [#allocation7], %s341_s2 }
  0x96   : > { %6759 = dma.done.wait (%p9665_p0), %s342_s13, 2048  }
  0x97   : > { %6761 = vsyncadd (%p9665_p0), %s342_s13, 4294965248  ;;  %p9666_p8 = scmp.eq.s32.totalorder %s6868_s9, 0 }
  0x99   : > { %6763 = dma.done.wait (%p9666_p8), [#allocation7], 256   ;;  %p9667_p11 = pmov %p9666_p8 }
  0x9a   : > { %p9668_p2 = pmov %p9666_p8 }
  0x9b   : > { %6765 = vsyncadd (%p9667_p11), [#allocation7], 4294967040 }
  0x9c   : > { %6767 = dma.done.wait (%p9668_p2), [#allocation10], 128   ;;  %p9669_p12 = pmov %p9668_p2 }
  0x9d   : > { %v415_v0 = vlaneseq  ;;  %v9640_v1 = vmov 0.0   ;;  %vm6797_vm0 = vmmov 0   ;;  %vm424_vm1 = vcmask 261120   ;;  %v411_v3 = vld [vmem:[%s9628_s5] sm:$0x1]  ;;  %v408_v10 = vld [vmem:[%s9627_s4 + $0x8] sm:$0xff] }
  0x9e   : > { %6769 = vsyncadd (%p9669_p12), [#allocation10], 4294967168  ;;  %5958 = vmatprep.subr.mxu1 %v9640_v1  ;;  %5960 = vmatprep.mubr.msk.f32.mxu1 %vm6797_vm0, %v9640_v1  ;;  %v535_v4 = vld [vmem:[%s9630_s7] sm:$0x1]  ;;  %v412_v6 = vmax.f32 %v411_v3, 0.0  ;;  %v409_v11 = vld [vmem:[%s9627_s4 + $0x10] sm:$0xff] }
  0x9f   : > { %v416_v2 = vshrl.u32 %v415_v0, 7  ;;  %vm7105_vm2 = vmpackc.low %vm424_vm1, %vm424_vm1  ;;  %v536_v8 = vmax.f32 %v535_v4, 0.0  ;;  %v407_v9 = vld [vmem:[%s9627_s4] sm:$0xff]  ;;  %v410_v13 = vld [vmem:[%s9627_s4 + $0x18] sm:$0xff]  ;;  %vm545_vm3 = vcmask 64512   ;;  %v6798_v30 = vmov 0  }
  0xa0   : > { %v6187_v12 = vpack.c.bf16 %v408_v10, %v407_v9  ;;  %v413_v14 = vmin.f32 %v412_v6, 1.0  ;;  %v6193_v16 = vpack.c.bf16 %v410_v13, %v409_v11  ;;  %v534_v17 = vld [vmem:[#allocation9] sm:$0xff]  ;;  %v622_v22 = vld [vmem:[%s7072_s24] sm:$0xff]  ;;  %v394_v29 = vld [vmem:[%s9626_s3 + $0x8] sm:$0xff]  ;;  %6374 = vset.pattern.permute.xlu0 %v6798_v30  ;;  %vm1810_vm4 = vcmask 1041409   ;;  %s8572_s19 = scalar_lea.vmem [#allocation11], %s7068_s18 }
  0xa1   : > { %v417_v7 = vsub.s32 0, %v416_v2  ;;  %v537_v15 = vmin.f32 %v536_v8, 1.0  ;;  %v628_v26 = vld [vmem:[%s7072_s24 + $0x30] sm:$0xff]  ;;  %v393_v27 = vld [vmem:[%s9626_s3] sm:$0xff]  ;;  %v396_v31 = vsub.f32 0.0, %v394_v29  ;;  %vm1813_vm5 = vcmask 1042434  }
  0xa2   : > { %6189 = vmatprep.subr.msk.bf16.mxu0 %vm7105_vm2, %v6187_v12  ;;  %v395_v28 = vsub.f32 0.0, %v393_v27  ;;  %v1778_v38 = vld [vmem:[%s7072_s24 + $0x8] sm:$0x1]  ;;  %v1779_v40 = vld [vmem:[%s7072_s24 + $0x10] sm:$0x1]  ;;  %vm1816_vm6 = vcmask 1043459  }
  0xa3   : > { %v418_v18 = vrot.slane %v413_v14, %v417_v7  ;;  %v542_v19 = vrot.slane %v537_v15, %v417_v7  ;;  %6192 = vmatpush3.bf16.xpose.msk.msra.mxu0 %vm7105_vm2, %v6187_v12  ;;  %v399_v33 = vmul.f32 1.442695, %v396_v31  ;;  %v1786_v39 = vld [vmem:[%s7072_s24 + $0x48] sm:$0x1]  ;;  %v1787_v41 = vld [vmem:[%s7072_s24 + $0x50] sm:$0x1] }
  0xa4   : > { %6195 = vmatprep.subr.msk.bf16.mxu0 %vm7105_vm2, %v6193_v16  ;;  %v397_v32 = vmul.f32 1.442695, %v395_v28  ;;  %v1809_v42 = vrot.slane %v1778_v38, 7  ;;  %v1830_v43 = vrot.slane %v1786_v39, 7  ;;  %v1777_v45 = vld [vmem:[%s7072_s24] sm:$0x1] }
  0xa5   : > { %v544_v20 = vmul.f32 %v542_v19, %v534_v17  ;;  %v420_v21 = vmul.f32 %v418_v18, %v407_v9  ;;  %v421_v23 = vmul.f32 %v418_v18, %v408_v10  ;;  %v422_v24 = vmul.f32 %v418_v18, %v409_v11  ;;  %v1785_v46 = vld [vmem:[%s7072_s24 + $0x40] sm:$0x1]  ;;  %v1780_v49 = vld [vmem:[%s7072_s24 + $0x18] sm:$0x1]  ;;  %v2279_v55 = vld [vmem:[%s7072_s24 + $0x9] sm:$0x1] }
  0xa6   : > { %v423_v25 = vmul.f32 %v418_v18, %v410_v13  ;;  %6375 = vpow2.f32 %v397_v32  ;;  %v1788_v50 = vld [vmem:[%s7072_s24 + $0x58] sm:$0x1]  ;;  %v1812_v51 = vrot.slane %v1779_v40, 6  ;;  %v1832_v52 = vrot.slane %v1787_v41, 6  ;;  %v2287_v56 = vld [vmem:[%s7072_s24 + $0x49] sm:$0x1] }
  0xa7   : > { %5959 = vmatpush3.xpose.msk.msra.mxu1 %vm545_vm3, %v544_v20  ;;  %5952 = vmatprep.mubr.msk.f32.mxu0 %vm424_vm1, %v420_v21  ;;  %6377 = vpow2.f32 %v399_v33  ;;  %v1811_v53 = vsel %vm1810_vm4, %v1809_v42, %v1777_v45  ;;  %v1831_v54 = vsel %vm1810_vm4, %v1830_v43, %v1785_v46  ;;  %v1781_v58 = vld [vmem:[%s7072_s24 + $0x20] sm:$0x1]  ;;  %v1782_v59 = vld [vmem:[%s7072_s24 + $0x28] sm:$0x1]  ;;  %v1815_v61 = vrot.slane %v1780_v49, 5  ;;  %s5821_s18 = sshll.u32 %s6868_s9, 11 }
  0xa8   : > { %5963 = vmatprep.subr.mxu1 %v9640_v1  ;;  %v1789_v60 = vld [vmem:[%s7072_s24 + $0x60] sm:$0x1]  ;;  %v1834_v62 = vrot.slane %v1788_v50, 5  ;;  %v1790_v63 = vld [vmem:[%s7072_s24 + $0x68] sm:$0x1]  ;;  %v1814_v0 = vsel %vm1813_vm5, %v1812_v51, %v1811_v53  ;;  %v1833_v2 = vsel %vm1813_vm5, %v1832_v52, %v1831_v54  ;;  %v2310_v5 = vrot.slane %v2279_v55, 7  ;;  %s9558_s14 = scalar_lea.hbm %s9631_s8, %s5821_s18 }
  0xa9   : > { %v7170_v3 = vld [vmem:[%s7072_s24 + $0x11] sm:$0x1]  ;;  %v2324_v6 = vrot.slane %v2287_v56, 7  ;;  %v7174_v7 = vld [vmem:[%s7072_s24 + $0x30] sm:$0x1]  ;;  %v1818_v11 = vrot.slane %v1781_v58, 4  ;;  %v1817_v13 = vsel %vm1816_vm6, %v1815_v61, %v1814_v0 }
  0xaa   : > { %5961 = vmatmul.mubr.msk.f32.vlgmr.msra.gmra.mrb[0].mxu1 %vm545_vm3, %v534_v17  ;;  %v2288_v4 = vld [vmem:[%s7072_s24 + $0x51] sm:$0x1]  ;;  %v7177_v8 = vld [vmem:[%s7072_s24 + $0x1] sm:$0x1]  ;;  %v7183_v10 = vld [vmem:[%s7072_s24 + $0x38] sm:$0x1]  ;;  %v1835_v14 = vsel %vm1816_vm6, %v1834_v62, %v1833_v2 }
  0xab   : > { %6198 = vmatpush3.bf16.xpose.msk.msra.mxu0 %vm7105_vm2, %v6193_v16  ;;  %5964 = vmatpush3.msra.mxu1 %v622_v22  ;;  %v7180_v9 = vld [vmem:[%s7072_s24 + $0x41] sm:$0x1]  ;;  %vm1819_vm7 = vcmask 1044484   ;;  %v1836_v12 = vrot.slane %v1789_v60, 4  ;;  %v7188_v15 = vld [vmem:[%s7072_s24 + $0x19] sm:$0x1]  ;;  %v2311_v21 = vsel %vm1810_vm4, %v2310_v5, %v7177_v8 }
  0xac   : > { %5993 = vmatprep.subr.mxu0 %v9640_v1  ;;  %5965 = vmatprep.mubr.msk.f32.mxu1 %vm6797_vm0, %v9640_v1  ;;  %v7191_v16 = vld [vmem:[%s7072_s24 + $0x59] sm:$0x1]  ;;  %v2312_v17 = vrot.slane %v7170_v3, 6  ;;  %v2326_v18 = vrot.slane %v2288_v4, 6  ;;  %v1791_v19 = vld [vmem:[%s7072_s24 + $0x70] sm:$0x1]  ;;  %v2325_v22 = vsel %vm1810_vm4, %v2324_v6, %v7180_v9 }
  0xad   : > { %5968 = vmatprep.subr.mxu1 %v9640_v1  ;;  %v1821_v20 = vrot.slane %v1782_v59, 3  ;;  %vm1822_vm8 = vcmask 1045509   ;;  %vm1825_vm9 = vcmask 1046534   ;;  %v1837_v27 = vsel %vm1819_vm7, %v1836_v12, %v1835_v14  ;;  %v7204_v28 = vld [vmem:[%s7072_s24 + $0x21] sm:$0x1]  ;;  %v623_v32 = vld [vmem:[%s7072_s24 + $0x8] sm:$0xff] }
  0xae   : > { %v7207_v29 = vld [vmem:[%s7072_s24 + $0x61] sm:$0x1]  ;;  %v2314_v30 = vrot.slane %v7188_v15, 5  ;;  %v2328_v31 = vrot.slane %v7191_v16, 5  ;;  %v7213_v33 = vld [vmem:[%s7072_s24 + $0x78] sm:$0x1] }
  0xaf   : > { %vm1828_vm10 = vcmask 1047559   ;;  %v630_v38 = vld [vmem:[%s7072_s24 + $0x40] sm:$0xff]  ;;  %v7222_v39 = vld [vmem:[%s7072_s24 + $0x31] sm:$0x1]  ;;  %v3231_v40 = vld [vmem:[%s7072_s24 + $0xb] sm:$0x1] }
  0xb0   : > { %v6376_v34 = vpop.eup %6375  ;;  %v7226_v41 = vld [vmem:[%s7072_s24 + $0x4b] sm:$0x1]  ;;  %v7234_v45 = vld [vmem:[%s7072_s24 + $0x69] sm:$0x1]  ;;  %v2316_v46 = vrot.slane %v7204_v28, 4  ;;  %v1842_v49 = vrot.slane %v7213_v33, 1 }
  0xb1   : > { %v6378_v35 = vpop.eup %6377  ;;  %v401_v36 = vadd.f32 1.0, %v6376_v34  ;;  %v1840_v34 = vrot.slane %v1791_v19, 2  ;;  %v7242_v50 = vld [vmem:[%s7072_s24 + $0x71] sm:$0x1]  ;;  %v7247_v53 = vld [vmem:[%s7072_s24 + $0x13] sm:$0x1] }
  0xb2   : > { %5953 = vmatmul.mubr.msk.f32.vlgmr.msra.gmra.mrb[0].mxu0 %vm424_vm1, %v421_v23  ;;  %v402_v37 = vadd.f32 1.0, %v6378_v35  ;;  %v1824_v23 = vrot.slane %v7174_v7, 2  ;;  %v7216_v35 = vld [vmem:[%s7072_s24 + $0x29] sm:$0x1]  ;;  %v624_v55 = vld [vmem:[%s7072_s24 + $0x10] sm:$0xff]  ;;  %v3262_v58 = vrot.slane %v3231_v40, 7 }
  0xb3   : > { %5955 = vmatprep.mubr.msk.f32.mxu0 %vm424_vm1, %v422_v24  ;;  %5994 = vmatpush3.msra.mxu0 %v628_v26  ;;  %6379 = vrcp.f32 %v401_v36  ;;  %v1827_v24 = vrot.slane %v7183_v10, 1  ;;  %v1820_v26 = vsel %vm1819_vm7, %v1818_v11, %v1817_v13  ;;  %v2313_v36 = vsel %vm1813_vm5, %v2312_v17, %v2311_v21  ;;  %v632_v60 = vld [vmem:[%s7072_s24 + $0x50] sm:$0xff]  ;;  %v3230_v2 = vld [vmem:[%s7072_s24 + $0x3] sm:$0x1]  ;;  %v7272_v5 = vld [vmem:[%s7072_s24 + $0x79] sm:$0x1] }
  0xb4   : > { %6003 = vmatprep.subr.mxu0 %v9640_v1  ;;  %6381 = vrcp.f32 %v402_v37  ;;  %v2327_v37 = vsel %vm1813_vm5, %v2326_v18, %v2325_v22  ;;  %v1823_v42 = vsel %vm1822_vm8, %v1821_v20, %v1820_v26  ;;  %v2315_v51 = vsel %vm1816_vm6, %v2314_v30, %v2313_v36  ;;  %v7268_v4 = vld [vmem:[%s7072_s24 + $0x43] sm:$0x1]  ;;  %v7279_v13 = vld [vmem:[%s7072_s24 + $0x1b] sm:$0x1]  ;;  %v7303_v22 = vld [vmem:[%s7072_s24 + $0x2b] sm:$0x1] }
  0xb5   : > { %v2329_v52 = vsel %vm1816_vm6, %v2328_v31, %v2327_v37  ;;  %v2318_v56 = vrot.slane %v7216_v35, 3  ;;  %v3276_v59 = vrot.slane %v7226_v41, 7  ;;  %v1826_v61 = vsel %vm1825_vm9, %v1824_v23, %v1823_v42  ;;  %v7285_v14 = vld [vmem:[%s7072_s24 + $0x23] sm:$0x1]  ;;  %v7288_v17 = vld [vmem:[%s7072_s24 + $0x5b] sm:$0x1] }
  0xb6   : > { %5956 = vmatmul.mubr.msk.f32.gmra.mrb[2].mxu0 %vm424_vm1, %v423_v25  ;;  %v1838_v25 = vrot.slane %v1790_v63, 3  ;;  %v2320_v63 = vrot.slane %v7222_v39, 2  ;;  %v2332_v0 = vrot.slane %v7234_v45, 3  ;;  %v2317_v6 = vsel %vm1819_vm7, %v2316_v46, %v2315_v51  ;;  %9672 = vst [vmem:[#allocation19_spill] sm:$0xff] %v7288_v17  ;;  %v625_v20 = vld [vmem:[%s7072_s24 + $0x18] sm:$0xff]  ;;  %v634_v42 = vld [vmem:[%s7072_s24 + $0x60] sm:$0xff] }
  0xb7   : > { %5995 = vmatprep.mubr.msk.f32.mxu0 %vm6797_vm0, %v9640_v1  ;;  %v2334_v12 = vrot.slane %v7242_v50, 2  ;;  %v3264_v18 = vrot.slane %v7247_v53, 6  ;;  %v7300_v21 = vsel %vm1828_vm10, %v1827_v24, %v1826_v61  ;;  %v7306_v23 = vld [vmem:[%s7072_s24 + $0x33] sm:$0x1]  ;;  %v3277_v26 = vsel %vm1810_vm4, %v3276_v59, %v7268_v4  ;;  %v7320_v31 = vld [vmem:[%s7072_s24 + $0x3b] sm:$0x1] }
  0xb8   : > { %v1839_v43 = vsel %vm1822_vm8, %v1838_v25, %v1837_v27  ;;  %v3263_v25 = vsel %vm1810_vm4, %v3262_v58, %v3230_v2  ;;  %v4183_v27 = vld [vmem:[%s7072_s24 + $0xd] sm:$0x1]  ;;  %v2319_v24 = vsel %vm1822_vm8, %v2318_v56, %v2317_v6  ;;  %v7326_v33 = vld [vmem:[%s7072_s24 + $0x6b] sm:$0x1]  ;;  %v7331_v36 = vld [vmem:[%s7072_s24 + $0x73] sm:$0x1] }
  0xb9   : > { %v1841_v62 = vsel %vm1825_vm9, %v1840_v34, %v1839_v43  ;;  %9674 = vst [vmem:[#allocation21_spill] sm:$0xff] %v7326_v33  ;;  %v2336_v34 = vrot.slane %v7272_v5, 1  ;;  %9675 = vst [vmem:[#allocation22_spill] sm:$0xff] %v7331_v36  ;;  %v3266_v37 = vrot.slane %v7279_v13, 5  ;;  %v3280_v40 = vrot.slane %v7288_v17, 5  ;;  %s5611_s29 = scalar_lea.sflag [#allocation5], %s7065_s10 }
  0xba   : > { %v7315_v10 = vsel %vm1828_vm10, %v1842_v49, %v1841_v62  ;;  %v7341_v46 = vld [vmem:[%s7072_s24 + $0x7b] sm:$0x1]  ;;  %v3270_v49 = vrot.slane %v7303_v22, 3  ;;  %v4214_v53 = vrot.slane %v4183_v27, 7  ;;  %vm1846_vm11 = vcmask 130048   ;;  %p9775_p13 = scmp.ne.s32.totalorder %s9659_s22, 0 }
  0xbb   : > { %9676 = vst [vmem:[#allocation23_spill] sm:$0xff] %v7341_v46  ;;  %v2321_v56 = vsel %vm1825_vm9, %v2320_v63, %v2319_v24  ;;  %v4182_v61 = vld [vmem:[%s7072_s24 + $0x5] sm:$0x1]  ;;  %v4191_v62 = vld [vmem:[%s7072_s24 + $0x4d] sm:$0x1]  ;;  %v9677_v22 = vmov 0.0  }
  0xbc   : > { %v7572_v17 = vld [vmem:[%s7072_s24 + $0x27] sm:$0x1]  ;;  %vm2261_vm12 = vcmask 253952   ;;  %s6799_s25 = smov [#allocation11]  }
  0xbd   : > { %v6380_v44 = vpop.eup %6379  ;;  %s6714_s6 = sshll.u32 %s6799_s25, 4  ;;  %s6715_s6 = int_to_ptr.vmem [resolvable:$false] %s6714_s6 }
  0xbe   : > { %v6382_v47 = vpop.eup %6381  ;;  %v404_v48 = vmul.f32 0.5, %v6380_v44  ;;  %v7231_v44 = vld [vmem:[%s7072_s24 + $0x39] sm:$0x1]  ;;  %s6716_s17 = scalar_lea.vmem %s6715_s6, 4096 }
  0xbf   : > { %v406_v57 = vmul.f32 0.5, %v6382_v47  ;;  %v2330_v47 = vrot.slane %v7207_v29, 4  ;;  %v2322_v7 = vrot.slane %v7231_v44, 1 }
  0xc0   : > { %2009 = vperm.xlu0 %6374, %v404_v48  }
  0xc1   : > { %v2331_v11 = vsel %vm1819_vm7, %v2330_v47, %v2329_v52  ;;  %v3265_v47 = vsel %vm1813_vm5, %v3264_v18, %v3263_v25  ;;  %v4184_v52 = vld [vmem:[%s7072_s24 + $0x15] sm:$0x1]  ;;  %v2756_v18 = vld [vmem:[%s7072_s24 + $0x12] sm:$0x1] }
  0xc2   : > { %v2333_v30 = vsel %vm1822_vm8, %v2332_v0, %v2331_v11  ;;  %v636_v0 = vld [vmem:[%s7072_s24 + $0x70] sm:$0xff]  ;;  %v3284_v11 = vrot.slane %v7326_v33, 3  ;;  %v3267_v13 = vsel %vm1816_vm6, %v3266_v37, %v3265_v47  ;;  %v4216_v25 = vrot.slane %v4184_v52, 6  ;;  %v2762_v33 = vld [vmem:[%s7072_s24 + $0x42] sm:$0x1] }
  0xc3   : > { %v2335_v58 = vsel %vm1825_vm9, %v2334_v12, %v2333_v30  ;;  %v7370_v12 = vld [vmem:[%s7072_s24 + $0x1d] sm:$0x1]  ;;  %v7392_v30 = vld [vmem:[%s7072_s24 + $0x2d] sm:$0x1]  ;;  %v4192_v37 = vld [vmem:[%s7072_s24 + $0x55] sm:$0x1] }
  0xc4   : > { %2014 = vperm.xlu0 %6374, %v406_v57   ;;  %v7256_v57 = vld [vmem:[%s7072_s24 + $0x53] sm:$0x1]  ;;  %v7389_v27 = vsel %vm1828_vm10, %v2336_v34, %v2335_v58  ;;  %v7403_v47 = vld [vmem:[%s7072_s24 + $0x35] sm:$0x1]  ;;  %v7413_v58 = vld [vmem:[%s7072_s24 + $0x3d] sm:$0x1] }
  0xc5   : > { %v3278_v19 = vrot.slane %v7256_v57, 6  ;;  %v7441_v34 = vld [vmem:[%s7072_s24 + $0x7d] sm:$0x1] }
  0xc7   : > { %v3279_v51 = vsel %vm1813_vm5, %v3278_v19, %v3277_v26  ;;  %v7377_v19 = vld [vmem:[%s7072_s24 + $0x25] sm:$0x1]  ;;  %v7386_v26 = vsel %vm1828_vm10, %v2322_v7, %v2321_v56  ;;  %v627_v7 = vld [vmem:[%s7072_s24 + $0x28] sm:$0xff] }
  0xc8   : > { %v4220_v6 = vrot.slane %v7377_v19, 4 }
 0x17d   : > { %v7238_v48 = vpop.f32.mrb[0].mxu1 }
 0x17e   : > { %v5962_v54 = vpop.f32.mrb[1].mxu1  ;;  %5966 = vmatmul.mubr.msk.f32.vlgmr.msra.gmra.mrb[2].mxu1 %vm545_vm3, %v7238_v48  ;;  %5996 = vmatmul.mubr.msk.f32.vlgmr.msra.gmra.mrb[4].mxu0 %vm545_vm3, %v7238_v48 }
 0x17f   : > { %5969 = vmatpush3.msra.mxu1 %v623_v32  ;;  %5970 = vmatprep.mubr.msk.f32.mxu1 %vm6797_vm0, %v9640_v1  ;;  %v7323_v32 = vld [vmem:[%s7072_s24 + $0x63] sm:$0x1] }
 0x180   : > { %5973 = vmatprep.subr.mxu1 %v9640_v1  ;;  %6004 = vmatpush3.msra.mxu0 %v630_v38  ;;  %9673 = vst [vmem:[#allocation20_spill] sm:$0xff] %v7323_v32  ;;  %v3268_v38 = vrot.slane %v7285_v14, 4  ;;  %v626_v54 = vld [vmem:[%s7072_s24 + $0x20] sm:$0xff]  ;;  %v3282_v63 = vrot.slane %v7323_v32, 4  ;;  %v3281_v14 = vsel %vm1816_vm6, %v3280_v40, %v3279_v51  ;;  %v4215_v40 = vsel %vm1810_vm4, %v4214_v53, %v4182_v61  ;;  %v7406_v51 = vld [vmem:[%s7072_s24 + $0x5d] sm:$0x1] }
 0x181   : > { %6005 = vmatprep.mubr.msk.f32.mxu0 %vm6797_vm0, %v9640_v1  ;;  %6013 = vmatprep.subr.mxu0 %v9640_v1  ;;  %v2763_v61 = vld [vmem:[%s7072_s24 + $0x4a] sm:$0x1]  ;;  %v5145_v32 = vld [vmem:[%s7072_s24 + $0x5f] sm:$0x1] }
 0x182   : > { %5971 = vmatmul.mubr.msk.f32.vlgmr.msra.gmra.mrb[4].mxu1 %vm545_vm3, %v7238_v48  ;;  %6006 = vmatmul.mubr.msk.f32.vlgmr.msra.gmra.mrb[6].mxu0 %vm545_vm3, %v7238_v48  ;;  %v3269_v53 = vsel %vm1819_vm7, %v3268_v38, %v3267_v13  ;;  %v3283_v56 = vsel %vm1819_vm7, %v3282_v63, %v3281_v14  ;;  %v7428_v38 = vld [vmem:[%s7072_s24 + $0x6d] sm:$0x1]  ;;  %v4217_v63 = vsel %vm1813_vm5, %v4216_v25, %v4215_v40  ;;  %v4218_v13 = vrot.slane %v7370_v12, 5  ;;  %v2764_v25 = vld [vmem:[%s7072_s24 + $0x52] sm:$0x1] }
 0x183   : > { %5974 = vmatpush3.msra.mxu1 %v624_v55  ;;  %5975 = vmatprep.mubr.msk.f32.mxu1 %vm6797_vm0, %v9640_v1  ;;  %v7354_v55 = vpack.c.bf16 %v7315_v10, %v7300_v21  ;;  %v4230_v14 = vrot.slane %v4192_v37, 6  ;;  %v3271_v40 = vsel %vm1822_vm8, %v3270_v49, %v3269_v53  ;;  %v3285_v19 = vsel %vm1822_vm8, %v3284_v11, %v3283_v56  ;;  %v2754_v12 = vld [vmem:[%s7072_s24 + $0x2] sm:$0x1]  ;;  %v629_v49 = vld [vmem:[%s7072_s24 + $0x38] sm:$0xff] }
 0x184   : > { %5978 = vmatprep.subr.mxu1 %v9640_v1  ;;  %6014 = vmatpush3.msra.mxu0 %v632_v60  ;;  %v4219_v11 = vsel %vm1816_vm6, %v4218_v13, %v4217_v63  ;;  %v2757_v63 = vld [vmem:[%s7072_s24 + $0x1a] sm:$0x1] }
 0x185   : > { %6015 = vmatprep.mubr.msk.f32.mxu0 %vm6797_vm0, %v9640_v1  ;;  %6023 = vmatprep.subr.mxu0 %v9640_v1  ;;  %v5954_v43 = vpop.f32.mrb[0].mxu0  ;;  %v2765_v13 = vld [vmem:[%s7072_s24 + $0x5a] sm:$0x1] }
 0x186   : > { %5976 = vmatmul.mubr.msk.f32.vlgmr.msra.gmra.mrb[6].mxu1 %vm545_vm3, %v7238_v48  ;;  %6016 = vmatmul.mubr.msk.f32.vlgmr.msra.gmra.mrb[8].mxu0 %vm545_vm3, %v7238_v48  ;;  %v515_v59 = vpop.f32.mrb[1].mxu0 }
 0x187   : > { %5979 = vmatpush3.msra.mxu1 %v625_v20  ;;  %5980 = vmatprep.mubr.msk.f32.mxu1 %vm6797_vm0, %v9640_v1  ;;  %v7364_v2 = vpack.c.bf16 %v5954_v43, %v515_v59  ;;  %v4190_v20 = vld [vmem:[%s7072_s24 + $0x45] sm:$0x1]  ;;  %v2755_v59 = vld [vmem:[%s7072_s24 + $0xa] sm:$0x1] }
 0x188   : > { %5983 = vmatprep.subr.mxu1 %v9640_v1  ;;  %6024 = vmatpush3.msra.mxu0 %v634_v42  ;;  %v4228_v42 = vrot.slane %v4191_v62, 7  ;;  %v7420_v62 = vld [vmem:[#allocation8] sm:$0xff]  ;;  %v2786_v60 = vrot.slane %v2755_v59, 7  ;;  %v9679_v59 = vrot.slane %v7331_v36, 2 }
 0x189   : > { %6025 = vmatprep.mubr.msk.f32.mxu0 %vm6797_vm0, %v9640_v1  ;;  %6033 = vmatprep.subr.mxu0 %v9640_v1  ;;  %v5957_v24 = vpop.f32.mrb[2].mxu0 }
 0x18a   : > { %5981 = vmatmul.mubr.msk.f32.vlgmr.msra.gmra.mrb[8].mxu1 %vm545_vm3, %v7238_v48  ;;  %6026 = vmatmul.mubr.msk.f32.vlgmr.msra.gmra.mrb[10].mxu0 %vm545_vm3, %v7238_v48  ;;  %v525_v43 = vpop.f32.mrb[3].mxu0  ;;  %v4229_v37 = vsel %vm1810_vm4, %v4228_v42, %v4190_v20  ;;  %v4232_v42 = vrot.slane %v7406_v51, 5  ;;  %v9678_v51 = vrot.slane %v7306_v23, 2  ;;  %v631_v23 = vld [vmem:[%s7072_s24 + $0x48] sm:$0xff] }
 0x18b   : > { %5984 = vmatpush3.msra.mxu1 %v626_v54  ;;  %6034 = vmatpush3.msra.mxu0 %v636_v0  ;;  %v7408_v52 = vpack.c.bf16 %v5957_v24, %v525_v43  ;;  %v6211_v54 = vpack.c.bf16 %v7389_v27, %v7386_v26  ;;  %v7425_v0 = vld [vmem:[%s7072_s24 + $0x65] sm:$0x1]  ;;  %v7435_v24 = vld [vmem:[#allocation8 + $0x8] sm:$0xff]  ;;  %v7438_v43 = vld [vmem:[%s7072_s24 + $0x75] sm:$0x1] }
 0x18c   : > { %5985 = vmatprep.mubr.msk.f32.mxu1 %vm6797_vm0, %v9640_v1  ;;  %5988 = vmatprep.subr.mxu1 %v9640_v1  ;;  %v3273_v56 = vsel %vm1825_vm9, %v9678_v51, %v3271_v40  ;;  %v5135_v20 = vld [vmem:[%s7072_s24 + $0xf] sm:$0x1] }
 0x18d   : > { %6035 = vmatprep.mubr.msk.f32.mxu0 %vm6797_vm0, %v9640_v1  ;;  %6200 = vmatprep.subr.bf16.mxu0 %v7354_v55  ;;  %v2800_v1 = vrot.slane %v2763_v61, 7  ;;  %v3287_v61 = vsel %vm1825_vm9, %v9679_v59, %v3285_v19  ;;  %v2787_v19 = vsel %vm1810_vm4, %v2786_v60, %v2754_v12  ;;  %v7492_v59 = vld [vmem:[%s7072_s24 + $0x22] sm:$0x1]  ;;  %v9681_v60 = vrot.slane %v7341_v46, 1 }
 0x18e   : > { %5986 = vmatmul.mubr.msk.f32.vlgmr.msra.gmra.mrb[10].mxu1 %vm545_vm3, %v7238_v48  ;;  %6036 = vmatmul.mubr.msk.f32.vlgmr.msra.gmra.mrb[12].mxu0 %vm545_vm3, %v7238_v48  ;;  %v2766_v12 = vld [vmem:[%s7072_s24 + $0x62] sm:$0x1]  ;;  %v9683_v46 = vrot.slane %v7403_v47, 2 }
 0x18f   : > { %5989 = vmatpush3.msra.mxu1 %v627_v7  ;;  %6202 = vmatpush3.bf16.msra.mxu0 %v7354_v55  ;;  %v4231_v7 = vsel %vm1813_vm5, %v4230_v14, %v4229_v37  ;;  %v4234_v55 = vrot.slane %v7425_v0, 4  ;;  %v2788_v0 = vrot.slane %v2756_v18, 6  ;;  %v2802_v14 = vrot.slane %v2764_v25, 6  ;;  %v5143_v37 = vld [vmem:[%s7072_s24 + $0x4f] sm:$0x1] }
 0x190   : > { %5990 = vmatprep.mubr.msk.f32.mxu1 %vm6797_vm0, %v9677_v22  ;;  %5998 = vmatprep.subr.mxu1 %v9677_v22  ;;  %v2801_v51 = vsel %vm1810_vm4, %v2800_v1, %v2762_v33  ;;  %v4221_v18 = vsel %vm1819_vm7, %v4220_v6, %v4219_v11  ;;  %v4233_v25 = vsel %vm1816_vm6, %v4232_v42, %v4231_v7  ;;  %v9680_v1 = vrot.slane %v7320_v31, 1  ;;  %v7517_v31 = vld [vmem:[%s7072_s24 + $0x32] sm:$0x1]  ;;  %v7520_v11 = vld [vmem:[%s7072_s24 + $0x6a] sm:$0x1] }
 0x191   : > { %6047 = vmatprep.mubr.msk.f32.mxu0 %vm1846_vm11, %v7420_v62  ;;  %6212 = vmatprep.subr.bf16.mxu0 %v6211_v54  ;;  %v7507_v6 = vsel %vm1828_vm10, %v9681_v60, %v3287_v61  ;;  %v2790_v42 = vrot.slane %v2757_v63, 5  ;;  %v2789_v7 = vsel %vm1813_vm5, %v2788_v0, %v2787_v19  ;;  %v5134_v61 = vld [vmem:[%s7072_s24 + $0x7] sm:$0x1]  ;;  %v633_v63 = vld [vmem:[%s7072_s24 + $0x58] sm:$0xff]  ;;  %v4235_v60 = vsel %vm1819_vm7, %v4234_v55, %v4233_v25  ;;  %v5144_v19 = vld [vmem:[%s7072_s24 + $0x57] sm:$0x1] }
 0x192   : > { %5991 = vmatmul.mubr.msk.f32.vlgmr.msra.gmra.mrb[12].mxu1 %vm545_vm3, %v7238_v48  ;;  %6048 = vmatmul.mubr.msk.f32.vlgmr.msra.gmra.mrb[14].mxu0 %vm1846_vm11, %v7435_v24  ;;  %v7502_v33 = vsel %vm1828_vm10, %v9680_v1, %v3273_v56  ;;  %v2803_v56 = vsel %vm1813_vm5, %v2802_v14, %v2801_v51  ;;  %v7535_v0 = vld [vmem:[%s7072_s24 + $0x3a] sm:$0x1]  ;;  %v5136_v14 = vld [vmem:[%s7072_s24 + $0x17] sm:$0x1]  ;;  %v5166_v51 = vrot.slane %v5135_v20, 7  ;;  %v5180_v40 = vrot.slane %v5143_v37, 7 }
 0x193   : > { %5999 = vmatpush3.msra.mxu1 %v629_v49  ;;  %6214 = vmatpush3.bf16.msra.mxu0 %v6211_v54  ;;  %v7510_v54 = vld [vmem:[%s7072_s24 + $0x2a] sm:$0x1]  ;;  %v2804_v49 = vrot.slane %v2765_v13, 5  ;;  %v9682_v13 = vrot.slane %v7392_v30, 3  ;;  %v6235_v53 = vpack.c.bf16 %v7507_v6, %v7502_v33  ;;  %v2792_v30 = vrot.slane %v7492_v59, 4 }
 0x194   : > { %6000 = vmatprep.mubr.msk.f32.mxu1 %vm6797_vm0, %v9677_v22  ;;  %6008 = vmatprep.subr.mxu1 %v9677_v22  ;;  %v3707_v55 = vld [vmem:[%s7072_s24 + $0xc] sm:$0x1]  ;;  %v7549_v20 = vld [vmem:[%s7072_s24 + $0x72] sm:$0x1]  ;;  %v2794_v37 = vrot.slane %v7510_v54, 3  ;;  %v5168_v25 = vrot.slane %v5136_v14, 6 }
 0x195   : > { %6065 = vmatprep.mubr.msk.f32.mxu0 %vm1846_vm11, %v7420_v62  ;;  %6216 = vmatprep.subr.bf16.mxu0 %v7364_v2  ;;  %v4223_v1 = vsel %vm1822_vm8, %v9682_v13, %v4221_v18  ;;  %v2806_v18 = vrot.slane %v2766_v12, 4  ;;  %v5142_v13 = vld [vmem:[%s7072_s24 + $0x47] sm:$0x1]  ;;  %v2805_v59 = vsel %vm1816_vm6, %v2804_v49, %v2803_v56  ;;  %v3715_v12 = vld [vmem:[%s7072_s24 + $0x4c] sm:$0x1]  ;;  %v5182_v49 = vrot.slane %v5144_v19, 6 }
 0x196   : > { %6001 = vmatmul.mubr.msk.f32.vlgmr.msra.gmra.mrb[14].mxu1 %vm545_vm3, %v7238_v48  ;;  %6066 = vmatmul.mubr.msk.f32.vlgmr.msra.gmra.mrb[16].mxu0 %vm1846_vm11, %v7435_v24  ;;  %v4225_v36 = vsel %vm1825_vm9, %v9683_v46, %v4223_v1  ;;  %v5137_v54 = vld [vmem:[%s7072_s24 + $0x1f] sm:$0x1]  ;;  %v635_v56 = vld [vmem:[%s7072_s24 + $0x68] sm:$0xff]  ;;  %v5167_v46 = vsel %vm1810_vm4, %v5166_v51, %v5134_v61  ;;  %v5181_v47 = vsel %vm1810_vm4, %v5180_v40, %v5142_v13  ;;  %v3738_v1 = vrot.slane %v3707_v55, 7  ;;  %v3706_v19 = vld [vmem:[%s7072_s24 + $0x4] sm:$0x1] }
 0x197   : > { %6009 = vmatpush3.msra.mxu1 %v631_v23  ;;  %6218 = vmatpush3.bf16.msra.mxu0 %v7364_v2  ;;  %v2791_v23 = vsel %vm1816_vm6, %v2790_v42, %v2789_v7  ;;  %v9684_v42 = vrot.slane %v7428_v38, 3  ;;  %v3708_v38 = vld [vmem:[%s7072_s24 + $0x14] sm:$0x1]  ;;  %v3752_v61 = vrot.slane %v3715_v12, 7  ;;  %v9685_v40 = vrot.slane %v7413_v58, 1 }
 0x198   : > { %6010 = vmatprep.mubr.msk.f32.mxu1 %vm6797_vm0, %v9677_v22  ;;  %6018 = vmatprep.subr.mxu1 %v9677_v22  ;;  %v9686_v51 = vrot.slane %v7438_v43, 2  ;;  %v5170_v13 = vrot.slane %v5137_v54, 5  ;;  %v5184_v55 = vrot.slane %v5145_v32, 5  ;;  %v2810_v12 = vrot.slane %v7549_v20, 2  ;;  %v637_v32 = vld [vmem:[%s7072_s24 + $0x78] sm:$0xff] }
 0x199   : > { %6220 = vmatprep.subr.bf16.mxu0 %v7408_v52  ;;  %6076 = vmatprep.mubr.msk.f32.mxu0 %vm424_vm1, %v7386_v26  ;;  %v4237_v7 = vsel %vm1822_vm8, %v9684_v42, %v4235_v60  ;;  %v2808_v26 = vrot.slane %v7520_v11, 3  ;;  %v2793_v60 = vsel %vm1819_vm7, %v2792_v30, %v2791_v23  ;;  %v2807_v11 = vsel %vm1819_vm7, %v2806_v18, %v2805_v59  ;;  %v3716_v42 = vld [vmem:[%s7072_s24 + $0x54] sm:$0x1]  ;;  %v5146_v18 = vld [vmem:[%s7072_s24 + $0x67] sm:$0x1] }
 0x19a   : > { %6011 = vmatmul.mubr.msk.f32.vlgmr.msra.gmra.mrb[16].mxu1 %vm545_vm3, %v7238_v48  ;;  %v4239_v30 = vsel %vm1825_vm9, %v9686_v51, %v4237_v7  ;;  %v3714_v23 = vld [vmem:[%s7072_s24 + $0x44] sm:$0x1]  ;;  %v2769_v59 = vld [vmem:[%s7072_s24 + $0x7a] sm:$0x1]  ;;  %v5169_v58 = vsel %vm1813_vm5, %v5168_v25, %v5167_v46  ;;  %v3740_v14 = vrot.slane %v3708_v38, 6  ;;  %v2795_v43 = vsel %vm1822_vm8, %v2794_v37, %v2793_v60 }
 0x19b   : > { %6019 = vmatpush3.msra.mxu1 %v633_v63  ;;  %6222 = vmatpush3.bf16.msra.mxu0 %v7408_v52  ;;  %v7589_v63 = vsel %vm1828_vm10, %v9685_v40, %v4225_v36  ;;  %v5183_v36 = vsel %vm1813_vm5, %v5182_v49, %v5181_v47  ;;  %v3709_v40 = vld [vmem:[%s7072_s24 + $0x1c] sm:$0x1]  ;;  %v2809_v20 = vsel %vm1822_vm8, %v2808_v26, %v2807_v11  ;;  %v3754_v54 = vrot.slane %v3716_v42, 6  ;;  %v5139_v47 = vld [vmem:[%s7072_s24 + $0x2f] sm:$0x1] }
 0x19c   : > { %6020 = vmatprep.mubr.msk.f32.mxu1 %vm6797_vm0, %v9677_v22  ;;  %6028 = vmatprep.subr.mxu1 %v9677_v22  ;;  %v3717_v7 = vld [vmem:[%s7072_s24 + $0x5c] sm:$0x1]  ;;  %v3739_v25 = vsel %vm1810_vm4, %v3738_v1, %v3706_v19  ;;  %v9687_v49 = vrot.slane %v7441_v34, 1  ;;  %v5172_v37 = vrot.slane %v7572_v17, 4  ;;  %v5186_v38 = vrot.slane %v5146_v18, 4 }
 0x19d   : > { %6236 = vmatprep.subr.bf16.mxu0 %v6235_v53  ;;  %v3753_v26 = vsel %vm1810_vm4, %v3752_v61, %v3714_v23  ;;  %v7623_v34 = vld [vmem:[%s7072_s24 + $0x37] sm:$0x1]  ;;  %v5185_v1 = vsel %vm1816_vm6, %v5184_v55, %v5183_v36  ;;  %v3710_v60 = vld [vmem:[%s7072_s24 + $0x24] sm:$0x1]  ;;  %v3742_v17 = vrot.slane %v3709_v40, 5  ;;  %v9688_v11 = vrot.slane %v7517_v31, 2 }
 0x19e   : > { %6021 = vmatmul.mubr.msk.f32.vlgmr.msra.gmra.mrb[18].mxu1 %vm545_vm3, %v7238_v48  ;;  %6077 = vmatmul.mubr.msk.f32.vlgmr.msra.gmra.mrb[18].mxu0 %vm424_vm1, %v7389_v27  ;;  %v7613_v46 = vsel %vm1828_vm10, %v9687_v49, %v4239_v30  ;;  %v5147_v27 = vld [vmem:[%s7072_s24 + $0x6f] sm:$0x1]  ;;  %v2811_v42 = vsel %vm1825_vm9, %v2810_v12, %v2809_v20  ;;  %v7636_v61 = vld [vmem:[%s7072_s24 + $0x3f] sm:$0x1]  ;;  %v3718_v51 = vld [vmem:[%s7072_s24 + $0x64] sm:$0x1]  ;;  %v3741_v30 = vsel %vm1813_vm5, %v3740_v14, %v3739_v25 }
 0x19f   : > { %6029 = vmatpush3.msra.mxu1 %v635_v56  ;;  %6238 = vmatpush3.bf16.msra.mxu0 %v6235_v53  ;;  %v2812_v53 = vrot.slane %v2769_v59, 1  ;;  %v5171_v56 = vsel %vm1816_vm6, %v5170_v13, %v5169_v58  ;;  %v2797_v19 = vsel %vm1825_vm9, %v9688_v11, %v2795_v43  ;;  %v3756_v18 = vrot.slane %v3717_v7, 5  ;;  %v5148_v13 = vld [vmem:[%s7072_s24 + $0x77] sm:$0x1]  ;;  %v7646_v31 = vld [vmem:[%s7072_s24 + $0x7f] sm:$0x1] }
 0x1a0   : > { %6030 = vmatprep.mubr.msk.f32.mxu1 %vm6797_vm0, %v9677_v22  ;;  %6038 = vmatprep.subr.mxu1 %v9677_v22  ;;  %v5174_v55 = vrot.slane %v5139_v47, 3  ;;  %v5188_v23 = vrot.slane %v5147_v27, 3  ;;  %v3755_v59 = vsel %vm1813_vm5, %v3754_v54, %v3753_v26  ;;  %v6259_v14 = vpack.c.bf16 %v7613_v46, %v7589_v63  ;;  %v3711_v36 = vld [vmem:[%s7072_s24 + $0x2c] sm:$0x1]  ;;  %v4659_v49 = vld [vmem:[%s7072_s24 + $0xe] sm:$0x1] }
 0x1a1   : > { %6101 = vmatprep.mubr.msk.f32.mxu0 %vm1846_vm11, %v7420_v62  ;;  %6240 = vmatprep.subr.bf16.mxu0 %v7364_v2  ;;  %v5173_v12 = vsel %vm1819_vm7, %v5172_v37, %v5171_v56  ;;  %v5187_v58 = vsel %vm1819_vm7, %v5186_v38, %v5185_v1  ;;  %v3719_v40 = vld [vmem:[%s7072_s24 + $0x6c] sm:$0x1]  ;;  %v3744_v43 = vrot.slane %v3710_v60, 4  ;;  %v7665_v7 = vsel %vm1828_vm10, %v2812_v53, %v2811_v42  ;;  %v4667_v47 = vld [vmem:[%s7072_s24 + $0x4e] sm:$0x1] }
 0x1a2   : > { %6031 = vmatmul.mubr.msk.f32.vlgmr.msra.gmra.mrb[20].mxu1 %vm545_vm3, %v7238_v48  ;;  %6102 = vmatmul.mubr.msk.f32.vlgmr.msra.gmra.mrb[20].mxu0 %vm1846_vm11, %v7435_v24  ;;  %v3743_v25 = vsel %vm1816_vm6, %v3742_v17, %v3741_v30  ;;  %v3758_v54 = vrot.slane %v3718_v51, 4  ;;  %v5190_v27 = vrot.slane %v5148_v13, 2  ;;  %v3712_v37 = vld [vmem:[%s7072_s24 + $0x34] sm:$0x1]  ;;  %v3757_v38 = vsel %vm1816_vm6, %v3756_v18, %v3755_v59  ;;  %v4660_v1 = vld [vmem:[%s7072_s24 + $0x16] sm:$0x1] }
 0x1a3   : > { %6039 = vmatpush3.msra.mxu1 %v637_v32  ;;  %6242 = vmatpush3.bf16.msra.mxu0 %v7364_v2  ;;  %v9689_v32 = vrot.slane %v7535_v0, 1  ;;  %v5178_v0 = vrot.slane %v7636_v61, 1  ;;  %v5175_v26 = vsel %vm1822_vm8, %v5174_v55, %v5173_v12  ;;  %v5189_v53 = vsel %vm1822_vm8, %v5188_v23, %v5187_v58  ;;  %v4668_v17 = vld [vmem:[%s7072_s24 + $0x56] sm:$0x1]  ;;  %v3713_v61 = vld [vmem:[%s7072_s24 + $0x3c] sm:$0x1] }
 0x1a4   : > { %6204 = vmatprep.subr.bf16.mxu1 %v7364_v2  ;;  %6040 = vmatprep.mubr.msk.f32.mxu1 %vm6797_vm0, %v9677_v22  ;;  %v5176_v22 = vrot.slane %v7623_v34, 2  ;;  %v5192_v56 = vrot.slane %v7646_v31, 1  ;;  %v3746_v34 = vrot.slane %v3711_v36, 3  ;;  %v3745_v60 = vsel %vm1819_vm7, %v3744_v43, %v3743_v25  ;;  %v4658_v30 = vld [vmem:[%s7072_s24 + $0x6] sm:$0x1] }
 0x1a5   : > { %v7662_v20 = vsel %vm1828_vm10, %v9689_v32, %v2797_v19  ;;  %6244 = vmatprep.subr.bf16.mxu0 %v7408_v52  ;;  %6112 = vmatprep.mubr.msk.f32.mxu0 %vm424_vm1, %v7502_v33  ;;  %v3720_v33 = vld [vmem:[%s7072_s24 + $0x74] sm:$0x1]  ;;  %v4690_v11 = vrot.slane %v4659_v49, 7  ;;  %v4704_v19 = vrot.slane %v4667_v47, 7  ;;  %v3759_v51 = vsel %vm1819_vm7, %v3758_v54, %v3757_v38  ;;  %v4666_v18 = vld [vmem:[%s7072_s24 + $0x46] sm:$0x1] }
 0x1a6   : > { %6041 = vmatmul.mubr.msk.f32.vlgmr.msra.gmra.mrb[22].mxu1 %vm545_vm3, %v7238_v48  ;;  %v3760_v48 = vrot.slane %v3719_v40, 3  ;;  %v6223_v42 = vpack.c.bf16 %v7665_v7, %v7662_v20  ;;  %v5177_v13 = vsel %vm1825_vm9, %v5176_v22, %v5175_v26  ;;  %v5191_v31 = vsel %vm1825_vm9, %v5190_v27, %v5189_v53  ;;  %v3721_v55 = vld [vmem:[%s7072_s24 + $0x7c] sm:$0x1]  ;;  %v4661_v59 = vld [vmem:[%s7072_s24 + $0x1e] sm:$0x1] }
 0x1a7   : > { %6206 = vmatpush3.bf16.msra.mxu1 %v7364_v2  ;;  %6246 = vmatpush3.bf16.msra.mxu0 %v7408_v52  ;;  %v3748_v23 = vrot.slane %v3712_v37, 2  ;;  %v3747_v12 = vsel %vm1822_vm8, %v3746_v34, %v3745_v60  ;;  %v3762_v58 = vrot.slane %v3720_v33, 2  ;;  %v4669_v36 = vld [vmem:[%s7072_s24 + $0x5e] sm:$0x1]  ;;  %v4692_v40 = vrot.slane %v4660_v1, 6 }
 0x1a8   : > { %6208 = vmatprep.subr.bf16.mxu1 %v7408_v52  ;;  %6260 = vmatprep.subr.bf16.mxu0 %v6259_v14  ;;  %v4706_v43 = vrot.slane %v4668_v17, 6  ;;  %v4691_v32 = vsel %vm1810_vm4, %v4690_v11, %v4658_v30  ;;  %v4705_v25 = vsel %vm1810_vm4, %v4704_v19, %v4666_v18  ;;  %v7714_v54 = vsel %vm1828_vm10, %v5192_v56, %v5191_v31  ;;  %v4662_v47 = vld [vmem:[%s7072_s24 + $0x26] sm:$0x1]  ;;  %v4663_v33 = vld [vmem:[%s7072_s24 + $0x2e] sm:$0x1] }
 0x1a9   : > { %6058 = vmatprep.mubr.msk.f32.mxu1 %vm424_vm1, %v7300_v21  ;;  %v3761_v21 = vsel %vm1822_vm8, %v3760_v48, %v3759_v51  ;;  %v3750_v49 = vrot.slane %v3713_v61, 1  ;;  %v3764_v22 = vrot.slane %v3721_v55, 1  ;;  %v4670_v27 = vld [vmem:[%s7072_s24 + $0x66] sm:$0x1]  ;;  %v4694_v37 = vrot.slane %v4661_v59, 5 }
 0x1aa   : > { %6113 = vmatmul.mubr.msk.f32.vlgmr.msra.gmra.mrb[22].mxu0 %vm424_vm1, %v7507_v6  ;;  %v7711_v6 = vsel %vm1828_vm10, %v5178_v0, %v5177_v13  ;;  %v4708_v38 = vrot.slane %v4669_v36, 5  ;;  %v3763_v0 = vsel %vm1825_vm9, %v3762_v58, %v3761_v21  ;;  %v4693_v26 = vsel %vm1813_vm5, %v4692_v40, %v4691_v32  ;;  %v4671_v34 = vld [vmem:[%s7072_s24 + $0x6e] sm:$0x1]  ;;  %v4664_v19 = vld [vmem:[%s7072_s24 + $0x36] sm:$0x1] }
 0x1ab   : > { %6210 = vmatpush3.bf16.msra.mxu1 %v7408_v52  ;;  %6262 = vmatpush3.bf16.msra.mxu0 %v6259_v14  ;;  %v3749_v14 = vsel %vm1825_vm9, %v3748_v23, %v3747_v12  ;;  %v4707_v53 = vsel %vm1813_vm5, %v4706_v43, %v4705_v25  ;;  %v4696_v1 = vrot.slane %v4662_v47, 4  ;;  %v4710_v60 = vrot.slane %v4670_v27, 4  ;;  %v4665_v13 = vld [vmem:[%s7072_s24 + $0x3e] sm:$0x1]  ;;  %v6383_v21 = vld [vmem:[%s7072_s24 + $0x9] sm:$0x1] }
 0x1ac   : > { %6264 = vmatprep.subr.bf16.mxu0 %v7364_v2  ;;  %6224 = vmatprep.subr.bf16.mxu1 %v6223_v42  ;;  %v3751_v56 = vsel %vm1828_vm10, %v3750_v49, %v3749_v14  ;;  %v3765_v48 = vsel %vm1828_vm10, %v3764_v22, %v3763_v0  ;;  %v4695_v17 = vsel %vm1816_vm6, %v4694_v37, %v4693_v26  ;;  %v4698_v61 = vrot.slane %v4663_v33, 3  ;;  %v4673_v31 = vld [vmem:[%s7072_s24 + $0x7e] sm:$0x1]  ;;  %v2628_v49 = vld [vmem:[%s7080_s26 + $0x11] sm:$0x1] }
 0x1ad   : > { %6137 = vmatprep.mubr.msk.f32.mxu0 %vm1846_vm11, %v7420_v62  ;;  %v4709_v11 = vsel %vm1816_vm6, %v4708_v38, %v4707_v53  ;;  %v4712_v51 = vrot.slane %v4671_v34, 3  ;;  %v4697_v30 = vsel %vm1819_vm7, %v4696_v1, %v4695_v17  ;;  %v4700_v55 = vrot.slane %v4664_v19, 2  ;;  %v6384_v14 = vld [vmem:[%s7072_s24 + $0x49] sm:$0x1]  ;;  %v2626_v27 = vld [vmem:[%s7080_s26 + $0x1] sm:$0x1] }
 0x1ae   : > { %6059 = vmatmul.mubr.msk.f32.vlgmr.msra.gmra.mrb[24].mxu1 %vm424_vm1, %v7315_v10  ;;  %6138 = vmatmul.mubr.msk.f32.vlgmr.msra.gmra.mrb[24].mxu0 %vm1846_vm11, %v7435_v24  ;;  %v6283_v10 = vpack.c.bf16 %v7714_v54, %v7711_v6  ;;  %v4711_v18 = vsel %vm1819_vm7, %v4710_v60, %v4709_v11  ;;  %v4699_v59 = vsel %vm1822_vm8, %v4698_v61, %v4697_v30  ;;  %v4716_v58 = vrot.slane %v4673_v31, 1  ;;  %v6385_v26 = vld [vmem:[%s7072_s24 + $0x51] sm:$0x1]  ;;  %v2630_v17 = vld [vmem:[%s7080_s26 + $0x21] sm:$0x1] }
 0x1af   : > { %6226 = vmatpush3.bf16.msra.mxu1 %v6223_v42  ;;  %6266 = vmatpush3.bf16.msra.mxu0 %v7364_v2  ;;  %v4672_v42 = vld [vmem:[%s7072_s24 + $0x76] sm:$0x1]  ;;  %v4713_v12 = vsel %vm1822_vm8, %v4712_v51, %v4711_v18  ;;  %v2498_v32 = vmul.f32 3.0, %v7170_v3  ;;  %v2496_v25 = vmul.f32 3.0, %v7177_v8  ;;  %v2505_v22 = vmul.f32 3.0, %v6384_v14 }
 0x1b0   : > { %6228 = vmatprep.subr.bf16.mxu1 %v7364_v2  ;;  %6268 = vmatprep.subr.bf16.mxu0 %v7408_v52  ;;  %v4714_v23 = vrot.slane %v4672_v42, 2  ;;  %v2500_v37 = vmul.f32 3.0, %v7204_v28  ;;  %v2504_v38 = vmul.f32 3.0, %v7180_v9  ;;  %v2629_v8 = vld [vmem:[%s7080_s26 + $0x19] sm:$0x1]  ;;  %v2660_v0 = vrot.slane %v2628_v49, 6 }
 0x1b1   : > { %6083 = vmatprep.mubr.msk.f32.mxu1 %vm1846_vm11, %v7420_v62  ;;  %6148 = vmatprep.mubr.msk.f32.mxu0 %vm424_vm1, %v7589_v63  ;;  %v6247_v63 = vpack.c.bf16 %v3765_v48, %v3751_v56  ;;  %v2506_v53 = vmul.f32 3.0, %v6385_v26  ;;  %v2507_v33 = vmul.f32 3.0, %v7191_v16  ;;  %v7817_v34 = vmul.f32 3.0, %v7207_v29  ;;  %v2635_v31 = vld [vmem:[%s7080_s26 + $0x49] sm:$0x1] }
 0x1b2   : > { %6084 = vmatmul.mubr.msk.f32.vlgmr.msra.gmra.mrb[26].mxu1 %vm1846_vm11, %v7435_v24  ;;  %v4715_v36 = vsel %vm1825_vm9, %v4714_v23, %v4713_v12  ;;  %v2542_v28 = vrot.slane %v2505_v22, 7  ;;  %v2501_v9 = vmul.f32 3.0, %v7216_v35  ;;  %v7821_v1 = vmul.f32 3.0, %v7234_v45  ;;  %v6386_v49 = vld [vmem:[%s7072_s24 + $0xb] sm:$0x1] }
 0x1b3   : > { %6230 = vmatpush3.bf16.msra.mxu1 %v7364_v2  ;;  %6270 = vmatpush3.bf16.msra.mxu0 %v7408_v52  ;;  %v4717_v40 = vsel %vm1828_vm10, %v4716_v58, %v4715_v36  ;;  %v7824_v60 = vmul.f32 3.0, %v7242_v50  ;;  %v2662_v11 = vrot.slane %v2629_v8, 5  ;;  %v3458_v35 = vmul.f32 3.0, %v7256_v57  ;;  %v2633_v14 = vld [vmem:[%s7080_s26 + $0x39] sm:$0x1] }
 0x1b4   : > { %6232 = vmatprep.subr.bf16.mxu1 %v7408_v52  ;;  %6284 = vmatprep.subr.bf16.mxu0 %v6283_v10  ;;  %v2544_v19 = vrot.slane %v2506_v53, 6  ;;  %v2502_v45 = vmul.f32 3.0, %v7222_v39  ;;  %v3456_v42 = vmul.f32 3.0, %v7268_v4  ;;  %v2543_v61 = vsel %vm1810_vm4, %v2542_v28, %v2504_v38  ;;  %v9690_v39 = vld [vmem:[#allocation19_spill] sm:$0xff]  ;;  %v9692_v53 = vld [vmem:[#allocation21_spill] sm:$0xff] }
 0x1b5   : > { %6094 = vmatprep.mubr.msk.f32.mxu1 %vm424_vm1, %v7662_v20  ;;  %v4702_v20 = vrot.slane %v4665_v13, 1  ;;  %v2546_v51 = vrot.slane %v2507_v33, 5  ;;  %v2664_v30 = vrot.slane %v2630_v17, 4  ;;  %v7838_v18 = vmul.f32 3.0, %v7231_v44 }
 0x1b6   : > { %6149 = vmatmul.mubr.msk.f32.vlgmr.msra.gmra.mrb[26].mxu0 %vm424_vm1, %v7613_v46  ;;  %v4701_v46 = vsel %vm1825_vm9, %v4700_v55, %v4699_v59  ;;  %v3459_v4 = vmul.f32 3.0, %v9690_v39  ;;  %v2548_v55 = vrot.slane %v7817_v34, 4  ;;  %v2550_v23 = vrot.slane %v7821_v1, 3  ;;  %v6387_v34 = vld [vmem:[%s7072_s24 + $0x3] sm:$0x1] }
 0x1b7   : > { %6234 = vmatpush3.bf16.msra.mxu1 %v7408_v52  ;;  %6286 = vmatpush3.bf16.msra.mxu0 %v6283_v10  ;;  %v2552_v59 = vrot.slane %v7824_v60, 2  ;;  %v3496_v12 = vrot.slane %v3458_v35, 6  ;;  %v2538_v44 = vrot.slane %v2502_v45, 2  ;;  %v3448_v28 = vmul.f32 3.0, %v6387_v34 }
 0x1b8   : > { %6288 = vmatprep.subr.bf16.mxu0 %v7364_v2  ;;  %6248 = vmatprep.subr.bf16.mxu1 %v6247_v63  ;;  %v2670_v35 = vrot.slane %v2633_v14, 1 }
 0x1b9   : > { %6173 = vmatprep.mubr.msk.f32.mxu0 %vm1846_vm11, %v7420_v62 }
 0x1ba   : > { %6095 = vmatmul.mubr.msk.f32.vlgmr.msra.gmra.mrb[28].mxu1 %vm424_vm1, %v7665_v7  ;;  %6174 = vmatmul.mubr.msk.f32.vlgmr.msra.gmra.mrb[28].mxu0 %vm1846_vm11, %v7435_v24  ;;  %v4703_v7 = vsel %vm1828_vm10, %v4702_v20, %v4701_v46  ;;  %v2632_v20 = vld [vmem:[%s7080_s26 + $0x31] sm:$0x1]  ;;  %v2545_v46 = vsel %vm1813_vm5, %v2544_v19, %v2543_v61  ;;  %v2638_v19 = vld [vmem:[%s7080_s26 + $0x61] sm:$0x1] }
 0x1bb   : > { %6250 = vmatpush3.bf16.msra.mxu1 %v6247_v63  ;;  %6290 = vmatpush3.bf16.msra.mxu0 %v7364_v2  ;;  %v6271_v43 = vpack.c.bf16 %v4717_v40, %v4703_v7  ;;  %v2536_v63 = vrot.slane %v2501_v9, 3  ;;  %v2668_v22 = vrot.slane %v2632_v20, 2  ;;  %v6388_v9 = vld [vmem:[%s7072_s24 + $0x13] sm:$0x1] }
 0x1bc   : > { %6252 = vmatprep.subr.bf16.mxu1 %v7364_v2  ;;  %6292 = vmatprep.subr.bf16.mxu0 %v7408_v52  ;;  %v3450_v1 = vmul.f32 3.0, %v6388_v9  ;;  %v6393_v9 = vld [vmem:[%s7072_s24 + $0x33] sm:$0x1] }
 0x1bd   : > { %6119 = vmatprep.mubr.msk.f32.mxu1 %vm1846_vm11, %v7420_v62  ;;  %6184 = vmatprep.mubr.msk.f32.mxu0 %vm424_vm1, %v7711_v6  ;;  %v2627_v6 = vld [vmem:[%s7080_s26 + $0x9] sm:$0x1] }
 0x1be   : > { %6120 = vmatmul.mubr.msk.f32.vlgmr.msra.gmra.mrb[30].mxu1 %vm1846_vm11, %v7435_v24  ;;  %v2658_v47 = vrot.slane %v2627_v6, 7  ;;  %v2540_v6 = vrot.slane %v7838_v18, 1 }
 0x1bf   : > { %6254 = vmatpush3.bf16.msra.mxu1 %v7364_v2  ;;  %6294 = vmatpush3.bf16.msra.mxu0 %v7408_v52 }
 0x1c0   : > { %6256 = vmatprep.subr.bf16.mxu1 %v7408_v52  ;;  %6130 = vmatprep.mubr.msk.f32.mxu1 %vm424_vm1, %v3751_v56  ;;  %v2659_v10 = vsel %vm1810_vm4, %v2658_v47, %v2626_v27  ;;  %v3457_v56 = vmul.f32 3.0, %v7226_v41  ;;  %v7828_v41 = vmul.f32 3.0, %v7272_v5  ;;  %v2631_v5 = vld [vmem:[%s7080_s26 + $0x29] sm:$0x1]  ;;  %v3449_v47 = vmul.f32 3.0, %v6386_v49 }
 0x1c1   : > { %v2661_v29 = vsel %vm1813_vm5, %v2660_v0, %v2659_v10  ;;  %v2666_v58 = vrot.slane %v2631_v5, 3  ;;  %v2637_v0 = vld [vmem:[%s7080_s26 + $0x59] sm:$0x1]  ;;  %v3586_v10 = vld [vmem:[%s7080_s26 + $0x43] sm:$0x1] }
 0x1c2   : > { %6185 = vmatmul.mubr.msk.f32.vlgmr.msra.gmra.mrb[30].mxu0 %vm424_vm1, %v7714_v54  ;;  %v2530_v54 = vrot.slane %v2498_v32, 6  ;;  %v3494_v50 = vrot.slane %v3457_v56, 7  ;;  %v2663_v57 = vsel %vm1816_vm6, %v2662_v11, %v2661_v29  ;;  %v3589_v11 = vld [vmem:[%s7080_s26 + $0x5b] sm:$0x1]  ;;  %v3480_v29 = vrot.slane %v3449_v47, 7 }
 0x1c3   : > { %6258 = vmatpush3.bf16.msra.mxu1 %v7408_v52  ;;  %v2676_v45 = vrot.slane %v2637_v0, 5  ;;  %v3628_v39 = vrot.slane %v3589_v11, 5  ;;  %v2640_v49 = vld [vmem:[%s7080_s26 + $0x71] sm:$0x1]  ;;  %v3592_v0 = vld [vmem:[%s7080_s26 + $0x73] sm:$0x1] }
 0x1c4   : > { %6272 = vmatprep.subr.bf16.mxu1 %v6271_v43  ;;  %v3495_v36 = vsel %vm1810_vm4, %v3494_v50, %v3456_v42  ;;  %v9693_v42 = vld [vmem:[#allocation22_spill] sm:$0xff]  ;;  %v3581_v11 = vld [vmem:[%s7080_s26 + $0x1b] sm:$0x1] }
 0x1c5   : > { %v3497_v27 = vsel %vm1813_vm5, %v3496_v12, %v3495_v36  ;;  %v3462_v50 = vmul.f32 3.0, %v9693_v42  ;;  %v2678_v12 = vrot.slane %v2638_v19, 4  ;;  %v3634_v19 = vrot.slane %v3592_v0, 2  ;;  %v6401_v0 = vld [vmem:[%s7072_s24 + $0x60] sm:$0x1] }
 0x1c6   : > { %6131 = vmatmul.mubr.msk.f32.vlgmr.msra.gmra.mrb[32].mxu1 %vm424_vm1, %v3765_v48  ;;  %v2534_v48 = vrot.slane %v2500_v37, 4  ;;  %v3588_v37 = vld [vmem:[%s7080_s26 + $0x53] sm:$0x1] }
 0x1c7   : > { %6274 = vmatpush3.bf16.msra.mxu1 %v6271_v43  ;;  %6155 = vmatprep.mubr.msk.f32.mxu1 %vm1846_vm11, %v7420_v62  ;;  %v2497_v62 = vmul.f32 3.0, %v6383_v21  ;;  %v2636_v43 = vld [vmem:[%s7080_s26 + $0x51] sm:$0x1]  ;;  %v2672_v21 = vrot.slane %v2635_v31, 7  ;;  %v3590_v31 = vld [vmem:[%s7080_s26 + $0x63] sm:$0x1] }
 0x1c8   : > { %6276 = vmatprep.subr.bf16.mxu1 %v7364_v2  ;;  %v2674_v26 = vrot.slane %v2636_v43, 6 }
 0x1ca   : > { %6156 = vmatmul.mubr.msk.f32.vlgmr.msra.gmra.mrb[34].mxu1 %vm1846_vm11, %v7435_v24  ;;  %v2528_v24 = vrot.slane %v2497_v62, 7  ;;  %v9691_v62 = vld [vmem:[#allocation20_spill] sm:$0xff] }
 0x1cb   : > { %6278 = vmatpush3.bf16.msra.mxu1 %v7364_v2  ;;  %6166 = vmatprep.mubr.msk.f32.mxu1 %vm424_vm1, %v4703_v7  ;;  %v2499_v2 = vmul.f32 3.0, %v7188_v15  ;;  %v3460_v32 = vmul.f32 3.0, %v9691_v62 }
 0x1cc   : > { %6280 = vmatprep.subr.bf16.mxu1 %v7408_v52 }
 0x1cd   : > { %v2532_v3 = vrot.slane %v2499_v2, 5  ;;  %v2634_v2 = vld [vmem:[%s7080_s26 + $0x41] sm:$0x1]  ;;  %v3500_v33 = vrot.slane %v3460_v32, 4 }
 0x1ce   : > { %v2673_v56 = vsel %vm1810_vm4, %v2672_v21, %v2634_v2  ;;  %v3579_v21 = vld [vmem:[%s7080_s26 + $0xb] sm:$0x1]  ;;  %v3630_v2 = vrot.slane %v3590_v31, 4 }
 0x1cf   : > { %6282 = vmatpush3.bf16.msra.mxu1 %v7408_v52  ;;  %v2529_v52 = vsel %vm1810_vm4, %v2528_v24, %v2496_v25  ;;  %v3587_v25 = vld [vmem:[%s7080_s26 + $0x4b] sm:$0x1]  ;;  %v2554_v24 = vrot.slane %v7828_v41, 1 }
 0x1d0   : > { %v2531_v15 = vsel %vm1813_vm5, %v2530_v54, %v2529_v52  ;;  %v3498_v54 = vrot.slane %v3459_v4, 5  ;;  %v2547_v52 = vsel %vm1816_vm6, %v2546_v51, %v2545_v46  ;;  %v3624_v38 = vrot.slane %v3587_v25, 7  ;;  %v3591_v25 = vld [vmem:[%s7080_s26 + $0x6b] sm:$0x1] }
 0x1d1   : > { %v2533_v16 = vsel %vm1816_vm6, %v2532_v3, %v2531_v15  ;;  %v3461_v15 = vmul.f32 3.0, %v9692_v53  ;;  %v3482_v4 = vrot.slane %v3450_v1, 6  ;;  %v3481_v46 = vsel %vm1810_vm4, %v3480_v29, %v3448_v28  ;;  %v6392_v28 = vld [vmem:[%s7072_s24 + $0x48] sm:$0x1] }
 0x1d2   : > { %6167 = vmatmul.mubr.msk.f32.vlgmr.msra.gmra.mrb[36].mxu1 %vm424_vm1, %v4717_v40  ;;  %v2535_v13 = vsel %vm1819_vm7, %v2534_v48, %v2533_v16  ;;  %v2665_v40 = vsel %vm1819_vm7, %v2664_v30, %v2663_v57  ;;  %v2549_v48 = vsel %vm1819_vm7, %v2548_v55, %v2547_v52  ;;  %v3499_v17 = vsel %vm1816_vm6, %v3498_v54, %v3497_v27  ;;  %v6389_v30 = vld [vmem:[%s7072_s24 + $0x1b] sm:$0x1]  ;;  %v2639_v55 = vld [vmem:[%s7080_s26 + $0x69] sm:$0x1]  ;;  %v6391_v52 = vld [vmem:[%s7072_s24 + $0x2b] sm:$0x1] }
 0x1d3   : > { %v2537_v7 = vsel %vm1822_vm8, %v2536_v63, %v2535_v13  ;;  %v2667_v8 = vsel %vm1822_vm8, %v2666_v58, %v2665_v40  ;;  %v3626_v16 = vrot.slane %v3588_v37, 6  ;;  %v3625_v61 = vsel %vm1810_vm4, %v3624_v38, %v3586_v10  ;;  %v6390_v40 = vld [vmem:[%s7072_s24 + $0x23] sm:$0x1]  ;;  %v3580_v37 = vld [vmem:[%s7080_s26 + $0x13] sm:$0x1] }
 0x1d4   : > { %v2539_v3 = vsel %vm1825_vm9, %v2538_v44, %v2537_v7  ;;  %v2669_v51 = vsel %vm1825_vm9, %v2668_v22, %v2667_v8  ;;  %v2675_v63 = vsel %vm1813_vm5, %v2674_v26, %v2673_v56  ;;  %v3502_v5 = vrot.slane %v3461_v15, 3  ;;  %v9694_v44 = vld [vmem:[#allocation23_spill] sm:$0xff]  ;;  %v3578_v15 = vld [vmem:[%s7080_s26 + $0x3] sm:$0x1] }
 0x1d5   : > { %v3451_v18 = vmul.f32 3.0, %v6389_v30  ;;  %v2551_v13 = vsel %vm1822_vm8, %v2550_v23, %v2549_v48  ;;  %v3501_v57 = vsel %vm1819_vm7, %v3500_v33, %v3499_v17  ;;  %v3463_v20 = vmul.f32 3.0, %v9694_v44  ;;  %v2641_v10 = vld [vmem:[%s7080_s26 + $0x79] sm:$0x1]  ;;  %v6394_v48 = vld [vmem:[%s7072_s24 + $0x3b] sm:$0x1] }
 0x1d6   : > { %v3627_v58 = vsel %vm1813_vm5, %v3626_v16, %v3625_v61  ;;  %v7888_v36 = vsel %vm1828_vm10, %v2540_v6, %v2539_v3  ;;  %v2677_v23 = vsel %vm1816_vm6, %v2676_v45, %v2675_v63  ;;  %v3504_v7 = vrot.slane %v3462_v50, 2  ;;  %v3582_v63 = vld [vmem:[%s7080_s26 + $0x23] sm:$0x1] }
 0x1d7   : > { %v3452_v43 = vmul.f32 3.0, %v6390_v40  ;;  %v2553_v62 = vsel %vm1825_vm9, %v2552_v59, %v2551_v13  ;;  %v3503_v32 = vsel %vm1822_vm8, %v3502_v5, %v3501_v57  ;;  %v3484_v54 = vrot.slane %v3451_v18, 5  ;;  %v6395_v5 = vld [vmem:[%s7072_s24 + $0x50] sm:$0x1]  ;;  %v6396_v57 = vld [vmem:[%s7072_s24 + $0x40] sm:$0x1] }
 0x1d8   : > { %v7899_v6 = vsel %vm1828_vm10, %v2670_v35, %v2669_v51  ;;  %v2680_v47 = vrot.slane %v2639_v55, 3  ;;  %v3629_v14 = vsel %vm1816_vm6, %v3628_v39, %v3627_v58  ;;  %v3483_v22 = vsel %vm1813_vm5, %v3482_v4, %v3481_v46  ;;  %v3593_v35 = vld [vmem:[%s7080_s26 + $0x7b] sm:$0x1]  ;;  %v2158_v4 = vld [vmem:[%s7080_s26 + $0x48] sm:$0x1] }
 0x1d9   : > { %v2679_v60 = vsel %vm1819_vm7, %v2678_v12, %v2677_v23  ;;  %v3506_v59 = vrot.slane %v3463_v20, 1  ;;  %v3453_v27 = vmul.f32 3.0, %v6391_v52  ;;  %v3610_v38 = vrot.slane %v3579_v21, 7  ;;  %v6397_v20 = vld [vmem:[%s7072_s24 + $0x8] sm:$0x1] }
 0x1da   : > { %v7910_v3 = vsel %vm1828_vm10, %v2554_v24, %v2553_v62  ;;  %v3505_v8 = vsel %vm1825_vm9, %v3504_v7, %v3503_v32  ;;  %v3632_v26 = vrot.slane %v3591_v25, 3  ;;  %v3486_v53 = vrot.slane %v3452_v43, 4  ;;  %v3583_v40 = vld [vmem:[%s7080_s26 + $0x2b] sm:$0x1]  ;;  %v6398_v43 = vld [vmem:[%s7072_s24 + $0x58] sm:$0x1] }
 0x1db   : > { %v2682_v56 = vrot.slane %v2640_v49, 2  ;;  %v3631_v33 = vsel %vm1819_vm7, %v3630_v2, %v3629_v14  ;;  %v3485_v34 = vsel %vm1816_vm6, %v3484_v54, %v3483_v22  ;;  %v2028_v41 = vmul.f32 3.0, %v6392_v28  ;;  %v2159_v25 = vld [vmem:[%s7080_s26 + $0x50] sm:$0x1]  ;;  %v2157_v22 = vld [vmem:[%s7080_s26 + $0x40] sm:$0x1] }
 0x1dc   : > { %v2681_v24 = vsel %vm1822_vm8, %v2680_v47, %v2679_v60  ;;  %v3454_v1 = vmul.f32 3.0, %v6393_v9  ;;  %v3455_v17 = vmul.f32 3.0, %v6394_v48  ;;  %v3612_v16 = vrot.slane %v3580_v37, 6  ;;  %v6399_v54 = vld [vmem:[%s7072_s24 + $0x10] sm:$0x1] }
 0x1dd   : > { %v7924_v29 = vsel %vm1828_vm10, %v3506_v59, %v3505_v8  ;;  %v3488_v45 = vrot.slane %v3453_v27, 3  ;;  %v3611_v42 = vsel %vm1810_vm4, %v3610_v38, %v3578_v15  ;;  %v2684_v50 = vrot.slane %v2641_v10, 1  ;;  %v6400_v60 = vld [vmem:[%s7072_s24] sm:$0x1]  ;;  %v3584_v8 = vld [vmem:[%s7080_s26 + $0x33] sm:$0x1] }
 0x1de   : > { %v3633_v61 = vsel %vm1822_vm8, %v3632_v26, %v3631_v33  ;;  %v3487_v51 = vsel %vm1819_vm7, %v3486_v53, %v3485_v34  ;;  %v2029_v30 = vmul.f32 3.0, %v6395_v5  ;;  %v2683_v18 = vsel %vm1825_vm9, %v2682_v56, %v2681_v24  ;;  %v2150_v53 = vld [vmem:[%s7080_s26 + $0x8] sm:$0x1]  ;;  %v2160_v56 = vld [vmem:[%s7080_s26 + $0x58] sm:$0x1] }
 0x1df   : > { %v3614_v13 = vrot.slane %v3581_v11, 5  ;;  %v2027_v31 = vmul.f32 3.0, %v6396_v57  ;;  %v2065_v39 = vrot.slane %v2028_v41, 7  ;;  %v3636_v55 = vrot.slane %v3593_v35, 1  ;;  %v6402_v34 = vld [vmem:[%s7072_s24 + $0x18] sm:$0x1] }
 0x1e0   : > { %v3490_v12 = vrot.slane %v3454_v1, 2  ;;  %v3613_v44 = vsel %vm1813_vm5, %v3612_v16, %v3611_v42  ;;  %v2020_v58 = vmul.f32 3.0, %v6397_v20  ;;  %v3635_v46 = vsel %vm1825_vm9, %v3634_v19, %v3633_v61  ;;  %v2161_v16 = vld [vmem:[%s7080_s26 + $0x60] sm:$0x1]  ;;  %v2151_v19 = vld [vmem:[%s7080_s26 + $0x10] sm:$0x1] }
 0x1e1   : > { %v3489_v23 = vsel %vm1822_vm8, %v3488_v45, %v3487_v51  ;;  %v3492_v7 = vrot.slane %v3455_v17, 1  ;;  %v2030_v21 = vmul.f32 3.0, %v6398_v43  ;;  %v3616_v62 = vrot.slane %v3582_v63, 4  ;;  %v6403_v17 = vld [vmem:[%s7072_s24 + $0x68] sm:$0x1] }
 0x1e2   : > { %v2067_v32 = vrot.slane %v2029_v30, 6  ;;  %v2195_v2 = vrot.slane %v2158_v4, 7  ;;  %v2021_v49 = vmul.f32 3.0, %v6399_v54  ;;  %v3615_v47 = vsel %vm1816_vm6, %v3614_v13, %v3613_v44  ;;  %v6404_v51 = vld [vmem:[%s7072_s24 + $0x20] sm:$0x1] }
 0x1e3   : > { %v2066_v14 = vsel %vm1810_vm4, %v2065_v39, %v2027_v31  ;;  %v2019_v59 = vmul.f32 3.0, %v6400_v60  ;;  %v2051_v52 = vrot.slane %v2020_v58, 7  ;;  %v7948_v27 = vsel %vm1828_vm10, %v2684_v50, %v2683_v18  ;;  %v2149_v5 = vld [vmem:[%s7080_s26] sm:$0x1]  ;;  %v3585_v30 = vld [vmem:[%s7080_s26 + $0x3b] sm:$0x1] }
 0x1e4   : > { %v7951_v37 = vsel %vm1828_vm10, %v3636_v55, %v3635_v46  ;;  %v3491_v38 = vsel %vm1825_vm9, %v3490_v12, %v3489_v23  ;;  %v2031_v26 = vmul.f32 3.0, %v6401_v0  ;;  %v3618_v15 = vrot.slane %v3583_v40, 3  ;;  %v6405_v39 = vld [vmem:[%s7072_s24 + $0x70] sm:$0x1]  ;;  %v6406_v55 = vld [vmem:[%s7072_s24 + $0x78] sm:$0x1] }
 0x1e5   : > { %v2069_v10 = vrot.slane %v2030_v21, 5  ;;  %v2197_v33 = vrot.slane %v2159_v25, 6  ;;  %v2022_v28 = vmul.f32 3.0, %v6402_v34  ;;  %v3617_v41 = vsel %vm1819_vm7, %v3616_v62, %v3615_v47  ;;  %v2152_v20 = vld [vmem:[%s7080_s26 + $0x18] sm:$0x1] }
 0x1e6   : > { %v2068_v24 = vsel %vm1813_vm5, %v2067_v32, %v2066_v14  ;;  %v2196_v9 = vsel %vm1810_vm4, %v2195_v2, %v2157_v22  ;;  %v2053_v1 = vrot.slane %v2021_v49, 6  ;;  %v7963_v48 = vsel %vm1828_vm10, %v3492_v7, %v3491_v38  ;;  %v2162_v23 = vld [vmem:[%s7080_s26 + $0x68] sm:$0x1]  ;;  %v2163_v49 = vld [vmem:[%s7080_s26 + $0x70] sm:$0x1] }
 0x1e7   : > { %v2032_v11 = vmul.f32 3.0, %v6403_v17  ;;  %v2052_v35 = vsel %vm1810_vm4, %v2051_v52, %v2019_v59  ;;  %v2181_v45 = vrot.slane %v2150_v53, 7  ;;  %v3620_v42 = vrot.slane %v3584_v8, 2  ;;  %v6407_v40 = vld [vmem:[%s7072_s24 + $0x28] sm:$0x1] }
 0x1e8   : > { %v2071_v50 = vrot.slane %v2031_v26, 4  ;;  %v2199_v61 = vrot.slane %v2160_v56, 5  ;;  %v2023_v63 = vmul.f32 3.0, %v6404_v51  ;;  %v3619_v18 = vsel %vm1822_vm8, %v3618_v15, %v3617_v41  ;;  %v2153_v14 = vld [vmem:[%s7080_s26 + $0x20] sm:$0x1] }
 0x1e9   : > { %v2070_v13 = vsel %vm1816_vm6, %v2069_v10, %v2068_v24  ;;  %v2198_v57 = vsel %vm1813_vm5, %v2197_v33, %v2196_v9  ;;  %v2055_v31 = vrot.slane %v2022_v28, 5  ;;  %v2033_v4 = vmul.f32 3.0, %v6405_v39  ;;  %v6408_v60 = vld [vmem:[%s7072_s24 + $0x4d] sm:$0x1]  ;;  %v6409_v8 = vld [vmem:[%s7072_s24 + $0x30] sm:$0x1] }
 0x1ea   : > { %v2034_v12 = vmul.f32 3.0, %v6406_v55  ;;  %v2054_v44 = vsel %vm1813_vm5, %v2053_v1, %v2052_v35  ;;  %v2183_v58 = vrot.slane %v2151_v19, 6  ;;  %v2073_v46 = vrot.slane %v2032_v11, 3  ;;  %v2164_v10 = vld [vmem:[%s7080_s26 + $0x78] sm:$0x1] }
 0x1eb   : > { %v2201_v7 = vrot.slane %v2161_v16, 4  ;;  %v2024_v43 = vmul.f32 3.0, %v6407_v40  ;;  %v2182_v21 = vsel %vm1810_vm4, %v2181_v45, %v2149_v5  ;;  %v3622_v62 = vrot.slane %v3585_v30, 1  ;;  %v2154_v41 = vld [vmem:[%s7080_s26 + $0x28] sm:$0x1] }
 0x1ec   : > { %v2072_v32 = vsel %vm1819_vm7, %v2071_v50, %v2070_v13  ;;  %v2200_v25 = vsel %vm1816_vm6, %v2199_v61, %v2198_v57  ;;  %v2057_v2 = vrot.slane %v2023_v63, 4  ;;  %v3621_v54 = vsel %vm1825_vm9, %v3620_v42, %v3619_v18  ;;  %v6410_v9 = vld [vmem:[%s7072_s24 + $0x55] sm:$0x1]  ;;  %v6411_v17 = vld [vmem:[%s7072_s24 + $0x38] sm:$0x1] }
 0x1ed   : > { %v2056_v47 = vsel %vm1816_vm6, %v2055_v31, %v2054_v44  ;;  %v2185_v22 = vrot.slane %v2152_v20, 5  ;;  %v4409_v59 = vmul.f32 3.0, %v6408_v60  ;;  %v2075_v52 = vrot.slane %v2033_v4, 2  ;;  %v6412_v35 = vld [vmem:[%s7072_s24 + $0x45] sm:$0x1] }
 0x1ee   : > { %v2203_v38 = vrot.slane %v2162_v23, 3  ;;  %v2025_v0 = vmul.f32 3.0, %v6409_v8  ;;  %v2184_v26 = vsel %vm1813_vm5, %v2183_v58, %v2182_v21  ;;  %v2074_v53 = vsel %vm1822_vm8, %v2073_v46, %v2072_v32  ;;  %v4539_v42 = vld [vmem:[%s7080_s26 + $0x4d] sm:$0x1]  ;;  %v2155_v18 = vld [vmem:[%s7080_s26 + $0x30] sm:$0x1] }
 0x1ef   : > { %v2077_v15 = vrot.slane %v2034_v12, 1  ;;  %v2202_v56 = vsel %vm1819_vm7, %v2201_v7, %v2200_v25  ;;  %v2059_v33 = vrot.slane %v2024_v43, 3  ;;  %v2205_v34 = vrot.slane %v2163_v49, 2  ;;  %v6413_v57 = vld [vmem:[%s7072_s24 + $0x5d] sm:$0x1] }
 0x1f0   : > { %v2058_v28 = vsel %vm1819_vm7, %v2057_v2, %v2056_v47  ;;  %v2187_v24 = vrot.slane %v2153_v14, 4  ;;  %v4410_v1 = vmul.f32 3.0, %v6410_v9  ;;  %v2026_v11 = vmul.f32 3.0, %v6411_v17  ;;  %v4540_v55 = vld [vmem:[%s7080_s26 + $0x55] sm:$0x1] }
 0x1f1   : > { %v2186_v16 = vsel %vm1816_vm6, %v2185_v22, %v2184_v26  ;;  %v4408_v19 = vmul.f32 3.0, %v6412_v35  ;;  %v4446_v45 = vrot.slane %v4409_v59, 7  ;;  %v8002_v50 = vsel %vm1828_vm10, %v3622_v62, %v3621_v54  ;;  %v6414_v44 = vld [vmem:[%s7072_s24 + $0xd] sm:$0x1]  ;;  %v4538_v40 = vld [vmem:[%s7080_s26 + $0x45] sm:$0x1] }
 0x1f2   : > { %v2076_v61 = vsel %vm1825_vm9, %v2075_v52, %v2074_v53  ;;  %v2204_v51 = vsel %vm1822_vm8, %v2203_v38, %v2202_v56  ;;  %v2061_v63 = vrot.slane %v2025_v0, 2  ;;  %v2207_v5 = vrot.slane %v2164_v10, 1  ;;  %v2156_v21 = vld [vmem:[%s7080_s26 + $0x38] sm:$0x1]  ;;  %v6415_v32 = vld [vmem:[%s7072_s24 + $0x65] sm:$0x1] }
 0x1f3   : > { %v2060_v30 = vsel %vm1822_vm8, %v2059_v33, %v2058_v28  ;;  %v2189_v13 = vrot.slane %v2154_v41, 3  ;;  %v4411_v31 = vmul.f32 3.0, %v6413_v57  ;;  %v2188_v39 = vsel %vm1819_vm7, %v2187_v24, %v2186_v16  ;;  %v6416_v2 = vld [vmem:[%s7072_s24 + $0x6d] sm:$0x1]  ;;  %v4541_v14 = vld [vmem:[%s7080_s26 + $0x5d] sm:$0x1] }
 0x1f4   : > { %v4448_v4 = vrot.slane %v4410_v1, 6  ;;  %v4576_v12 = vrot.slane %v4539_v42, 7  ;;  %v4401_v20 = vmul.f32 3.0, %v6414_v44  ;;  %v8013_v58 = vsel %vm1828_vm10, %v2077_v15, %v2076_v61  ;;  %v6417_v60 = vld [vmem:[%s7072_s24 + $0x15] sm:$0x1] }
 0x1f5   : > { %v2206_v46 = vsel %vm1825_vm9, %v2205_v34, %v2204_v51  ;;  %v2063_v23 = vrot.slane %v2026_v11, 1  ;;  %v4447_v7 = vsel %vm1810_vm4, %v4446_v45, %v4408_v19  ;;  %v2062_v43 = vsel %vm1825_vm9, %v2061_v63, %v2060_v30  ;;  %v6418_v8 = vld [vmem:[%s7072_s24 + $0x5] sm:$0x1]  ;;  %v6419_v10 = vld [vmem:[%s7072_s24 + $0x75] sm:$0x1] }
 0x1f6   : > { %v2191_v62 = vrot.slane %v2155_v18, 2  ;;  %v4412_v25 = vmul.f32 3.0, %v6415_v32  ;;  %v8022_v54 = vmul.f32 3.0, %v6416_v2  ;;  %v2190_v49 = vsel %vm1822_vm8, %v2189_v13, %v2188_v39  ;;  %v6420_v33 = vld [vmem:[%s7072_s24 + $0x7d] sm:$0x1] }
 0x1f7   : > { %v4450_v47 = vrot.slane %v4411_v31, 5  ;;  %v4578_v22 = vrot.slane %v4540_v55, 6  ;;  %v4402_v59 = vmul.f32 3.0, %v6417_v60  ;;  %v4449_v52 = vsel %vm1813_vm5, %v4448_v4, %v4447_v7  ;;  %v4531_v28 = vld [vmem:[%s7080_s26 + $0xd] sm:$0x1] }
 0x1f8   : > { %v4577_v38 = vsel %vm1810_vm4, %v4576_v12, %v4538_v40  ;;  %v4400_v0 = vmul.f32 3.0, %v6418_v8  ;;  %v4432_v26 = vrot.slane %v4401_v20, 7  ;;  %v8031_v53 = vsel %vm1828_vm10, %v2207_v5, %v2206_v46  ;;  %v4542_v9 = vld [vmem:[%s7080_s26 + $0x65] sm:$0x1]  ;;  %v6421_v17 = vld [vmem:[%s7072_s24 + $0x1d] sm:$0x1] }
 0x1f9   : > { %9695 = vst [vmem:[#allocation19_spill] sm:$0xff] %v8031_v53  ;;  %v2193_v15 = vrot.slane %v2156_v21, 1  ;;  %v8034_v56 = vmul.f32 3.0, %v6419_v10  ;;  %v8037_v34 = vmul.f32 3.0, %v6420_v33  ;;  %v8041_v41 = vsel %vm1828_vm10, %v2063_v23, %v2062_v43  ;;  %v4543_v19 = vld [vmem:[%s7080_s26 + $0x6d] sm:$0x1] }
 0x1fa   : > { %v4452_v24 = vrot.slane %v4412_v25, 4  ;;  %v4580_v1 = vrot.slane %v4541_v14, 5  ;;  %v4403_v11 = vmul.f32 3.0, %v6421_v17  ;;  %v2192_v16 = vsel %vm1825_vm9, %v2191_v62, %v2190_v49  ;;  %v4532_v63 = vld [vmem:[%s7080_s26 + $0x15] sm:$0x1] }
 0x1fb   : > { %v4451_v35 = vsel %vm1816_vm6, %v4450_v47, %v4449_v52  ;;  %v4579_v45 = vsel %vm1813_vm5, %v4578_v22, %v4577_v38  ;;  %v4434_v42 = vrot.slane %v4402_v59, 6  ;;  %v4454_v61 = vrot.slane %v8022_v54, 3  ;;  %v6422_v30 = vld [vmem:[%s7072_s24 + $0x4a] sm:$0x1]  ;;  %v6423_v39 = vld [vmem:[%s7072_s24 + $0x25] sm:$0x1] }
 0x1fc   : > { %v4433_v51 = vsel %vm1810_vm4, %v4432_v26, %v4400_v0  ;;  %v4562_v5 = vrot.slane %v4531_v28, 7  ;;  %v2981_v18 = vmul.f32 3.0, %v6422_v30  ;;  %v4456_v13 = vrot.slane %v8034_v56, 2  ;;  %v4530_v55 = vld [vmem:[%s7080_s26 + $0x5] sm:$0x1] }
 0x1fd   : > { %v4458_v57 = vrot.slane %v8037_v34, 1  ;;  %v4582_v31 = vrot.slane %v4542_v9, 4  ;;  %v4404_v4 = vmul.f32 3.0, %v6423_v39  ;;  %v4453_v12 = vsel %vm1819_vm7, %v4452_v24, %v4451_v35  ;;  %v4544_v44 = vld [vmem:[%s7080_s26 + $0x75] sm:$0x1] }
 0x1fe   : > { %v4581_v20 = vsel %vm1816_vm6, %v4580_v1, %v4579_v45  ;;  %v4584_v46 = vrot.slane %v4543_v19, 3  ;;  %v4436_v23 = vrot.slane %v4403_v11, 5  ;;  %v8061_v7 = vsel %vm1828_vm10, %v2193_v15, %v2192_v16  ;;  %v4533_v43 = vld [vmem:[%s7080_s26 + $0x1d] sm:$0x1]  ;;  %v6424_v62 = vld [vmem:[%s7072_s24 + $0x52] sm:$0x1] }
 0x1ff   : > { %v4435_v40 = vsel %vm1813_vm5, %v4434_v42, %v4433_v51  ;;  %v4564_v21 = vrot.slane %v4532_v63, 6  ;;  %v2982_v32 = vmul.f32 3.0, %v6424_v62  ;;  %v3111_v25 = vld [vmem:[%s7080_s26 + $0x4a] sm:$0x1]  ;;  %v4545_v2 = vld [vmem:[%s7080_s26 + $0x7d] sm:$0x1]  ;;  %v4563_v47 = vsel %vm1810_vm4, %v4562_v5, %v4530_v55 }
 0x200   : > { %v6425_v54 = vld [vmem:[%s7072_s24 + $0x2d] sm:$0x1]  ;;  %v6426_v14 = vld [vmem:[%s7072_s24 + $0x42] sm:$0x1]  ;;  %v3018_v60 = vrot.slane %v2981_v18, 7  ;;  %v4455_v59 = vsel %vm1822_vm8, %v4454_v61, %v4453_v12  ;;  %v4583_v52 = vsel %vm1819_vm7, %v4582_v31, %v4581_v20  ;;  %v4586_v38 = vrot.slane %v4544_v44, 2 }
 0x201   : > { %v4405_v49 = vmul.f32 3.0, %v6425_v54  ;;  %v2980_v22 = vmul.f32 3.0, %v6426_v14  ;;  %v4438_v8 = vrot.slane %v4404_v4, 4  ;;  %v4534_v0 = vld [vmem:[%s7080_s26 + $0x25] sm:$0x1]  ;;  %v4437_v26 = vsel %vm1816_vm6, %v4436_v23, %v4435_v40 }
 0x202   : > { %v4566_v15 = vrot.slane %v4533_v43, 5  ;;  %v6427_v10 = vld [vmem:[%s7072_s24 + $0x5a] sm:$0x1]  ;;  %v3112_v33 = vld [vmem:[%s7080_s26 + $0x52] sm:$0x1]  ;;  %v3148_v34 = vrot.slane %v3111_v25, 7  ;;  %v4565_v1 = vsel %vm1813_vm5, %v4564_v21, %v4563_v47  ;;  %v4457_v16 = vsel %vm1825_vm9, %v4456_v13, %v4455_v59 }
 0x203   : > { %v2983_v56 = vmul.f32 3.0, %v6427_v10  ;;  %v4588_v28 = vrot.slane %v4545_v2, 1  ;;  %v6428_v24 = vld [vmem:[%s7072_s24 + $0x35] sm:$0x1]  ;;  %v3020_v17 = vrot.slane %v2982_v32, 6  ;;  %v4585_v35 = vsel %vm1822_vm8, %v4584_v46, %v4583_v52 }
 0x204   : > { %v4406_v9 = vmul.f32 3.0, %v6428_v24  ;;  %v3110_v11 = vld [vmem:[%s7080_s26 + $0x42] sm:$0x1]  ;;  %v4440_v19 = vrot.slane %v4405_v49, 3  ;;  %v4535_v45 = vld [vmem:[%s7080_s26 + $0x2d] sm:$0x1]  ;;  %v3019_v42 = vsel %vm1810_vm4, %v3018_v60, %v2980_v22  ;;  %v4439_v61 = vsel %vm1819_vm7, %v4438_v8, %v4437_v26 }
 0x205   : > { %v4568_v51 = vrot.slane %v4534_v0, 4  ;;  %v6429_v63 = vld [vmem:[%s7072_s24 + $0x62] sm:$0x1]  ;;  %v3113_v30 = vld [vmem:[%s7080_s26 + $0x5a] sm:$0x1]  ;;  %v3150_v18 = vrot.slane %v3112_v33, 6  ;;  %v4567_v13 = vsel %vm1816_vm6, %v4566_v15, %v4565_v1  ;;  %v3149_v55 = vsel %vm1810_vm4, %v3148_v34, %v3110_v11 }
 0x206   : > { %v2984_v5 = vmul.f32 3.0, %v6429_v63  ;;  %v6430_v31 = vld [vmem:[%s7072_s24 + $0x3d] sm:$0x1]  ;;  %v3022_v4 = vrot.slane %v2983_v56, 5  ;;  %v8093_v12 = vsel %vm1828_vm10, %v4458_v57, %v4457_v16  ;;  %v4587_v44 = vsel %vm1825_vm9, %v4586_v38, %v4585_v35  ;;  %v4536_v46 = vld [vmem:[%s7080_s26 + $0x35] sm:$0x1] }
 0x207   : > { %v8088_v39 = vmul.f32 3.0, %v6430_v31  ;;  %v4442_v20 = vrot.slane %v4406_v9, 2  ;;  %v8098_v23 = vld [vmem:[%s7080_s26 + $0x3d] sm:$0x1]  ;;  %v3021_v40 = vsel %vm1813_vm5, %v3020_v17, %v3019_v42  ;;  %v4441_v43 = vsel %vm1822_vm8, %v4440_v19, %v4439_v61  ;;  %v6431_v62 = vld [vmem:[%s7072_s24 + $0x6a] sm:$0x1] }
 0x208   : > { %v4570_v21 = vrot.slane %v4535_v45, 3  ;;  %v2985_v32 = vmul.f32 3.0, %v6431_v62  ;;  %v3114_v25 = vld [vmem:[%s7080_s26 + $0x62] sm:$0x1]  ;;  %v3152_v2 = vrot.slane %v3113_v30, 5  ;;  %v4569_v57 = vsel %vm1819_vm7, %v4568_v51, %v4567_v13 }
 0x209   : > { %v6432_v54 = vld [vmem:[%s7072_s24 + $0x72] sm:$0x1]  ;;  %v3024_v47 = vrot.slane %v2984_v5, 4  ;;  %v3151_v14 = vsel %vm1813_vm5, %v3150_v18, %v3149_v55  ;;  %v8110_v22 = vsel %vm1828_vm10, %v4588_v28, %v4587_v44  ;;  %v3023_v59 = vsel %vm1816_vm6, %v3022_v4, %v3021_v40  ;;  %v3115_v52 = vld [vmem:[%s7080_s26 + $0x6a] sm:$0x1] }
 0x20a   : > { %v8106_v49 = vmul.f32 3.0, %v6432_v54  ;;  %9696 = vst [vmem:[#allocation20_spill] sm:$0xff] %v8110_v22  ;;  %v6433_v38 = vld [vmem:[%s7072_s24 + $0xa] sm:$0x1]  ;;  %v4572_v0 = vrot.slane %v4536_v46, 2  ;;  %v3154_v56 = vrot.slane %v3114_v25, 4  ;;  %v8121_v33 = vsel %vm1825_vm9, %v4442_v20, %v4441_v43 }
 0x20b   : > { %v2973_v8 = vmul.f32 3.0, %v6433_v38  ;;  %v6434_v15 = vld [vmem:[%s7072_s24 + $0x7a] sm:$0x1]  ;;  %v4571_v34 = vsel %vm1822_vm8, %v4570_v21, %v4569_v57  ;;  %v3026_v28 = vrot.slane %v2985_v32, 3  ;;  %v8125_v24 = vld [vmem:[%s7080_s26 + $0x72] sm:$0x1]  ;;  %v3153_v9 = vsel %vm1816_vm6, %v3152_v2, %v3151_v14 }
 0x20c   : > { %v8118_v10 = vmul.f32 3.0, %v6434_v15  ;;  %v3025_v1 = vsel %vm1819_vm7, %v3024_v47, %v3023_v59  ;;  %v3156_v11 = vrot.slane %v3115_v52, 3  ;;  %v6435_v16 = vld [vmem:[%s7072_s24 + $0x12] sm:$0x1]  ;;  %v3103_v19 = vld [vmem:[%s7080_s26 + $0xa] sm:$0x1]  ;;  %v3155_v13 = vsel %vm1819_vm7, %v3154_v56, %v3153_v9 }
 0x20d   : > { %v2974_v35 = vmul.f32 3.0, %v6435_v16  ;;  %v8133_v45 = vld [vmem:[%s7080_s26 + $0x7a] sm:$0x1]  ;;  %v6436_v42 = vld [vmem:[%s7072_s24 + $0x2] sm:$0x1]  ;;  %v3004_v18 = vrot.slane %v2973_v8, 7  ;;  %v8158_v57 = vsel %vm1825_vm9, %v4572_v0, %v4571_v34  ;;  %v8161_v54 = vsel %vm1822_vm8, %v3026_v28, %v3025_v1 }
 0x20e   : > { %v2972_v61 = vmul.f32 3.0, %v6436_v42  ;;  %v6437_v51 = vld [vmem:[%s7072_s24 + $0x1a] sm:$0x1]  ;;  %v6438_v5 = vld [vmem:[%s7072_s24 + $0x22] sm:$0x1]  ;;  %v3134_v32 = vrot.slane %v3103_v19, 7  ;;  %v8171_v38 = vsel %vm1822_vm8, %v3156_v11, %v3155_v13 }
 0x20f   : > { %v8137_v63 = vmul.f32 3.0, %v6437_v51  ;;  %v8140_v30 = vmul.f32 3.0, %v6438_v5  ;;  %v6439_v4 = vld [vmem:[%s7072_s24 + $0x2a] sm:$0x1]  ;;  %v6440_v44 = vld [vmem:[%s7072_s24 + $0x32] sm:$0x1] }
 0x210   : > { %v8145_v55 = vmul.f32 3.0, %v6439_v4  ;;  %v8148_v20 = vmul.f32 3.0, %v6440_v44  ;;  %v3102_v46 = vld [vmem:[%s7080_s26 + $0x2] sm:$0x1]  ;;  %v6441_v43 = vld [vmem:[%s7072_s24 + $0x3a] sm:$0x1]  ;;  %v3005_v8 = vsel %vm1810_vm4, %v3004_v18, %v2972_v61 }
 0x211   : > { %v8153_v21 = vmul.f32 3.0, %v6441_v43  ;;  %v3104_v62 = vld [vmem:[%s7080_s26 + $0x12] sm:$0x1]  ;;  %v6442_v25 = vld [vmem:[%s7072_s24 + $0x4f] sm:$0x1]  ;;  %v3006_v14 = vrot.slane %v2974_v35, 6  ;;  %v3135_v61 = vsel %vm1810_vm4, %v3134_v32, %v3102_v46 }
 0x212   : > { %v5361_v2 = vmul.f32 3.0, %v6442_v25  ;;  %v8165_v59 = vld [vmem:[%s7080_s26 + $0x1a] sm:$0x1]  ;;  %v8168_v52 = vld [vmem:[%s7080_s26 + $0x22] sm:$0x1]  ;;  %v3008_v0 = vrot.slane %v8137_v63, 5 }
 0x213   : > { %v8177_v56 = vld [vmem:[%s7080_s26 + $0x2a] sm:$0x1]  ;;  %v5491_v34 = vld [vmem:[%s7080_s26 + $0x4f] sm:$0x1]  ;;  %v8183_v1 = vld [vmem:[%s7080_s26 + $0x32] sm:$0x1]  ;;  %v3007_v18 = vsel %vm1813_vm5, %v3006_v14, %v3005_v8 }
 0x214   : > { %v3136_v16 = vrot.slane %v3104_v62, 6  ;;  %v6443_v11 = vld [vmem:[%s7072_s24 + $0x57] sm:$0x1]  ;;  %v8188_v42 = vld [vmem:[%s7080_s26 + $0x3a] sm:$0x1]  ;;  %v5398_v5 = vrot.slane %v5361_v2, 7  ;;  %v3009_v17 = vsel %vm1816_vm6, %v3008_v0, %v3007_v18 }
 0x215   : > { %v5362_v35 = vmul.f32 3.0, %v6443_v11  ;;  %v6444_v51 = vld [vmem:[%s7072_s24 + $0x47] sm:$0x1]  ;;  %v3138_v13 = vrot.slane %v8165_v59, 5  ;;  %v5492_v44 = vld [vmem:[%s7080_s26 + $0x57] sm:$0x1] }
 0x216   : > { %v5360_v63 = vmul.f32 3.0, %v6444_v51  ;;  %v5528_v43 = vrot.slane %v5491_v34, 7  ;;  %v6445_v25 = vld [vmem:[%s7072_s24 + $0x5f] sm:$0x1]  ;;  %v6446_v46 = vld [vmem:[%s7072_s24 + $0x67] sm:$0x1]  ;;  %v3137_v59 = vsel %vm1813_vm5, %v3136_v16, %v3135_v61 }
 0x217   : > { %v5363_v11 = vmul.f32 3.0, %v6445_v25  ;;  %v8199_v32 = vmul.f32 3.0, %v6446_v46  ;;  %v6447_v2 = vld [vmem:[%s7072_s24 + $0x6f] sm:$0x1]  ;;  %v5490_v8 = vld [vmem:[%s7080_s26 + $0x47] sm:$0x1] }
 0x218   : > { %v8202_v14 = vmul.f32 3.0, %v6447_v2  ;;  %v5400_v51 = vrot.slane %v5362_v35, 6  ;;  %v6448_v19 = vld [vmem:[%s7072_s24 + $0xf] sm:$0x1]  ;;  %v5399_v46 = vsel %vm1810_vm4, %v5398_v5, %v5360_v63  ;;  %v5493_v31 = vld [vmem:[%s7080_s26 + $0x5f] sm:$0x1] }
 0x219   : > { %v5353_v47 = vmul.f32 3.0, %v6448_v19  ;;  %v5530_v9 = vrot.slane %v5492_v44, 6  ;;  %v6449_v2 = vld [vmem:[%s7072_s24 + $0x17] sm:$0x1]  ;;  %v6451_v16 = vld [vmem:[%s7072_s24 + $0x7f] sm:$0x1]  ;;  %v5529_v19 = vsel %vm1810_vm4, %v5528_v43, %v5490_v8 }
 0x21a   : > { %v5354_v26 = vmul.f32 3.0, %v6449_v2  ;;  %v6450_v60 = vld [vmem:[%s7072_s24 + $0x77] sm:$0x1]  ;;  %v8216_v61 = vmul.f32 3.0, %v6451_v16  ;;  %v8219_v35 = vld [vmem:[%s7080_s26 + $0x67] sm:$0x1]  ;;  %v5401_v4 = vsel %vm1813_vm5, %v5400_v51, %v5399_v46 }
 0x21b   : > { %v8213_v62 = vmul.f32 3.0, %v6450_v60  ;;  %v6452_v25 = vld [vmem:[%s7072_s24 + $0x7] sm:$0x1]  ;;  %v5483_v63 = vld [vmem:[%s7080_s26 + $0xf] sm:$0x1]  ;;  %v5402_v5 = vrot.slane %v5363_v11, 5  ;;  %v5531_v0 = vsel %vm1813_vm5, %v5530_v9, %v5529_v19 }
 0x21c   : > { %v5352_v34 = vmul.f32 3.0, %v6452_v25  ;;  %v5404_v44 = vrot.slane %v8199_v32, 4  ;;  %v5384_v60 = vrot.slane %v5353_v47, 7  ;;  %v5484_v28 = vld [vmem:[%s7080_s26 + $0x17] sm:$0x1]  ;;  %v5532_v43 = vrot.slane %v5493_v31, 5 }
 0x21d   : > { %v6453_v8 = vld [vmem:[%s7072_s24 + $0x1f] sm:$0x1]  ;;  %v5482_v15 = vld [vmem:[%s7080_s26 + $0x7] sm:$0x1]  ;;  %v3139_v32 = vsel %vm1816_vm6, %v3138_v13, %v3137_v59  ;;  %v8235_v2 = vld [vmem:[%s7080_s26 + $0x6f] sm:$0x1]  ;;  %v5403_v13 = vsel %vm1816_vm6, %v5402_v5, %v5401_v4 }
 0x21e   : > { %v5355_v25 = vmul.f32 3.0, %v6453_v8  ;;  %v5386_v31 = vrot.slane %v5354_v26, 6  ;;  %v5485_v18 = vld [vmem:[%s7080_s26 + $0x1f] sm:$0x1]  ;;  %v5514_v51 = vrot.slane %v5483_v63, 7  ;;  %v5533_v22 = vsel %vm1816_vm6, %v5532_v43, %v5531_v0 }
 0x21f   : > { %v8242_v8 = vld [vmem:[%s7080_s26 + $0x77] sm:$0x1]  ;;  %v8247_v59 = vld [vmem:[%s7080_s26 + $0x7f] sm:$0x1]  ;;  %v6454_v26 = vld [vmem:[%s7072_s24 + $0x27] sm:$0x1] }
 0x220   : > { %v5356_v9 = vmul.f32 3.0, %v6454_v26  ;;  %v5486_v19 = vld [vmem:[%s7080_s26 + $0x27] sm:$0x1]  ;;  %v5515_v63 = vsel %vm1810_vm4, %v5514_v51, %v5482_v15  ;;  %v6455_v53 = vld [vmem:[%s7072_s24 + $0x2f] sm:$0x1]  ;;  %v5518_v4 = vrot.slane %v5485_v18, 5 }
 0x221   : > { %v6457_v51 = vld [vmem:[%s7072_s24 + $0x3f] sm:$0x1]  ;;  %v9698_v18 = vrot.slane %v8168_v52, 4 }
 0x222   : > { %v8263_v26 = vmul.f32 3.0, %v6457_v51  ;;  %v5405_v51 = vsel %vm1819_vm7, %v5404_v44, %v5403_v13 }
 0x251   : > { %v707_v40 = vpop.f32.mrb[2].mxu1  ;;  %v1127_v16 = vpop.f32.mrb[4].mxu0 }
 0x252   : > { %1761 = vst.msk [vmem:[#allocation2] sm:$0xff] %vm424_vm1, %v707_v40  ;;  %1767 = vst.msk [vmem:[#allocation2 + $0x30] sm:$0xff] %vm424_vm1, %v1127_v16  ;;  %v5967_v11 = vpop.f32.mrb[3].mxu1  ;;  %v5997_v47 = vpop.f32.mrb[5].mxu0  ;;  %v5385_v16 = vsel %vm1810_vm4, %v5384_v60, %v5352_v34  ;;  %v8255_v34 = vmul.f32 3.0, %v6455_v53 }
 0x253   : > { %v5516_v11 = vrot.slane %v5484_v28, 6  ;;  %v5534_v47 = vrot.slane %v8219_v35, 4  ;;  %v5388_v28 = vrot.slane %v5355_v25, 5  ;;  %v6456_v60 = vld [vmem:[%s7072_s24 + $0x37] sm:$0x1]  ;;  %v5387_v53 = vsel %vm1813_vm5, %v5386_v31, %v5385_v16 }
 0x254   : > { %v8260_v15 = vmul.f32 3.0, %v6456_v60  ;;  %v9697_v25 = vrot.slane %v8140_v30, 4  ;;  %v8277_v60 = vld [vmem:[%s7080_s26 + $0x37] sm:$0x1]  ;;  %v5390_v16 = vrot.slane %v5356_v9, 4  ;;  %v5520_v30 = vrot.slane %v5486_v19, 4 }
 0x255   : > { %v777_v46 = vpop.f32.mrb[4].mxu1  ;;  %v1267_v40 = vpop.f32.mrb[6].mxu0  ;;  %v5517_v43 = vsel %vm1813_vm5, %v5516_v11, %v5515_v63  ;;  %v8282_v11 = vld [vmem:[%s7080_s26 + $0x3f] sm:$0x1]  ;;  %v5392_v63 = vrot.slane %v8255_v34, 3 }
 0x256   : > { %1762 = vst.msk [vmem:[#allocation2 + $0x8] sm:$0xff] %vm424_vm1, %v777_v46  ;;  %1769 = vst.msk [vmem:[#allocation2 + $0x40] sm:$0xff] %vm424_vm1, %v1267_v40  ;;  %v5972_v35 = vpop.f32.mrb[5].mxu1  ;;  %v6007_v5 = vpop.f32.mrb[7].mxu0  ;;  %v3011_v0 = vsel %vm1819_vm7, %v9697_v25, %v3009_v17  ;;  %v3141_v46 = vsel %vm1819_vm7, %v9698_v18, %v3139_v32  ;;  %v5536_v40 = vrot.slane %v8235_v2, 3  ;;  %v5535_v32 = vsel %vm1819_vm7, %v5534_v47, %v5533_v22 }
 0x257   : > { %v5487_v5 = vld [vmem:[%s7080_s26 + $0x2f] sm:$0x1]  ;;  %v5389_v2 = vsel %vm1816_vm6, %v5388_v28, %v5387_v53  ;;  %v5519_v25 = vsel %vm1816_vm6, %v5518_v4, %v5517_v43  ;;  %v6458_v28 = vld [vmem:[%s7072_s24 + $0x44] sm:$0x1]  ;;  %v6459_v34 = vld [vmem:[%s7072_s24 + $0x4c] sm:$0x1] }
 0x258   : > { %v5522_v18 = vrot.slane %v5487_v5, 3  ;;  %v8295_v53 = vmul.f32 3.0, %v6458_v28  ;;  %v8298_v4 = vmul.f32 3.0, %v6459_v34  ;;  %v6460_v43 = vld [vmem:[%s7072_s24 + $0x54] sm:$0x1]  ;;  %v9702_v5 = vrot.slane %v8106_v49, 2 }
 0x259   : > { %v847_v17 = vpop.f32.mrb[6].mxu1  ;;  %v1407_v52 = vpop.f32.mrb[8].mxu0  ;;  %v9703_v28 = vrot.slane %v8125_v24, 2  ;;  %v5521_v19 = vsel %vm1819_vm7, %v5520_v30, %v5519_v25  ;;  %v8321_v49 = vld [vmem:[#allocation2 + $0x35] sm:$0x1] }
 0x25a   : > { %1763 = vst.msk [vmem:[#allocation2 + $0x10] sm:$0xff] %vm424_vm1, %v847_v17  ;;  %1771 = vst.msk [vmem:[#allocation2 + $0x50] sm:$0xff] %vm424_vm1, %v1407_v52  ;;  %v5977_v44 = vpop.f32.mrb[7].mxu1  ;;  %v6017_v13 = vpop.f32.mrb[9].mxu0  ;;  %v8301_v17 = vmul.f32 3.0, %v6460_v43  ;;  %v3029_v47 = vsel %vm1825_vm9, %v9702_v5, %v8161_v54  ;;  %v5391_v43 = vsel %vm1819_vm7, %v5390_v16, %v5389_v2  ;;  %v9704_v54 = vrot.slane %v8145_v55, 3 }
 0x25b   : > { %9699 = vst [vmem:[#allocation21_spill] sm:$0xff] %v8295_v53  ;;  %9700 = vst [vmem:[#allocation22_spill] sm:$0xff] %v8298_v4  ;;  %v8303_v52 = vld [vmem:[#allocation2 + $0x31] sm:$0x1]  ;;  %v8305_v44 = vld [vmem:[#allocation2 + $0x33] sm:$0x1]  ;;  %v3159_v34 = vsel %vm1825_vm9, %v9703_v28, %v8171_v38  ;;  %v5537_v2 = vsel %vm1822_vm8, %v5536_v40, %v5535_v32 }
 0x25c   : > { %9701 = vst [vmem:[#allocation23_spill] sm:$0xff] %v8301_v17  ;;  %v8307_v13 = vld [vmem:[#allocation2 + $0x30] sm:$0x1]  ;;  %v3013_v24 = vsel %vm1822_vm8, %v9704_v54, %v3011_v0  ;;  %v9705_v5 = vrot.slane %v8177_v56, 3  ;;  %v9706_v16 = vrot.slane %v8202_v14, 3 }
 0x25d   : > { %v917_v31 = vpop.f32.mrb[8].mxu1  ;;  %v1547_v22 = vpop.f32.mrb[10].mxu0  ;;  %v8319_v9 = vld [vmem:[#allocation2 + $0x9] sm:$0x1]  ;;  %v6461_v55 = vld [vmem:[%s7072_s24 + $0x5c] sm:$0x1] }
 0x25e   : > { %v3143_v38 = vsel %vm1822_vm8, %v9705_v5, %v3141_v46  ;;  %v5407_v30 = vsel %vm1822_vm8, %v9706_v16, %v5405_v51  ;;  %1764 = vst.msk [vmem:[#allocation2 + $0x18] sm:$0xff] %vm424_vm1, %v917_v31  ;;  %1773 = vst.msk [vmem:[#allocation2 + $0x60] sm:$0xff] %vm424_vm1, %v1547_v22  ;;  %v5982_v25 = vpop.f32.mrb[9].mxu1  ;;  %v6027_v28 = vpop.f32.mrb[11].mxu0  ;;  %v8336_v35 = vmul.f32 3.0, %v6461_v55  ;;  %v5393_v22 = vsel %vm1822_vm8, %v5392_v63, %v5391_v43 }
 0x25f   : > { %v6462_v0 = vld [vmem:[%s7072_s24 + $0x64] sm:$0x1]  ;;  %v6463_v46 = vld [vmem:[%s7072_s24 + $0x6c] sm:$0x1]  ;;  %v6464_v14 = vld [vmem:[%s7072_s24 + $0x74] sm:$0x1]  ;;  %v5523_v5 = vsel %vm1822_vm8, %v5522_v18, %v5521_v19  ;;  %v8357_v28 = vpop.permute.xlu0 %2009 }
 0x260   : > { %9707 = vst [vmem:[#allocation24_spill] sm:$0xff] %v8336_v35  ;;  %v8339_v56 = vmul.f32 3.0, %v6462_v0  ;;  %v8342_v54 = vmul.f32 3.0, %v6463_v46  ;;  %v8345_v51 = vmul.f32 3.0, %v6464_v14  ;;  %v8348_v31 = vld [vmem:[#allocation2 + $0xb] sm:$0x1] }
 0x261   : > { %v8350_v32 = vld [vmem:[#allocation2 + $0x8] sm:$0x1]  ;;  %v6465_v16 = vld [vmem:[%s7072_s24 + $0x7c] sm:$0x1]  ;;  %v2594_v55 = vrot.slane %v8319_v9, 7  ;;  %v9712_v19 = vrot.slane %v8088_v39, 1 }
 0x262   : > { %9708 = vst [vmem:[#allocation25_spill] sm:$0xff] %v8339_v56  ;;  %9709 = vst [vmem:[#allocation26_spill] sm:$0xff] %v8342_v54  ;;  %v8355_v25 = vmul.f32 3.0, %v6465_v16  ;;  %v8363_v40 = vld [vmem:[#allocation2 + $0x51] sm:$0x1]  ;;  %v1687_v54 = vpop.f32.mrb[12].mxu0 }
 0x263   : > { %9710 = vst [vmem:[#allocation27_spill] sm:$0xff] %v8345_v51  ;;  %v987_v51 = vpop.f32.mrb[10].mxu1  ;;  %v8365_v63 = vld [vmem:[#allocation2 + $0x11] sm:$0x1]  ;;  %v8371_v18 = vsel %vm1828_vm10, %v9712_v19, %v8121_v33  ;;  %v9713_v9 = vrot.slane %v8098_v23, 1  ;;  %v9715_v16 = vrot.slane %v8148_v20, 2 }
 0x264   : > { %9711 = vst [vmem:[#allocation28_spill] sm:$0xff] %v8355_v25  ;;  %v9716_v46 = vrot.slane %v8183_v1, 2  ;;  %1765 = vst.msk [vmem:[#allocation2 + $0x20] sm:$0xff] %vm424_vm1, %v987_v51  ;;  %v5987_v39 = vpop.f32.mrb[11].mxu1  ;;  %v6037_v33 = vpop.f32.mrb[13].mxu0  ;;  %v3546_v23 = vrot.slane %v8348_v31, 7 }
 0x265   : > { %v8377_v43 = vsel %vm1828_vm10, %v9713_v9, %v8158_v57  ;;  %v3015_v14 = vsel %vm1825_vm9, %v9715_v16, %v3013_v24  ;;  %1775 = vst.msk [vmem:[#allocation2 + $0x70] sm:$0xff] %vm424_vm1, %v1687_v54  ;;  %v8387_v19 = vld [vmem:[#allocation2 + $0x53] sm:$0x1]  ;;  %v2117_v57 = vrot.slane %v8350_v32, 7  ;;  %v9717_v20 = vrot.slane %v8213_v62, 2 }
 0x266   : > { %9714 = vst [vmem:[#allocation29_spill] sm:$0xff] %v8377_v43  ;;  %v3145_v0 = vsel %vm1825_vm9, %v9716_v46, %v3143_v38  ;;  %v9718_v1 = vrot.slane %v8242_v8, 2  ;;  %v3516_v46 = vld [vmem:[#allocation2 + $0x13] sm:$0x1]  ;;  %v8397_v51 = vld [vmem:[#allocation2 + $0x50] sm:$0x1] }
 0x267   : > { %v5409_v24 = vsel %vm1825_vm9, %v9717_v20, %v5407_v30  ;;  %v8399_v54 = vld [vmem:[#allocation2 + $0xd] sm:$0x1]  ;;  %v9719_v9 = vrot.slane %v8118_v10, 1  ;;  %v9720_v31 = vrot.slane %v8133_v45, 1  ;;  %v9722_v30 = vrot.slane %v8260_v15, 2  ;;  %v1057_v15 = vpop.f32.mrb[12].mxu1 }
 0x268   : > { %v5539_v38 = vsel %vm1825_vm9, %v9718_v1, %v5537_v2  ;;  %v9723_v2 = vrot.slane %v8277_v60, 2  ;;  %v2562_v33 = vld [vmem:[#allocation2 + $0x1] sm:$0x1]  ;;  %v2596_v10 = vrot.slane %v8365_v63, 6  ;;  %v3514_v20 = vld [vmem:[#allocation2 + $0x3] sm:$0x1] }
 0x269   : > { %v8404_v16 = vsel %vm1828_vm10, %v9719_v9, %v3029_v47  ;;  %v8409_v62 = vsel %vm1828_vm10, %v9720_v31, %v3159_v34  ;;  %v5395_v8 = vsel %vm1825_vm9, %v9722_v30, %v5393_v22  ;;  %v8419_v47 = vpop.permute.xlu0 %2014  ;;  %v3548_v34 = vrot.slane %v3516_v46, 6  ;;  %v2087_v1 = vld [vmem:[#allocation2 + $0x10] sm:$0x1]  ;;  %v8422_v9 = vld [vmem:[#allocation2 + $0x61] sm:$0x1]  ;;  %v6049_v22 = vpop.f32.mrb[14].mxu0 }
 0x26a   : > { %9721 = vst [vmem:[#allocation30_spill] sm:$0xff] %v8409_v62  ;;  %v5525_v32 = vsel %vm1825_vm9, %v9723_v2, %v5523_v5  ;;  %v2565_v31 = vld [vmem:[#allocation2 + $0x19] sm:$0x1]  ;;  %v9724_v60 = vrot.slane %v8153_v21, 1  ;;  %v9726_v30 = vrot.slane %v8188_v42, 1  ;;  %v9728_v2 = vrot.slane %v8216_v61, 1 }
 0x26b   : > { %v9730_v45 = vrot.slane %v8247_v59, 1  ;;  %1766 = vst.msk [vmem:[#allocation2 + $0x28] sm:$0xff] %vm424_vm1, %v1057_v15  ;;  %v5992_v21 = vpop.f32.mrb[13].mxu1  ;;  %v9732_v61 = vrot.slane %v8263_v26, 1  ;;  %v9734_v59 = vrot.slane %v8282_v11, 1  ;;  %v2595_v15 = vsel %vm1810_vm4, %v2594_v55, %v2562_v33 }
 0x26c   : > { %v8427_v5 = vsel %vm1828_vm10, %v9724_v60, %v3015_v14  ;;  %v8432_v63 = vsel %vm1828_vm10, %v9726_v30, %v3145_v0  ;;  %v8437_v46 = vsel %vm1828_vm10, %v9728_v2, %v5409_v24  ;;  %v1919_v14 = vpop.f32.mrb[15].mxu0  ;;  %v8445_v60 = vld [vmem:[#allocation2 + $0x63] sm:$0x1]  ;;  %v2085_v0 = vld [vmem:[#allocation2] sm:$0x1]  ;;  %v2598_v2 = vrot.slane %v2565_v31, 5 }
 0x26d   : > { %9725 = vst [vmem:[#allocation31_spill] sm:$0xff] %v8427_v5  ;;  %9727 = vst [vmem:[#allocation32_spill] sm:$0xff] %v8432_v63  ;;  %v8442_v39 = vsel %vm1828_vm10, %v9730_v45, %v5539_v38  ;;  %v8452_v24 = vsel %vm1828_vm10, %v9732_v61, %v5395_v8  ;;  %v8457_v38 = vsel %vm1828_vm10, %v9734_v59, %v5525_v32  ;;  %v3517_v21 = vld [vmem:[#allocation2 + $0x1b] sm:$0x1]  ;;  %v8462_v25 = vld [vmem:[#allocation2 + $0x60] sm:$0x1] }
 0x26e   : > { %9729 = vst [vmem:[#allocation33_spill] sm:$0xff] %v8437_v46  ;;  %9731 = vst [vmem:[#allocation34_spill] sm:$0xff] %v8442_v39  ;;  %v3547_v42 = vsel %vm1810_vm4, %v3546_v23, %v3514_v20  ;;  %v3550_v30 = vrot.slane %v3517_v21, 5  ;;  %v2088_v61 = vld [vmem:[#allocation2 + $0x18] sm:$0x1]  ;;  %v2119_v11 = vrot.slane %v2087_v1, 6  ;;  %v2597_v55 = vsel %vm1813_vm5, %v2596_v10, %v2595_v15 }
 0x26f   : > { %9733 = vst [vmem:[#allocation35_spill] sm:$0xff] %v8452_v24  ;;  %9735 = vst [vmem:[#allocation36_spill] sm:$0xff] %v8457_v38  ;;  %v8466_v53 = vld [vmem:[#allocation2 + $0x71] sm:$0x1]  ;;  %v1197_v32 = vpop.f32.mrb[14].mxu1  ;;  %v6067_v59 = vpop.f32.mrb[16].mxu0  ;;  %v3549_v33 = vsel %vm1813_vm5, %v3548_v34, %v3547_v42  ;;  %v8471_v23 = vmul.f32 %v6049_v22, %v8419_v47  ;;  %v2118_v20 = vsel %vm1810_vm4, %v2117_v57, %v2085_v0 }
 0x270   : > { %v2566_v45 = vld [vmem:[#allocation2 + $0x21] sm:$0x1]  ;;  %1768 = vst.msk [vmem:[#allocation2 + $0x38] sm:$0xff] %vm424_vm1, %v1197_v32  ;;  %v6002_v21 = vpop.f32.mrb[15].mxu1  ;;  %v2406_v1 = vpop.f32.mrb[17].mxu0  ;;  %v2495_v26 = vmul.f32 %v6067_v59, %v8419_v47  ;;  %v8480_v10 = vmul.f32 %v8357_v28, %v1919_v14  ;;  %v2599_v42 = vsel %vm1816_vm6, %v2598_v2, %v2597_v55  ;;  %v3551_v59 = vsel %vm1816_vm6, %v3550_v30, %v3549_v33 }
 0x271   : > { %v2600_v8 = vrot.slane %v2566_v45, 4  ;;  %v8477_v38 = vld [vmem:[#allocation2 + $0x73] sm:$0x1]  ;;  %v8482_v34 = vld [vmem:[#allocation2 + $0x55] sm:$0x1]  ;;  %v2494_v57 = vmul.f32 %v2406_v1, %v8357_v28  ;;  %v2121_v45 = vrot.slane %v2088_v61, 5  ;;  %v2120_v39 = vsel %vm1813_vm5, %v2119_v11, %v2118_v20 }
 0x272   : > { %v8484_v22 = vld [vmem:[#allocation2 + $0x65] sm:$0x1]  ;;  %v3518_v15 = vld [vmem:[#allocation2 + $0x23] sm:$0x1]  ;;  %v8489_v32 = vld [vmem:[#allocation2 + $0x70] sm:$0x1]  ;;  %v2559_v0 = vsub.f32 %v2495_v26, %v7910_v3 }
 0x273   : > { %v3552_v21 = vrot.slane %v3518_v15, 4  ;;  %v2089_v31 = vld [vmem:[#allocation2 + $0x20] sm:$0x1]  ;;  %v8494_v56 = vld [vmem:[#allocation2 + $0x75] sm:$0x1]  ;;  %v1337_v35 = vpop.f32.mrb[16].mxu1  ;;  %v2558_v1 = vsub.f32 %v2494_v57, %v7888_v36  ;;  %v2601_v55 = vsel %vm1819_vm7, %v2600_v8, %v2599_v42  ;;  %v2122_v14 = vsel %vm1816_vm6, %v2121_v45, %v2120_v39 }
 0x274   : > { %v2567_v2 = vld [vmem:[#allocation2 + $0x29] sm:$0x1]  ;;  %v3519_v17 = vld [vmem:[#allocation2 + $0x2b] sm:$0x1]  ;;  %v2123_v61 = vrot.slane %v2089_v31, 4  ;;  %1770 = vst.msk [vmem:[#allocation2 + $0x48] sm:$0xff] %vm424_vm1, %v1337_v35 }
 0x275   : > { %v4466_v4 = vld [vmem:[#allocation2 + $0x5] sm:$0x1]  ;;  %v6012_v30 = vpop.f32.mrb[17].mxu1  ;;  %v2602_v33 = vrot.slane %v2567_v2, 3  ;;  %v3553_v15 = vsel %vm1819_vm7, %v3552_v21, %v3551_v59  ;;  %v3554_v11 = vrot.slane %v3519_v17, 3  ;;  %v9736_v39 = vrot.slane %v8399_v54, 7 }
 0x276   : > { %v2090_v20 = vld [vmem:[#allocation2 + $0x28] sm:$0x1]  ;;  %v4468_v26 = vld [vmem:[#allocation2 + $0x15] sm:$0x1]  ;;  %v2124_v57 = vsel %vm1819_vm7, %v2123_v61, %v2122_v14  ;;  %v4469_v42 = vld [vmem:[#allocation2 + $0x1d] sm:$0x1] }
 0x277   : > { %v2125_v63 = vrot.slane %v2090_v20, 3  ;;  %v2603_v31 = vsel %vm1822_vm8, %v2602_v33, %v2601_v55  ;;  %v3555_v35 = vsel %vm1822_vm8, %v3554_v11, %v3553_v15  ;;  %v4470_v59 = vld [vmem:[#allocation2 + $0x25] sm:$0x1]  ;;  %v8508_v17 = vld [vmem:[#allocation2 + $0x2d] sm:$0x1]  ;;  %v4499_v45 = vsel %vm1810_vm4, %v9736_v39, %v4466_v4  ;;  %v1477_v21 = vpop.f32.mrb[18].mxu1 }
 0x278   : > { %v6078_v2 = vpop.f32.mrb[18].mxu0  ;;  %v2569_v30 = vld [vmem:[#allocation2 + $0x39] sm:$0x1]  ;;  %v9737_v20 = vrot.slane %v8303_v52, 2  ;;  %v3521_v55 = vld [vmem:[#allocation2 + $0x3b] sm:$0x1] }
 0x279   : > { %v2126_v61 = vsel %vm1822_vm8, %v2125_v63, %v2124_v57  ;;  %1772 = vst.msk [vmem:[#allocation2 + $0x58] sm:$0xff] %vm424_vm1, %v1477_v21  ;;  %v6022_v54 = vpop.f32.mrb[19].mxu1  ;;  %v2485_v4 = vpop.f32.mrb[19].mxu0  ;;  %v2606_v15 = vrot.slane %v2569_v30, 1  ;;  %v8522_v11 = vadd.f32 %v6078_v2, %v2559_v0  ;;  %v9738_v52 = vrot.slane %v8305_v44, 2 }
 0x27a   : > { %v2605_v3 = vsel %vm1825_vm9, %v9737_v20, %v2603_v31  ;;  %v3558_v39 = vrot.slane %v3521_v55, 1  ;;  %v2092_v20 = vld [vmem:[#allocation2 + $0x38] sm:$0x1]  ;;  %v2560_v8 = vadd.f32 %v2558_v1, %v2485_v4  ;;  %v4500_v33 = vrot.slane %v4468_v26, 6  ;;  %v2570_v2 = vld [vmem:[#allocation2 + $0x41] sm:$0x1] }
 0x27b   : > { %v3557_v31 = vsel %vm1825_vm9, %v9738_v52, %v3555_v35  ;;  %v2129_v36 = vrot.slane %v2092_v20, 1  ;;  %v4502_v14 = vrot.slane %v4469_v42, 5  ;;  %v2607_v63 = vsel %vm1828_vm10, %v2606_v15, %v2605_v3  ;;  %v2571_v30 = vld [vmem:[#allocation2 + $0x49] sm:$0x1]  ;;  %v1617_v24 = vpop.f32.mrb[20].mxu1  ;;  %v6103_v35 = vpop.f32.mrb[20].mxu0 }
 0x27c   : > { %v9739_v57 = vrot.slane %v8307_v13, 2  ;;  %v4504_v54 = vrot.slane %v4470_v59, 4  ;;  %v2624_v44 = vadd.f32 %v2607_v63, %v2560_v8  ;;  %v3523_v55 = vld [vmem:[#allocation2 + $0x4b] sm:$0x1]  ;;  %v8533_v1 = vsel %vm1828_vm10, %v3558_v39, %v3557_v31  ;;  %1774 = vst.msk [vmem:[#allocation2 + $0x68] sm:$0xff] %vm424_vm1, %v1617_v24  ;;  %v6032_v42 = vpop.f32.mrb[21].mxu1 }
 0x27d   : > { %v4501_v3 = vsel %vm1813_vm5, %v4500_v33, %v4499_v45  ;;  %v2608_v13 = vrot.slane %v2571_v30, 7  ;;  %v3447_v59 = vmul.f32 %v6103_v35, %v8419_v47  ;;  %v3560_v4 = vrot.slane %v3523_v55, 7  ;;  %v8541_v8 = vld [vmem:[#allocation2 + $0x48] sm:$0x1]  ;;  %v8549_v33 = vld [vmem:[#allocation2 + $0x4d] sm:$0x1] }
 0x27e   : > { %v2128_v21 = vsel %vm1825_vm9, %v9739_v57, %v2126_v61  ;;  %v3358_v61 = vpop.f32.mrb[21].mxu0  ;;  %v4503_v15 = vsel %vm1816_vm6, %v4502_v14, %v4501_v3  ;;  %v2688_v52 = vadd.f32 %v7899_v6, %v2624_v44  ;;  %v2131_v45 = vrot.slane %v8541_v8, 7  ;;  %v1757_v35 = vpop.f32.mrb[22].mxu1  ;;  %v6468_v8 = vld [vmem:[%s7072_s24 + $0x11] sm:$0x1] }
 0x27f   : > { %v8536_v26 = vsel %vm1828_vm10, %v2129_v36, %v2128_v21  ;;  %v8546_v31 = vmul.f32 %v3358_v61, %v8357_v28  ;;  %v3522_v36 = vld [vmem:[#allocation2 + $0x43] sm:$0x1]  ;;  %v8552_v24 = vsel %vm1819_vm7, %v4504_v54, %v4503_v15  ;;  %v2609_v39 = vsel %vm1810_vm4, %v2608_v13, %v2570_v2  ;;  %1776 = vst.msk [vmem:[#allocation2 + $0x78] sm:$0xff] %vm424_vm1, %v1757_v35  ;;  %v6042_v13 = vpop.f32.mrb[23].mxu1  ;;  %v6467_v61 = vld [vmem:[%s7072_s24 + $0x9] sm:$0x1] }
 0x280   : > { %v3511_v20 = vsub.f32 %v3447_v59, %v7924_v29  ;;  %v3561_v14 = vsel %vm1810_vm4, %v3560_v4, %v3522_v36  ;;  %v2573_v63 = vld [vmem:[#allocation2 + $0x59] sm:$0x1]  ;;  %v9740_v57 = vrot.slane %v8363_v40, 6  ;;  %v2692_v30 = vrot.slane %v2688_v52, 1  ;;  %v6466_v59 = vld [vmem:[%s7072_s24 + $0x1] sm:$0x1] }
 0x281   : > { %v2693_v44 = vrot.slane %v2688_v52, 2  ;;  %v2694_v54 = vrot.slane %v2688_v52, 3  ;;  %v2612_v2 = vrot.slane %v2573_v63, 5  ;;  %v2695_v55 = vrot.slane %v2688_v52, 4  ;;  %v3525_v36 = vld [vmem:[#allocation2 + $0x5b] sm:$0x1] }
 0x282   : > { %v2611_v21 = vsel %vm1813_vm5, %v9740_v57, %v2609_v39  ;;  %v2696_v29 = vrot.slane %v2688_v52, 5  ;;  %v2697_v3 = vrot.slane %v2688_v52, 6  ;;  %v2698_v42 = vrot.slane %v2688_v52, 7  ;;  %v6469_v63 = vld [vmem:[%s7072_s24 + $0x19] sm:$0x1] }
 0x283   : > { %v2722_v40 = vadd.f32 %v6466_v59, %v2688_v52  ;;  %v2723_v4 = vadd.f32 %v6467_v61, %v2692_v30  ;;  %v2724_v15 = vadd.f32 %v6468_v8, %v2693_v44  ;;  %v2613_v39 = vsel %vm1816_vm6, %v2612_v2, %v2611_v21  ;;  %v6470_v0 = vld [vmem:[%s7072_s24 + $0x21] sm:$0x1]  ;;  %v6471_v46 = vld [vmem:[%s7072_s24 + $0x29] sm:$0x1]  ;;  %v2093_v13 = vld [vmem:[#allocation2 + $0x40] sm:$0x1] }
 0x284   : > { %v2725_v57 = vadd.f32 %v6469_v63, %v2694_v54  ;;  %v2726_v6 = vadd.f32 %v6470_v0, %v2695_v55  ;;  %v2727_v35 = vadd.f32 %v6471_v46, %v2696_v29  ;;  %v2096_v62 = vld [vmem:[#allocation2 + $0x58] sm:$0x1]  ;;  %v6472_v5 = vld [vmem:[%s7072_s24 + $0x31] sm:$0x1]  ;;  %v6473_v52 = vld [vmem:[%s7072_s24 + $0x39] sm:$0x1] }
 0x285   : > { %v2728_v43 = vadd.f32 %v6472_v5, %v2697_v3  ;;  %v2729_v59 = vadd.f32 %v6473_v52, %v2698_v42  ;;  %2738 = vst.msk [vmem:[%s8572_s19 + $0x1] sm:$0x1] %vm2261_vm12, %v2722_v40  ;;  %2739 = vst.msk [vmem:[%s8572_s19 + $0x9] sm:$0x1] %vm2261_vm12, %v2723_v4  ;;  %v2575_v46 = vld [vmem:[#allocation2 + $0x69] sm:$0x1] }
 0x286   : > { %2740 = vst.msk [vmem:[%s8572_s19 + $0x11] sm:$0x1] %vm2261_vm12, %v2724_v15  ;;  %v9741_v5 = vrot.slane %v8422_v9, 4  ;;  %v6114_v21 = vpop.f32.mrb[22].mxu0  ;;  %v3527_v30 = vld [vmem:[#allocation2 + $0x6b] sm:$0x1] }
 0x287   : > { %v9742_v44 = vrot.slane %v8387_v19, 6  ;;  %2741 = vst.msk [vmem:[%s8572_s19 + $0x19] sm:$0x1] %vm2261_vm12, %v2725_v57  ;;  %2742 = vst.msk [vmem:[%s8572_s19 + $0x21] sm:$0x1] %vm2261_vm12, %v2726_v6  ;;  %v2616_v2 = vrot.slane %v2575_v46, 3  ;;  %v3513_v55 = vadd.f32 %v6114_v21, %v3511_v20  ;;  %v3510_v19 = vsub.f32 %v8546_v31, %v7963_v48 }
 0x288   : > { %v2615_v0 = vsel %vm1819_vm7, %v9741_v5, %v2613_v39  ;;  %2743 = vst.msk [vmem:[%s8572_s19 + $0x29] sm:$0x1] %vm2261_vm12, %v2727_v35  ;;  %v3564_v29 = vrot.slane %v3525_v36, 5  ;;  %v3568_v3 = vrot.slane %v3527_v30, 3  ;;  %v3437_v42 = vpop.f32.mrb[23].mxu0  ;;  %v2135_v40 = vrot.slane %v2096_v62, 5 }
 0x289   : > { %v3563_v54 = vsel %vm1813_vm5, %v9742_v44, %v3561_v14  ;;  %v2098_v9 = vld [vmem:[#allocation2 + $0x68] sm:$0x1]  ;;  %2744 = vst.msk [vmem:[%s8572_s19 + $0x31] sm:$0x1] %vm2261_vm12, %v2728_v43  ;;  %2745 = vst.msk [vmem:[%s8572_s19 + $0x39] sm:$0x1] %vm2261_vm12, %v2729_v59  ;;  %v2132_v14 = vsel %vm1810_vm4, %v2131_v45, %v2093_v13  ;;  %v2617_v4 = vsel %vm1822_vm8, %v2616_v2, %v2615_v0 }
 0x28a   : > { %v2139_v61 = vrot.slane %v2098_v9, 3  ;;  %v4474_v6 = vld [vmem:[#allocation2 + $0x45] sm:$0x1]  ;;  %v3565_v20 = vsel %vm1816_vm6, %v3564_v29, %v3563_v54  ;;  %v9743_v8 = vrot.slane %v8397_v51, 6  ;;  %v9744_v43 = vrot.slane %v8549_v33, 7  ;;  %v6060_v35 = vpop.f32.mrb[24].mxu1 }
 0x28b   : > { %v2577_v39 = vld [vmem:[#allocation2 + $0x79] sm:$0x1]  ;;  %v9745_v48 = vrot.slane %v8466_v53, 2  ;;  %v3529_v31 = vld [vmem:[#allocation2 + $0x7b] sm:$0x1]  ;;  %v9746_v45 = vrot.slane %v8445_v60, 4  ;;  %v3512_v57 = vadd.f32 %v3510_v19, %v3437_v42  ;;  %v9747_v46 = vsub.f32 %v8471_v23, %v8013_v58 }
 0x28c   : > { %v2134_v15 = vsel %vm1813_vm5, %v9743_v8, %v2132_v14  ;;  %v8607_v36 = vsel %vm1810_vm4, %v9744_v43, %v4474_v6  ;;  %v6139_v13 = vpop.f32.mrb[24].mxu0  ;;  %v2620_v52 = vrot.slane %v2577_v39, 1  ;;  %v3572_v59 = vrot.slane %v3529_v31, 1  ;;  %v2100_v5 = vld [vmem:[#allocation2 + $0x78] sm:$0x1]  ;;  %v1998_v0 = vpop.f32.mrb[25].mxu1 }
 0x28d   : > { %v2619_v62 = vsel %vm1825_vm9, %v9745_v48, %v2617_v4  ;;  %v3567_v63 = vsel %vm1819_vm7, %v9746_v45, %v3565_v20  ;;  %v2136_v51 = vsel %vm1816_vm6, %v2135_v40, %v2134_v15  ;;  %v8620_v53 = vadd.f32 %v6060_v35, %v9747_v46  ;;  %v8622_v21 = vpop.f32.mrb[25].mxu0  ;;  %v6085_v40 = vpop.f32.mrb[26].mxu1 }
 0x28e   : > { %v3569_v33 = vsel %vm1822_vm8, %v3568_v3, %v3567_v63  ;;  %v9748_v60 = vrot.slane %v8477_v38, 2  ;;  %v3576_v44 = vadd.f32 %v8533_v1, %v3512_v57  ;;  %v9749_v54 = vrot.slane %v8462_v25, 4  ;;  %v8668_v48 = vpop.f32.mrb[26].mxu0  ;;  %v6474_v63 = vld [vmem:[%s7072_s24 + $0x41] sm:$0x1] }
 0x28f   : > { %v2143_v29 = vrot.slane %v2100_v5, 1  ;;  %v2621_v3 = vsel %vm1828_vm10, %v2620_v52, %v2619_v62  ;;  %v9750_v42 = vsub.f32 %v8480_v10, %v8041_v41  ;;  %v9751_v25 = vrot.slane %v8489_v32, 2  ;;  %v8671_v35 = vpop.f32.mrb[27].mxu0  ;;  %v6476_v52 = vld [vmem:[%s7072_s24 + $0x51] sm:$0x1] }
 0x290   : > { %v3571_v30 = vsel %vm1825_vm9, %v9748_v60, %v3569_v33  ;;  %v2138_v2 = vsel %vm1819_vm7, %v9749_v54, %v2136_v51  ;;  %v2625_v38 = vadd.f32 %v2621_v3, %v8522_v11  ;;  %v8639_v1 = vadd.f32 %v8002_v50, %v3576_v44  ;;  %v8656_v11 = vpop.f32.mrb[27].mxu1  ;;  %v6475_v51 = vld [vmem:[%s7072_s24 + $0x49] sm:$0x1]  ;;  %v6478_v5 = vld [vmem:[%s7072_s24 + $0x61] sm:$0x1] }
 0x291   : > { %v3573_v58 = vsel %vm1828_vm10, %v3572_v59, %v3571_v30  ;;  %v2140_v23 = vsel %vm1822_vm8, %v2139_v61, %v2138_v2  ;;  %v2083_v9 = vadd.f32 %v9750_v42, %v1998_v0  ;;  %v8651_v41 = vmul.f32 %v6085_v40, %v8419_v47  ;;  %v6477_v59 = vld [vmem:[%s7072_s24 + $0x59] sm:$0x1]  ;;  %v6479_v60 = vld [vmem:[%s7072_s24 + $0x69] sm:$0x1]  ;;  %v6480_v44 = vld [vmem:[%s7072_s24 + $0x71] sm:$0x1] }
 0x292   : > { %v3577_v19 = vadd.f32 %v3573_v58, %v3513_v55  ;;  %v2142_v14 = vsel %vm1825_vm9, %v9751_v25, %v2140_v23  ;;  %v8654_v10 = vmul.f32 %v6139_v13, %v8419_v47  ;;  %v2689_v50 = vadd.f32 %v7948_v27, %v2625_v38  ;;  %v6481_v2 = vld [vmem:[%s7072_s24 + $0x79] sm:$0x1]  ;;  %v8695_v38 = vpop.f32.mrb[28].mxu1  ;;  %v6482_v40 = vld [vmem:[%s7072_s24 + $0x43] sm:$0x1] }
 0x293   : > { %v8645_v6 = vsel %vm1828_vm10, %v2143_v29, %v2142_v14  ;;  %v8648_v61 = vadd.f32 %v8536_v26, %v2083_v9  ;;  %v3644_v55 = vrot.slane %v8639_v1, 1  ;;  %v3645_v4 = vrot.slane %v8639_v1, 2 }
 0x294   : > { %v8660_v32 = vadd.f32 %v7951_v37, %v3577_v19  ;;  %v3646_v26 = vrot.slane %v8639_v1, 3  ;;  %v3647_v20 = vrot.slane %v8639_v1, 4  ;;  %v3648_v8 = vrot.slane %v8639_v1, 5  ;;  %v8697_v19 = vpop.f32.mrb[28].mxu0 }
 0x295   : > { %v3649_v15 = vrot.slane %v8639_v1, 6  ;;  %v2699_v27 = vrot.slane %v2689_v50, 1  ;;  %v2700_v43 = vrot.slane %v2689_v50, 2  ;;  %v2701_v37 = vrot.slane %v2689_v50, 3 }
 0x296   : > { %v2702_v39 = vrot.slane %v2689_v50, 4  ;;  %v2703_v62 = vrot.slane %v2689_v50, 5  ;;  %v2704_v31 = vrot.slane %v2689_v50, 6  ;;  %v2705_v45 = vrot.slane %v2689_v50, 7 }
 0x297   : > { %v2730_v57 = vadd.f32 %v6474_v63, %v2689_v50  ;;  %v2731_v13 = vadd.f32 %v6475_v51, %v2699_v27  ;;  %v2732_v33 = vadd.f32 %v6476_v52, %v2700_v43  ;;  %v2733_v46 = vadd.f32 %v6477_v59, %v2701_v37  ;;  %v6483_v27 = vld [vmem:[%s7072_s24 + $0x4b] sm:$0x1]  ;;  %v8710_v37 = vpop.f32.mrb[29].mxu1  ;;  %v6488_v52 = vld [vmem:[%s7072_s24 + $0x73] sm:$0x1] }
 0x298   : > { %v2734_v0 = vadd.f32 %v6478_v5, %v2702_v39  ;;  %v2735_v30 = vadd.f32 %v6479_v60, %v2703_v62  ;;  %v2736_v54 = vadd.f32 %v6480_v44, %v2704_v31  ;;  %v2737_v29 = vadd.f32 %v6481_v2, %v2705_v45  ;;  %v8712_v39 = vpop.f32.mrb[29].mxu0  ;;  %v6484_v62 = vld [vmem:[%s7072_s24 + $0x53] sm:$0x1]  ;;  %v6485_v45 = vld [vmem:[%s7072_s24 + $0x5b] sm:$0x1] }
 0x299   : > { %2746 = vst.msk [vmem:[%s8572_s19 + $0x41] sm:$0x1] %vm2261_vm12, %v2730_v57  ;;  %v3651_v3 = vrot.slane %v8660_v32, 1  ;;  %2747 = vst.msk [vmem:[%s8572_s19 + $0x49] sm:$0x1] %vm2261_vm12, %v2731_v13  ;;  %v3652_v58 = vrot.slane %v8660_v32, 2  ;;  %v3682_v50 = vadd.f32 %v6482_v40, %v8660_v32 }
 0x29a   : > { %2748 = vst.msk [vmem:[%s8572_s19 + $0x51] sm:$0x1] %vm2261_vm12, %v2732_v33  ;;  %2749 = vst.msk [vmem:[%s8572_s19 + $0x59] sm:$0x1] %vm2261_vm12, %v2733_v46  ;;  %v3653_v23 = vrot.slane %v8660_v32, 3  ;;  %v3654_v42 = vrot.slane %v8660_v32, 4 }
 0x29b   : > { %2750 = vst.msk [vmem:[%s8572_s19 + $0x61] sm:$0x1] %vm2261_vm12, %v2734_v0  ;;  %v3655_v9 = vrot.slane %v8660_v32, 5  ;;  %2751 = vst.msk [vmem:[%s8572_s19 + $0x69] sm:$0x1] %vm2261_vm12, %v2735_v30  ;;  %v3656_v25 = vrot.slane %v8660_v32, 6  ;;  %v3683_v43 = vadd.f32 %v6483_v27, %v3651_v3  ;;  %v3684_v31 = vadd.f32 %v6484_v62, %v3652_v58 }
 0x29c   : > { %2752 = vst.msk [vmem:[%s8572_s19 + $0x71] sm:$0x1] %vm2261_vm12, %v2736_v54  ;;  %2753 = vst.msk [vmem:[%s8572_s19 + $0x79] sm:$0x1] %vm2261_vm12, %v2737_v29  ;;  %v3657_v14 = vrot.slane %v8660_v32, 7  ;;  %v3685_v63 = vadd.f32 %v6485_v45, %v3653_v23  ;;  %v3650_v5 = vrot.slane %v8639_v1, 7 }
 0x29d   : > { %v6486_v57 = vld [vmem:[%s7072_s24 + $0x63] sm:$0x1]  ;;  %v6487_v32 = vld [vmem:[%s7072_s24 + $0x6b] sm:$0x1]  ;;  %v3688_v33 = vadd.f32 %v6488_v52, %v3656_v25  ;;  %v6489_v59 = vld [vmem:[%s7072_s24 + $0x7b] sm:$0x1] }
 0x29e   : > { %v3686_v51 = vadd.f32 %v6486_v57, %v3654_v42  ;;  %v3687_v13 = vadd.f32 %v6487_v32, %v3655_v9  ;;  %v3689_v46 = vadd.f32 %v6489_v59, %v3657_v14  ;;  %3698 = vst.msk [vmem:[%s8572_s19 + $0x43] sm:$0x1] %vm2261_vm12, %v3682_v50  ;;  %3699 = vst.msk [vmem:[%s8572_s19 + $0x4b] sm:$0x1] %vm2261_vm12, %v3683_v43  ;;  %v6490_v0 = vld [vmem:[%s7072_s24 + $0x3] sm:$0x1] }
 0x29f   : > { %v3674_v60 = vadd.f32 %v6490_v0, %v8639_v1  ;;  %3700 = vst.msk [vmem:[%s8572_s19 + $0x53] sm:$0x1] %vm2261_vm12, %v3684_v31  ;;  %3701 = vst.msk [vmem:[%s8572_s19 + $0x5b] sm:$0x1] %vm2261_vm12, %v3685_v63  ;;  %v6491_v30 = vld [vmem:[%s7072_s24 + $0xb] sm:$0x1]  ;;  %v2148_v50 = vadd.f32 %v8645_v6, %v8620_v53  ;;  %v8780_v1 = vadd.f32 %v8061_v7, %v8648_v61 }
 0x2a0   : > { %3702 = vst.msk [vmem:[%s8572_s19 + $0x63] sm:$0x1] %vm2261_vm12, %v3686_v51  ;;  %3703 = vst.msk [vmem:[%s8572_s19 + $0x6b] sm:$0x1] %vm2261_vm12, %v3687_v13  ;;  %v3675_v44 = vadd.f32 %v6491_v30, %v3644_v55  ;;  %v6492_v54 = vld [vmem:[%s7072_s24 + $0x13] sm:$0x1]  ;;  %v8788_v53 = vmul.f32 %v8622_v21, %v8357_v28  ;;  %v4463_v6 = vsub.f32 %v8654_v10, %v8093_v12 }
 0x2a1   : > { %v3676_v2 = vadd.f32 %v6492_v54, %v3645_v4  ;;  %v6493_v29 = vld [vmem:[%s7072_s24 + $0x1b] sm:$0x1]  ;;  %v6494_v58 = vld [vmem:[%s7072_s24 + $0x23] sm:$0x1]  ;;  %v8747_v42 = vld [vmem:[#allocation2 + $0x5d] sm:$0x1] }
 0x2a2   : > { %v3677_v3 = vadd.f32 %v6493_v29, %v3646_v26  ;;  %v3678_v23 = vadd.f32 %v6494_v58, %v3647_v20  ;;  %v8749_v55 = vld [vmem:[#allocation2 + $0x6d] sm:$0x1]  ;;  %v8751_v9 = vpop.f32.mrb[30].mxu1  ;;  %3704 = vst.msk [vmem:[%s8572_s19 + $0x73] sm:$0x1] %vm2261_vm12, %v3688_v33  ;;  %v9753_v61 = vrot.slane %v8482_v34, 6 }
 0x2a3   : > { %3705 = vst.msk [vmem:[%s8572_s19 + $0x7b] sm:$0x1] %vm2261_vm12, %v3689_v46  ;;  %v6495_v4 = vld [vmem:[%s7072_s24 + $0x2b] sm:$0x1]  ;;  %v6496_v25 = vld [vmem:[%s7072_s24 + $0x33] sm:$0x1] }
 0x2a4   : > { %v3679_v26 = vadd.f32 %v6495_v4, %v3648_v8  ;;  %v3680_v20 = vadd.f32 %v6496_v25, %v3649_v15  ;;  %v6497_v14 = vld [vmem:[%s7072_s24 + $0x3b] sm:$0x1]  ;;  %3690 = vst.msk [vmem:[%s8572_s19 + $0x3] sm:$0x1] %vm2261_vm12, %v3674_v60  ;;  %v8768_v27 = vpop.f32.mrb[31].mxu1  ;;  %v8784_v8 = vmul.f32 %v8656_v11, %v8357_v28  ;;  %v8803_v11 = vsel %vm1813_vm5, %v9753_v61, %v8607_v36  ;;  %v8811_v34 = vpop.f32.mrb[30].mxu0 }
 0x2a5   : > { %v3681_v40 = vadd.f32 %v6497_v14, %v3650_v5  ;;  %3691 = vst.msk [vmem:[%s8572_s19 + $0xb] sm:$0x1] %vm2261_vm12, %v3675_v44  ;;  %3692 = vst.msk [vmem:[%s8572_s19 + $0x13] sm:$0x1] %vm2261_vm12, %v3676_v2  ;;  %v9752_v15 = vld [vmem:[#allocation19_spill] sm:$0xff]  ;;  %v4516_v21 = vrot.slane %v8747_v42, 5  ;;  %v4462_v42 = vsub.f32 %v8788_v53, %v8371_v18 }
 0x2a6   : > { %3693 = vst.msk [vmem:[%s8572_s19 + $0x1b] sm:$0x1] %vm2261_vm12, %v3677_v3  ;;  %3694 = vst.msk [vmem:[%s8572_s19 + $0x23] sm:$0x1] %vm2261_vm12, %v3678_v23  ;;  %v2212_v7 = vadd.f32 %v9752_v15, %v2148_v50  ;;  %v4520_v43 = vrot.slane %v8749_v55, 3  ;;  %v2215_v62 = vrot.slane %v8780_v1, 1 }
 0x2a7   : > { %3695 = vst.msk [vmem:[%s8572_s19 + $0x2b] sm:$0x1] %vm2261_vm12, %v3679_v26  ;;  %3696 = vst.msk [vmem:[%s8572_s19 + $0x33] sm:$0x1] %vm2261_vm12, %v3680_v20  ;;  %v2216_v31 = vrot.slane %v8780_v1, 2  ;;  %v2217_v45 = vrot.slane %v8780_v1, 3  ;;  %v4464_v55 = vadd.f32 %v4462_v42, %v8671_v35 }
 0x2a8   : > { %3697 = vst.msk [vmem:[%s8572_s19 + $0x3b] sm:$0x1] %vm2261_vm12, %v3681_v40  ;;  %v2218_v63 = vrot.slane %v8780_v1, 4  ;;  %v2222_v36 = vrot.slane %v2212_v7, 1  ;;  %v2223_v57 = vrot.slane %v2212_v7, 2  ;;  %v2224_v51 = vrot.slane %v2212_v7, 3 }
 0x2a9   : > { %v2225_v32 = vrot.slane %v2212_v7, 4  ;;  %v8813_v13 = vpop.f32.mrb[31].mxu0  ;;  %v2226_v52 = vrot.slane %v2212_v7, 5  ;;  %v2227_v33 = vrot.slane %v2212_v7, 6  ;;  %v2228_v59 = vrot.slane %v2212_v7, 7  ;;  %v8826_v40 = vpop.f32.mrb[32].mxu1 }
 0x2aa   : > { %v6498_v46 = vld [vmem:[%s7072_s24 + $0x40] sm:$0x1]  ;;  %v6499_v0 = vld [vmem:[%s7072_s24 + $0x48] sm:$0x1]  ;;  %v6500_v30 = vld [vmem:[%s7072_s24 + $0x50] sm:$0x1] }
 0x2ab   : > { %v2253_v5 = vadd.f32 %v6498_v46, %v2212_v7  ;;  %v2254_v60 = vadd.f32 %v6499_v0, %v2222_v36  ;;  %v2255_v44 = vadd.f32 %v6500_v30, %v2223_v57  ;;  %v6501_v54 = vld [vmem:[%s7072_s24 + $0x58] sm:$0x1]  ;;  %v6502_v29 = vld [vmem:[%s7072_s24 + $0x60] sm:$0x1]  ;;  %v6503_v58 = vld [vmem:[%s7072_s24 + $0x68] sm:$0x1] }
 0x2ac   : > { %v2256_v2 = vadd.f32 %v6501_v54, %v2224_v51  ;;  %v2257_v3 = vadd.f32 %v6502_v29, %v2225_v32  ;;  %v2258_v23 = vadd.f32 %v6503_v58, %v2226_v52  ;;  %v6504_v4 = vld [vmem:[%s7072_s24 + $0x70] sm:$0x1]  ;;  %v6505_v25 = vld [vmem:[%s7072_s24 + $0x78] sm:$0x1]  ;;  %v2219_v14 = vrot.slane %v8780_v1, 5  ;;  %v8841_v32 = vpop.f32.mrb[33].mxu1 }
 0x2ad   : > { %v2259_v26 = vadd.f32 %v6504_v4, %v2227_v33  ;;  %v2260_v20 = vadd.f32 %v6505_v25, %v2228_v59  ;;  %2270 = vst.msk [vmem:[%s8572_s19 + $0x40] sm:$0x1] %vm2261_vm12, %v2253_v5  ;;  %2271 = vst.msk [vmem:[%s8572_s19 + $0x48] sm:$0x1] %vm2261_vm12, %v2254_v60  ;;  %v2220_v50 = vrot.slane %v8780_v1, 6  ;;  %v2221_v15 = vrot.slane %v8780_v1, 7 }
 0x2ae   : > { %2272 = vst.msk [vmem:[%s8572_s19 + $0x50] sm:$0x1] %vm2261_vm12, %v2255_v44  ;;  %2273 = vst.msk [vmem:[%s8572_s19 + $0x58] sm:$0x1] %vm2261_vm12, %v2256_v2  ;;  %v6506_v7 = vld [vmem:[%s7072_s24] sm:$0x1] }
 0x2af   : > { %2274 = vst.msk [vmem:[%s8572_s19 + $0x60] sm:$0x1] %vm2261_vm12, %v2257_v3  ;;  %v2245_v61 = vadd.f32 %v6506_v7, %v8780_v1  ;;  %v6507_v36 = vld [vmem:[%s7072_s24 + $0x8] sm:$0x1]  ;;  %v4481_v51 = vld [vmem:[#allocation2 + $0x7d] sm:$0x1] }
 0x2b0   : > { %v2246_v57 = vadd.f32 %v6507_v36, %v2215_v62  ;;  %2275 = vst.msk [vmem:[%s8572_s19 + $0x68] sm:$0x1] %vm2261_vm12, %v2258_v23  ;;  %2276 = vst.msk [vmem:[%s8572_s19 + $0x70] sm:$0x1] %vm2261_vm12, %v2259_v26  ;;  %v6508_v52 = vld [vmem:[%s7072_s24 + $0x10] sm:$0x1] }
 0x2b1   : > { %2277 = vst.msk [vmem:[%s8572_s19 + $0x78] sm:$0x1] %vm2261_vm12, %v2260_v20  ;;  %v2247_v33 = vadd.f32 %v6508_v52, %v2216_v31  ;;  %v6509_v59 = vld [vmem:[%s7072_s24 + $0x18] sm:$0x1]  ;;  %v6510_v1 = vld [vmem:[%s7072_s24 + $0x20] sm:$0x1]  ;;  %v4465_v31 = vadd.f32 %v8668_v48, %v4463_v6 }
 0x2b2   : > { %v2248_v46 = vadd.f32 %v6509_v59, %v2217_v45  ;;  %v2249_v62 = vadd.f32 %v6510_v1, %v2218_v63  ;;  %v6511_v5 = vld [vmem:[%s7072_s24 + $0x28] sm:$0x1]  ;;  %v4473_v60 = vld [vmem:[#allocation2 + $0x3d] sm:$0x1]  ;;  %v6512_v30 = vld [vmem:[%s7072_s24 + $0x30] sm:$0x1]  ;;  %v4517_v45 = vsel %vm1816_vm6, %v4516_v21, %v8803_v11 }
 0x2b3   : > { %v2250_v0 = vadd.f32 %v6511_v5, %v2219_v14  ;;  %v2251_v44 = vadd.f32 %v6512_v30, %v2220_v50  ;;  %v6513_v54 = vld [vmem:[%s7072_s24 + $0x38] sm:$0x1]  ;;  %2262 = vst.msk [vmem:[%s8572_s19] sm:$0x1] %vm2261_vm12, %v2245_v61  ;;  %2263 = vst.msk [vmem:[%s8572_s19 + $0x8] sm:$0x1] %vm2261_vm12, %v2246_v57 }
 0x2b4   : > { %v2252_v2 = vadd.f32 %v6513_v54, %v2221_v15  ;;  %v3047_v63 = vld [vmem:[#allocation2 + $0x4a] sm:$0x1]  ;;  %v3048_v29 = vld [vmem:[#allocation2 + $0x52] sm:$0x1]  ;;  %2264 = vst.msk [vmem:[%s8572_s19 + $0x10] sm:$0x1] %vm2261_vm12, %v2247_v33 }
 0x2b5   : > { %2265 = vst.msk [vmem:[%s8572_s19 + $0x18] sm:$0x1] %vm2261_vm12, %v2248_v46  ;;  %2266 = vst.msk [vmem:[%s8572_s19 + $0x20] sm:$0x1] %vm2261_vm12, %v2249_v62  ;;  %v9754_v12 = vrot.slane %v8484_v22, 4  ;;  %v4524_v48 = vrot.slane %v4481_v51, 1 }
 0x2b6   : > { %2267 = vst.msk [vmem:[%s8572_s19 + $0x28] sm:$0x1] %vm2261_vm12, %v2250_v0  ;;  %v9755_v6 = vrot.slane %v8508_v17, 3  ;;  %v3049_v21 = vld [vmem:[#allocation2 + $0x5a] sm:$0x1]  ;;  %v8884_v3 = vpop.f32.mrb[34].mxu1  ;;  %v3035_v17 = vsub.f32 %v8651_v41, %v8404_v16 }
 0x2b7   : > { %v4519_v10 = vsel %vm1819_vm7, %v9754_v12, %v4517_v45  ;;  %2268 = vst.msk [vmem:[%s8572_s19 + $0x30] sm:$0x1] %vm2261_vm12, %v2251_v44  ;;  %2269 = vst.msk [vmem:[%s8572_s19 + $0x38] sm:$0x1] %vm2261_vm12, %v2252_v2  ;;  %v9756_v58 = vrot.slane %v8321_v49, 2  ;;  %v4510_v53 = vrot.slane %v4473_v60, 1 }
 0x2b8   : > { %v4507_v11 = vsel %vm1822_vm8, %v9755_v6, %v8552_v24  ;;  %v4521_v22 = vsel %vm1822_vm8, %v4520_v43, %v4519_v10  ;;  %v3050_v24 = vld [vmem:[#allocation2 + $0x62] sm:$0x1]  ;;  %v8898_v23 = vld [vmem:[#allocation2 + $0x72] sm:$0x1]  ;;  %v8900_v4 = vpop.f32.mrb[35].mxu1  ;;  %v9757_v26 = vrot.slane %v8494_v56, 2  ;;  %v8913_v41 = vadd.f32 %v8695_v38, %v3035_v17 }
 0x2b9   : > { %v4509_v18 = vsel %vm1825_vm9, %v9756_v58, %v4507_v11  ;;  %v8906_v43 = vld [vmem:[#allocation2 + $0x6a] sm:$0x1]  ;;  %v8908_v49 = vld [vmem:[#allocation2 + $0x7a] sm:$0x1]  ;;  %v3084_v20 = vrot.slane %v3047_v63, 7  ;;  %v3086_v14 = vrot.slane %v3048_v29, 6 }
 0x2ba   : > { %v4523_v25 = vsel %vm1825_vm9, %v9757_v26, %v4521_v22  ;;  %v4511_v16 = vsel %vm1828_vm10, %v4510_v53, %v4509_v18  ;;  %v3046_v15 = vld [vmem:[#allocation2 + $0x42] sm:$0x1]  ;;  %v3088_v7 = vrot.slane %v3049_v21, 5  ;;  %v8915_v56 = vld [vmem:[#allocation2 + $0xa] sm:$0x1]  ;;  %v3090_v57 = vrot.slane %v3050_v24, 4 }
 0x2bb   : > { %v4525_v50 = vsel %vm1828_vm10, %v4524_v48, %v4523_v25  ;;  %v4528_v36 = vadd.f32 %v4511_v16, %v4464_v55  ;;  %v3085_v35 = vsel %vm1810_vm4, %v3084_v20, %v3046_v15  ;;  %v8918_v51 = vld [vmem:[#allocation2 + $0x12] sm:$0x1]  ;;  %v8920_v52 = vld [vmem:[#allocation2 + $0x1a] sm:$0x1]  ;;  %v3092_v59 = vrot.slane %v8906_v43, 3  ;;  %v9758_v1 = vld [vmem:[#allocation20_spill] sm:$0xff] }
 0x2bc   : > { %v4529_v61 = vadd.f32 %v4525_v50, %v4465_v31  ;;  %v3087_v33 = vsel %vm1813_vm5, %v3086_v14, %v3085_v35  ;;  %v3094_v38 = vrot.slane %v8898_v23, 2  ;;  %v3096_v46 = vrot.slane %v8908_v49, 1  ;;  %v9759_v5 = vld [vmem:[#allocation29_spill] sm:$0xff]  ;;  %v9760_v30 = vld [vmem:[#allocation31_spill] sm:$0xff]  ;;  %v8939_v48 = vpop.f32.mrb[36].mxu1 }
 0x2bd   : > { %v8928_v0 = vadd.f32 %v9759_v5, %v4528_v36  ;;  %v3089_v60 = vsel %vm1816_vm6, %v3088_v7, %v3087_v33  ;;  %v3034_v44 = vsub.f32 %v8784_v8, %v9760_v30  ;;  %v3070_v2 = vrot.slane %v8915_v56, 7  ;;  %v6514_v21 = vld [vmem:[%s7072_s24 + $0x45] sm:$0x1]  ;;  %v8942_v58 = vpop.f32.mrb[37].mxu1  ;;  %v6515_v18 = vld [vmem:[%s7072_s24 + $0x4d] sm:$0x1] }
 0x2be   : > { %v4593_v62 = vadd.f32 %v9758_v1, %v4529_v61  ;;  %v8934_v54 = vsel %vm1819_vm7, %v3090_v57, %v3089_v60  ;;  %v3072_v31 = vrot.slane %v8918_v51, 6  ;;  %v3074_v45 = vrot.slane %v8920_v52, 5  ;;  %v6516_v17 = vld [vmem:[%s7072_s24 + $0x55] sm:$0x1]  ;;  %v6517_v26 = vld [vmem:[%s7072_s24 + $0x5d] sm:$0x1] }
 0x2bf   : > { %v6518_v55 = vld [vmem:[%s7072_s24 + $0x65] sm:$0x1]  ;;  %v6519_v14 = vld [vmem:[%s7072_s24 + $0x6d] sm:$0x1]  ;;  %v6520_v16 = vld [vmem:[%s7072_s24 + $0x75] sm:$0x1]  ;;  %v5351_v49 = vmul.f32 %v8697_v19, %v8419_v47 }
 0x2c0   : > { %v4603_v63 = vrot.slane %v4593_v62, 1  ;;  %v4604_v29 = vrot.slane %v4593_v62, 2  ;;  %v4605_v12 = vrot.slane %v4593_v62, 3  ;;  %v4606_v10 = vrot.slane %v4593_v62, 4  ;;  %v6521_v7 = vld [vmem:[%s7072_s24 + $0x7d] sm:$0x1] }
 0x2c1   : > { %v4607_v42 = vrot.slane %v4593_v62, 5  ;;  %v4608_v6 = vrot.slane %v4593_v62, 6  ;;  %v4609_v11 = vrot.slane %v4593_v62, 7  ;;  %v4634_v22 = vadd.f32 %v6514_v21, %v4593_v62  ;;  %v6522_v60 = vld [vmem:[%s7072_s24 + $0x5] sm:$0x1]  ;;  %v9762_v19 = vld [vmem:[#allocation33_spill] sm:$0xff] }
 0x2c2   : > { %v4635_v53 = vadd.f32 %v6515_v18, %v4603_v63  ;;  %v4636_v24 = vadd.f32 %v6516_v17, %v4604_v29  ;;  %v4637_v25 = vadd.f32 %v6517_v26, %v4605_v12  ;;  %v4638_v20 = vadd.f32 %v6518_v55, %v4606_v10  ;;  %v6523_v29 = vld [vmem:[%s7072_s24 + $0xd] sm:$0x1]  ;;  %v3042_v10 = vld [vmem:[#allocation2 + $0x22] sm:$0x1]  ;;  %v6525_v21 = vld [vmem:[%s7072_s24 + $0x1d] sm:$0x1] }
 0x2c3   : > { %v4639_v50 = vadd.f32 %v6519_v14, %v4607_v42  ;;  %v4640_v15 = vadd.f32 %v6520_v16, %v4608_v6  ;;  %v4641_v61 = vadd.f32 %v6521_v7, %v4609_v11  ;;  %4650 = vst.msk [vmem:[%s8572_s19 + $0x45] sm:$0x1] %vm2261_vm12, %v4634_v22  ;;  %v4596_v36 = vrot.slane %v8928_v0, 1  ;;  %v3043_v42 = vld [vmem:[#allocation2 + $0x2a] sm:$0x1] }
 0x2c4   : > { %4651 = vst.msk [vmem:[%s8572_s19 + $0x4d] sm:$0x1] %vm2261_vm12, %v4635_v53  ;;  %4652 = vst.msk [vmem:[%s8572_s19 + $0x55] sm:$0x1] %vm2261_vm12, %v4636_v24  ;;  %v4597_v35 = vrot.slane %v8928_v0, 2  ;;  %v4598_v57 = vrot.slane %v8928_v0, 3  ;;  %v4626_v63 = vadd.f32 %v6522_v60, %v8928_v0  ;;  %v8997_v16 = vadd.f32 %v3034_v44, %v8710_v37 }
 0x2c5   : > { %4653 = vst.msk [vmem:[%s8572_s19 + $0x5d] sm:$0x1] %vm2261_vm12, %v4637_v25  ;;  %4654 = vst.msk [vmem:[%s8572_s19 + $0x65] sm:$0x1] %vm2261_vm12, %v4638_v20  ;;  %v4599_v33 = vrot.slane %v8928_v0, 4  ;;  %v4600_v1 = vrot.slane %v8928_v0, 5  ;;  %v4627_v12 = vadd.f32 %v6523_v29, %v4596_v36  ;;  %v9039_v36 = vmul.f32 %v8768_v27, %v8357_v28 }
 0x2c6   : > { %4655 = vst.msk [vmem:[%s8572_s19 + $0x6d] sm:$0x1] %vm2261_vm12, %v4639_v50  ;;  %4656 = vst.msk [vmem:[%s8572_s19 + $0x75] sm:$0x1] %vm2261_vm12, %v4640_v15  ;;  %v4601_v62 = vrot.slane %v8928_v0, 6  ;;  %v4602_v5 = vrot.slane %v8928_v0, 7  ;;  %v4629_v22 = vadd.f32 %v6525_v21, %v4598_v57  ;;  %v3093_v50 = vsel %vm1822_vm8, %v3092_v59, %v8934_v54 }
 0x2c7   : > { %4657 = vst.msk [vmem:[%s8572_s19 + $0x7d] sm:$0x1] %vm2261_vm12, %v4641_v61  ;;  %v6524_v6 = vld [vmem:[%s7072_s24 + $0x15] sm:$0x1]  ;;  %v6526_v18 = vld [vmem:[%s7072_s24 + $0x25] sm:$0x1]  ;;  %v3095_v43 = vsel %vm1825_vm9, %v3094_v38, %v3093_v50  ;;  %v9030_v61 = vmul.f32 %v8751_v9, %v8419_v47  ;;  %v5415_v57 = vsub.f32 %v5351_v49, %v9762_v19 }
 0x2c8   : > { %v4628_v11 = vadd.f32 %v6524_v6, %v4597_v35  ;;  %v4630_v53 = vadd.f32 %v6526_v18, %v4599_v33  ;;  %v6527_v17 = vld [vmem:[%s7072_s24 + $0x2d] sm:$0x1]  ;;  %v3044_v0 = vld [vmem:[#allocation2 + $0x32] sm:$0x1]  ;;  %v8981_v26 = vld [vmem:[#allocation2 + $0x3a] sm:$0x1]  ;;  %v3097_v44 = vsel %vm1828_vm10, %v3096_v46, %v3095_v43 }
 0x2c9   : > { %v4631_v24 = vadd.f32 %v6527_v17, %v4600_v1  ;;  %v6528_v25 = vld [vmem:[%s7072_s24 + $0x35] sm:$0x1]  ;;  %v6529_v20 = vld [vmem:[%s7072_s24 + $0x3d] sm:$0x1]  ;;  %4642 = vst.msk [vmem:[%s8572_s19 + $0x5] sm:$0x1] %vm2261_vm12, %v4626_v63 }
 0x2ca   : > { %v4632_v55 = vadd.f32 %v6528_v25, %v4601_v62  ;;  %v4633_v14 = vadd.f32 %v6529_v20, %v4602_v5  ;;  %4643 = vst.msk [vmem:[%s8572_s19 + $0xd] sm:$0x1] %vm2261_vm12, %v4627_v12  ;;  %v3038_v15 = vld [vmem:[#allocation2 + $0x2] sm:$0x1]  ;;  %4644 = vst.msk [vmem:[%s8572_s19 + $0x15] sm:$0x1] %vm2261_vm12, %v4628_v11 }
 0x2cb   : > { %4645 = vst.msk [vmem:[%s8572_s19 + $0x1d] sm:$0x1] %vm2261_vm12, %v4629_v22  ;;  %4646 = vst.msk [vmem:[%s8572_s19 + $0x25] sm:$0x1] %vm2261_vm12, %v4630_v53  ;;  %v3071_v59 = vsel %vm1810_vm4, %v3070_v2, %v3038_v15  ;;  %v3076_v8 = vrot.slane %v3042_v10, 4  ;;  %v3078_v37 = vrot.slane %v3043_v42, 3  ;;  %v3101_v2 = vadd.f32 %v3097_v44, %v8913_v41 }
 0x2cc   : > { %4647 = vst.msk [vmem:[%s8572_s19 + $0x2d] sm:$0x1] %vm2261_vm12, %v4631_v24  ;;  %v5427_v30 = vld [vmem:[#allocation2 + $0x4f] sm:$0x1]  ;;  %4648 = vst.msk [vmem:[%s8572_s19 + $0x35] sm:$0x1] %vm2261_vm12, %v4632_v55  ;;  %v3073_v23 = vsel %vm1813_vm5, %v3072_v31, %v3071_v59  ;;  %v9043_v41 = vmul.f32 %v8712_v39, %v8357_v28 }
 0x2cd   : > { %4649 = vst.msk [vmem:[%s8572_s19 + $0x3d] sm:$0x1] %vm2261_vm12, %v4633_v14  ;;  %v3080_v38 = vrot.slane %v3044_v0, 2  ;;  %v3082_v56 = vrot.slane %v8981_v26, 1  ;;  %v5428_v54 = vld [vmem:[#allocation2 + $0x57] sm:$0x1]  ;;  %v3075_v7 = vsel %vm1816_vm6, %v3074_v45, %v3073_v23 }
 0x2ce   : > { %v5429_v51 = vld [vmem:[#allocation2 + $0x5f] sm:$0x1]  ;;  %v9034_v46 = vld [vmem:[#allocation2 + $0x67] sm:$0x1]  ;;  %v3077_v31 = vsel %vm1819_vm7, %v3076_v8, %v3075_v7  ;;  %v5464_v52 = vrot.slane %v5427_v30, 7  ;;  %v9761_v45 = vld [vmem:[#allocation30_spill] sm:$0xff] }
 0x2cf   : > { %v3165_v9 = vadd.f32 %v9761_v45, %v3101_v2  ;;  %v3079_v35 = vsel %vm1822_vm8, %v3078_v37, %v3077_v31  ;;  %v5426_v33 = vld [vmem:[#allocation2 + $0x47] sm:$0x1]  ;;  %v5466_v1 = vrot.slane %v5428_v54, 6  ;;  %v5468_v5 = vrot.slane %v5429_v51, 5  ;;  %v6530_v11 = vld [vmem:[%s7072_s24 + $0x42] sm:$0x1] }
 0x2d0   : > { %v3081_v62 = vsel %vm1825_vm9, %v3080_v38, %v3079_v35  ;;  %v5465_v27 = vsel %vm1810_vm4, %v5464_v52, %v5426_v33  ;;  %v5470_v39 = vrot.slane %v9034_v46, 4  ;;  %v5431_v22 = vld [vmem:[#allocation2 + $0x6f] sm:$0x1]  ;;  %v6531_v18 = vld [vmem:[%s7072_s24 + $0x4a] sm:$0x1]  ;;  %v5417_v54 = vadd.f32 %v8811_v34, %v5415_v57  ;;  %v9763_v34 = vld [vmem:[#allocation35_spill] sm:$0xff] }
 0x2d1   : > { %v3175_v60 = vrot.slane %v3165_v9, 1  ;;  %v3176_v63 = vrot.slane %v3165_v9, 2  ;;  %v3177_v29 = vrot.slane %v3165_v9, 3  ;;  %v3178_v12 = vrot.slane %v3165_v9, 4  ;;  %v6532_v17 = vld [vmem:[%s7072_s24 + $0x52] sm:$0x1] }
 0x2d2   : > { %v3179_v10 = vrot.slane %v3165_v9, 5  ;;  %v3180_v42 = vrot.slane %v3165_v9, 6  ;;  %v3181_v6 = vrot.slane %v3165_v9, 7  ;;  %v3206_v21 = vadd.f32 %v6530_v11, %v3165_v9  ;;  %v6533_v0 = vld [vmem:[%s7072_s24 + $0x5a] sm:$0x1]  ;;  %v9764_v52 = vld [vmem:[#allocation32_spill] sm:$0xff] }
 0x2d3   : > { %v3207_v53 = vadd.f32 %v6531_v18, %v3175_v60  ;;  %v3208_v24 = vadd.f32 %v6532_v17, %v3176_v63  ;;  %v3209_v26 = vadd.f32 %v6533_v0, %v3177_v29  ;;  %v6534_v25 = vld [vmem:[%s7072_s24 + $0x62] sm:$0x1]  ;;  %v9056_v20 = vld [vmem:[#allocation2 + $0x77] sm:$0x1]  ;;  %v9058_v14 = vld [vmem:[#allocation2 + $0x7f] sm:$0x1]  ;;  %v3083_v30 = vsel %vm1828_vm10, %v3082_v56, %v3081_v62 }
 0x2d4   : > { %v3210_v55 = vadd.f32 %v6534_v25, %v3178_v12  ;;  %v6535_v50 = vld [vmem:[%s7072_s24 + $0x6a] sm:$0x1]  ;;  %v6536_v43 = vld [vmem:[%s7072_s24 + $0x72] sm:$0x1]  ;;  %v6537_v8 = vld [vmem:[%s7072_s24 + $0x7a] sm:$0x1]  ;;  %v3100_v38 = vadd.f32 %v3083_v30, %v8997_v16  ;;  %v5467_v2 = vsel %vm1813_vm5, %v5466_v1, %v5465_v27  ;;  %v5414_v31 = vsub.f32 %v9043_v41, %v9763_v34 }
 0x2d5   : > { %v3211_v15 = vadd.f32 %v6535_v50, %v3179_v10  ;;  %v3212_v59 = vadd.f32 %v6536_v43, %v3180_v42  ;;  %v3213_v37 = vadd.f32 %v6537_v8, %v3181_v6  ;;  %3222 = vst.msk [vmem:[%s8572_s19 + $0x42] sm:$0x1] %vm2261_vm12, %v3206_v21  ;;  %v9066_v44 = vld [vmem:[#allocation2 + $0xf] sm:$0x1]  ;;  %v9068_v23 = vld [vmem:[#allocation2 + $0x17] sm:$0x1]  ;;  %v5469_v51 = vsel %vm1816_vm6, %v5468_v5, %v5467_v2 }
 0x2d6   : > { %3223 = vst.msk [vmem:[%s8572_s19 + $0x4a] sm:$0x1] %vm2261_vm12, %v3207_v53  ;;  %3224 = vst.msk [vmem:[%s8572_s19 + $0x52] sm:$0x1] %vm2261_vm12, %v3208_v24  ;;  %v5472_v7 = vrot.slane %v5431_v22, 3  ;;  %v5474_v46 = vrot.slane %v9056_v20, 2  ;;  %v3164_v45 = vadd.f32 %v9764_v52, %v3100_v38  ;;  %v5471_v9 = vsel %vm1819_vm7, %v5470_v39, %v5469_v51 }
 0x2d7   : > { %3225 = vst.msk [vmem:[%s8572_s19 + $0x5a] sm:$0x1] %vm2261_vm12, %v3209_v26  ;;  %3226 = vst.msk [vmem:[%s8572_s19 + $0x62] sm:$0x1] %vm2261_vm12, %v3210_v55  ;;  %v9081_v56 = vld [vmem:[#allocation2 + $0x1f] sm:$0x1]  ;;  %v9102_v33 = vadd.f32 %v5414_v31, %v8813_v13 }
 0x2d8   : > { %v9083_v49 = vld [vmem:[#allocation2 + $0x27] sm:$0x1]  ;;  %3227 = vst.msk [vmem:[%s8572_s19 + $0x6a] sm:$0x1] %vm2261_vm12, %v3211_v15  ;;  %3228 = vst.msk [vmem:[%s8572_s19 + $0x72] sm:$0x1] %vm2261_vm12, %v3212_v59  ;;  %v5473_v57 = vsel %vm1822_vm8, %v5472_v7, %v5471_v9 }
 0x2d9   : > { %3229 = vst.msk [vmem:[%s8572_s19 + $0x7a] sm:$0x1] %vm2261_vm12, %v3213_v37  ;;  %v5476_v16 = vrot.slane %v9058_v14, 1  ;;  %v5450_v35 = vrot.slane %v9066_v44, 7  ;;  %v5452_v19 = vrot.slane %v9068_v23, 6  ;;  %v5454_v1 = vrot.slane %v9081_v56, 5 }
 0x2da   : > { %v5456_v41 = vrot.slane %v9083_v49, 4  ;;  %v3168_v62 = vrot.slane %v3164_v45, 1  ;;  %v3169_v27 = vrot.slane %v3164_v45, 2  ;;  %v3170_v5 = vrot.slane %v3164_v45, 3  ;;  %v5423_v60 = vld [vmem:[#allocation2 + $0x2f] sm:$0x1] }
 0x2db   : > { %v3171_v39 = vrot.slane %v3164_v45, 4  ;;  %v3172_v63 = vrot.slane %v3164_v45, 5  ;;  %v3173_v29 = vrot.slane %v3164_v45, 6  ;;  %v3174_v12 = vrot.slane %v3164_v45, 7  ;;  %v6538_v10 = vld [vmem:[%s7072_s24 + $0x2] sm:$0x1] }
 0x2dc   : > { %v3198_v13 = vadd.f32 %v6538_v10, %v3164_v45  ;;  %v9107_v42 = vld [vmem:[#allocation2 + $0x37] sm:$0x1]  ;;  %v6539_v6 = vld [vmem:[%s7072_s24 + $0xa] sm:$0x1]  ;;  %v6540_v21 = vld [vmem:[%s7072_s24 + $0x12] sm:$0x1]  ;;  %v5475_v15 = vsel %vm1825_vm9, %v5474_v46, %v5473_v57 }
 0x2dd   : > { %v3199_v11 = vadd.f32 %v6539_v6, %v3168_v62  ;;  %v3200_v22 = vadd.f32 %v6540_v21, %v3169_v27  ;;  %v6541_v18 = vld [vmem:[%s7072_s24 + $0x1a] sm:$0x1]  ;;  %v6542_v17 = vld [vmem:[%s7072_s24 + $0x22] sm:$0x1]  ;;  %v9113_v0 = vld [vmem:[#allocation2 + $0x3f] sm:$0x1]  ;;  %v5477_v59 = vsel %vm1828_vm10, %v5476_v16, %v5475_v15 }
 0x2de   : > { %v3201_v53 = vadd.f32 %v6541_v18, %v3170_v5  ;;  %v3202_v24 = vadd.f32 %v6542_v17, %v3171_v39  ;;  %v6543_v26 = vld [vmem:[%s7072_s24 + $0x2a] sm:$0x1]  ;;  %v6544_v55 = vld [vmem:[%s7072_s24 + $0x32] sm:$0x1]  ;;  %v6545_v14 = vld [vmem:[%s7072_s24 + $0x3a] sm:$0x1]  ;;  %v5481_v44 = vadd.f32 %v5477_v59, %v5417_v54 }
 0x2df   : > { %v3203_v25 = vadd.f32 %v6543_v26, %v3172_v63  ;;  %v3204_v20 = vadd.f32 %v6544_v55, %v3173_v29  ;;  %v3205_v50 = vadd.f32 %v6545_v14, %v3174_v12  ;;  %3214 = vst.msk [vmem:[%s8572_s19 + $0x2] sm:$0x1] %vm2261_vm12, %v3198_v13  ;;  %v5418_v43 = vld [vmem:[#allocation2 + $0x7] sm:$0x1]  ;;  %3215 = vst.msk [vmem:[%s8572_s19 + $0xa] sm:$0x1] %vm2261_vm12, %v3199_v11 }
 0x2e0   : > { %3216 = vst.msk [vmem:[%s8572_s19 + $0x12] sm:$0x1] %vm2261_vm12, %v3200_v22  ;;  %3217 = vst.msk [vmem:[%s8572_s19 + $0x1a] sm:$0x1] %vm2261_vm12, %v3201_v53  ;;  %v5451_v8 = vsel %vm1810_vm4, %v5450_v35, %v5418_v43  ;;  %v5458_v37 = vrot.slane %v5423_v60, 3  ;;  %v5460_v30 = vrot.slane %v9107_v42, 2 }
 0x2e1   : > { %3218 = vst.msk [vmem:[%s8572_s19 + $0x22] sm:$0x1] %vm2261_vm12, %v3202_v24  ;;  %3219 = vst.msk [vmem:[%s8572_s19 + $0x2a] sm:$0x1] %vm2261_vm12, %v3203_v25  ;;  %v5453_v23 = vsel %vm1813_vm5, %v5452_v19, %v5451_v8  ;;  %v5462_v38 = vrot.slane %v9113_v0, 1  ;;  %v9765_v2 = vld [vmem:[#allocation22_spill] sm:$0xff] }
 0x2e2   : > { %3220 = vst.msk [vmem:[%s8572_s19 + $0x32] sm:$0x1] %vm2261_vm12, %v3204_v20  ;;  %3221 = vst.msk [vmem:[%s8572_s19 + $0x3a] sm:$0x1] %vm2261_vm12, %v3205_v50  ;;  %v3970_v7 = vrot.slane %v9765_v2, 7  ;;  %v5455_v56 = vsel %vm1816_vm6, %v5454_v1, %v5453_v23  ;;  %v9766_v49 = vld [vmem:[#allocation23_spill] sm:$0xff] }
 0x2e3   : > { %v3972_v51 = vrot.slane %v9766_v49, 6  ;;  %v9767_v46 = vld [vmem:[#allocation24_spill] sm:$0xff]  ;;  %v9768_v34 = vld [vmem:[#allocation25_spill] sm:$0xff]  ;;  %v9769_v52 = vld [vmem:[#allocation34_spill] sm:$0xff]  ;;  %v5457_v9 = vsel %vm1819_vm7, %v5456_v41, %v5455_v56 }
 0x2e4   : > { %v3974_v16 = vrot.slane %v9767_v46, 5  ;;  %v3976_v31 = vrot.slane %v9768_v34, 4  ;;  %v5545_v45 = vadd.f32 %v9769_v52, %v5481_v44  ;;  %v9770_v54 = vld [vmem:[#allocation21_spill] sm:$0xff]  ;;  %v9771_v19 = vld [vmem:[#allocation26_spill] sm:$0xff]  ;;  %v5459_v62 = vsel %vm1822_vm8, %v5458_v37, %v5457_v9  ;;  %v9772_v27 = vld [vmem:[#allocation27_spill] sm:$0xff] }
 0x2e5   : > { %v3971_v35 = vsel %vm1810_vm4, %v3970_v7, %v9770_v54  ;;  %v3978_v57 = vrot.slane %v9771_v19, 3  ;;  %v3980_v5 = vrot.slane %v9772_v27, 2  ;;  %v9773_v39 = vld [vmem:[#allocation28_spill] sm:$0xff]  ;;  %v3999_v10 = vld [vmem:[#allocation2 + $0x4c] sm:$0x1]  ;;  %v5461_v44 = vsel %vm1825_vm9, %v5460_v30, %v5459_v62 }
 0x2e6   : > { %v3973_v1 = vsel %vm1813_vm5, %v3972_v51, %v3971_v35  ;;  %v3982_v60 = vrot.slane %v9773_v39, 1  ;;  %v5555_v63 = vrot.slane %v5545_v45, 1  ;;  %v5556_v29 = vrot.slane %v5545_v45, 2  ;;  %v6546_v11 = vld [vmem:[%s7072_s24 + $0x47] sm:$0x1] }
 0x2e7   : > { %v5557_v41 = vrot.slane %v5545_v45, 3  ;;  %v5558_v12 = vrot.slane %v5545_v45, 4  ;;  %v5559_v13 = vrot.slane %v5545_v45, 5  ;;  %v5560_v42 = vrot.slane %v5545_v45, 6  ;;  %v4000_v22 = vld [vmem:[#allocation2 + $0x54] sm:$0x1] }
 0x2e8   : > { %v5561_v6 = vrot.slane %v5545_v45, 7  ;;  %v5586_v21 = vadd.f32 %v6546_v11, %v5545_v45  ;;  %v6547_v18 = vld [vmem:[%s7072_s24 + $0x4f] sm:$0x1]  ;;  %v6548_v17 = vld [vmem:[%s7072_s24 + $0x57] sm:$0x1]  ;;  %v5463_v7 = vsel %vm1828_vm10, %v5462_v38, %v5461_v44  ;;  %v3975_v56 = vsel %vm1816_vm6, %v3974_v16, %v3973_v1  ;;  %v9774_v1 = vld [vmem:[#allocation36_spill] sm:$0xff] }
 0x2e9   : > { %v5587_v53 = vadd.f32 %v6547_v18, %v5555_v63  ;;  %v5588_v24 = vadd.f32 %v6548_v17, %v5556_v29  ;;  %v6549_v0 = vld [vmem:[%s7072_s24 + $0x5f] sm:$0x1]  ;;  %v6550_v25 = vld [vmem:[%s7072_s24 + $0x67] sm:$0x1]  ;;  %v4001_v20 = vld [vmem:[#allocation2 + $0x5c] sm:$0x1]  ;;  %v5480_v34 = vadd.f32 %v5463_v7, %v9102_v33  ;;  %v3977_v52 = vsel %vm1819_vm7, %v3976_v31, %v3975_v56 }
 0x2ea   : > { %v5589_v26 = vadd.f32 %v6549_v0, %v5557_v41  ;;  %v5590_v55 = vadd.f32 %v6550_v25, %v5558_v12  ;;  %v9159_v14 = vld [vmem:[#allocation2 + $0x64] sm:$0x1]  ;;  %v6551_v50 = vld [vmem:[%s7072_s24 + $0x6f] sm:$0x1]  ;;  %v6552_v43 = vld [vmem:[%s7072_s24 + $0x77] sm:$0x1]  ;;  %v3979_v54 = vsel %vm1822_vm8, %v3978_v57, %v3977_v52 }
 0x2eb   : > { %v5591_v15 = vadd.f32 %v6551_v50, %v5559_v13  ;;  %v5592_v59 = vadd.f32 %v6552_v43, %v5560_v42  ;;  %v6553_v8 = vld [vmem:[%s7072_s24 + $0x7f] sm:$0x1]  ;;  %5602 = vst.msk [vmem:[%s8572_s19 + $0x47] sm:$0x1] %vm2261_vm12, %v5586_v21  ;;  %v9167_v23 = vld [vmem:[#allocation2 + $0x6c] sm:$0x1]  ;;  %v5544_v27 = vadd.f32 %v9774_v1, %v5480_v34  ;;  %v3981_v33 = vsel %vm1825_vm9, %v3980_v5, %v3979_v54 }
 0x2ec   : > { %v5593_v37 = vadd.f32 %v6553_v8, %v5561_v6  ;;  %v9169_v2 = vld [vmem:[#allocation2 + $0x74] sm:$0x1]  ;;  %5603 = vst.msk [vmem:[%s8572_s19 + $0x4f] sm:$0x1] %vm2261_vm12, %v5587_v53  ;;  %5604 = vst.msk [vmem:[%s8572_s19 + $0x57] sm:$0x1] %vm2261_vm12, %v5588_v24  ;;  %v3983_v63 = vsel %vm1828_vm10, %v3982_v60, %v3981_v33 }
 0x2ed   : > { %5605 = vst.msk [vmem:[%s8572_s19 + $0x5f] sm:$0x1] %vm2261_vm12, %v5589_v26  ;;  %5606 = vst.msk [vmem:[%s8572_s19 + $0x67] sm:$0x1] %vm2261_vm12, %v5590_v55  ;;  %v9181_v49 = vld [vmem:[#allocation2 + $0x7c] sm:$0x1] }
 0x2ee   : > { %v4036_v30 = vrot.slane %v3999_v10, 7  ;;  %v4038_v51 = vrot.slane %v4000_v22, 6  ;;  %v4063_v46 = vld [vmem:[%s7080_s26 + $0x4c] sm:$0x1]  ;;  %5607 = vst.msk [vmem:[%s8572_s19 + $0x6f] sm:$0x1] %vm2261_vm12, %v5591_v15 }
 0x2ef   : > { %5608 = vst.msk [vmem:[%s8572_s19 + $0x77] sm:$0x1] %vm2261_vm12, %v5592_v59  ;;  %5609 = vst.msk [vmem:[%s8572_s19 + $0x7f] sm:$0x1] %vm2261_vm12, %v5593_v37  ;;  %v3998_v45 = vld [vmem:[#allocation2 + $0x44] sm:$0x1] }
 0x2f0   : > { %v4040_v38 = vrot.slane %v4001_v20, 5  ;;  %v4042_v16 = vrot.slane %v9159_v14, 4  ;;  %v4064_v9 = vld [vmem:[%s7080_s26 + $0x54] sm:$0x1]  ;;  %v4037_v35 = vsel %vm1810_vm4, %v4036_v30, %v3998_v45  ;;  %v4044_v19 = vrot.slane %v9167_v23, 3 }
 0x2f1   : > { %v4046_v62 = vrot.slane %v9169_v2, 2  ;;  %v4039_v31 = vsel %vm1813_vm5, %v4038_v51, %v4037_v35  ;;  %v4048_v39 = vrot.slane %v9181_v49, 1  ;;  %v4062_v29 = vld [vmem:[%s7080_s26 + $0x44] sm:$0x1]  ;;  %v4100_v41 = vrot.slane %v4063_v46, 7 }
 0x2f2   : > { %v4041_v57 = vsel %vm1816_vm6, %v4040_v38, %v4039_v31  ;;  %v4102_v12 = vrot.slane %v4064_v9, 6  ;;  %v5548_v10 = vrot.slane %v5544_v27, 1  ;;  %v5549_v13 = vrot.slane %v5544_v27, 2  ;;  %v4065_v6 = vld [vmem:[%s7080_s26 + $0x5c] sm:$0x1] }
 0x2f3   : > { %v5550_v5 = vrot.slane %v5544_v27, 3  ;;  %v5551_v42 = vrot.slane %v5544_v27, 4  ;;  %v5552_v11 = vrot.slane %v5544_v27, 5  ;;  %v5553_v21 = vrot.slane %v5544_v27, 6  ;;  %v6554_v22 = vld [vmem:[%s7072_s24 + $0x7] sm:$0x1] }
 0x2f4   : > { %v5554_v60 = vrot.slane %v5544_v27, 7  ;;  %v5578_v18 = vadd.f32 %v6554_v22, %v5544_v27  ;;  %v4066_v53 = vld [vmem:[%s7080_s26 + $0x64] sm:$0x1]  ;;  %v6555_v17 = vld [vmem:[%s7072_s24 + $0xf] sm:$0x1]  ;;  %v3987_v23 = vsub.f32 %v9030_v61, %v3983_v63  ;;  %v4043_v56 = vsel %vm1819_vm7, %v4042_v16, %v4041_v57 }
 0x2f5   : > { %v5579_v24 = vadd.f32 %v6555_v17, %v5548_v10  ;;  %v6556_v0 = vld [vmem:[%s7072_s24 + $0x17] sm:$0x1]  ;;  %v6557_v25 = vld [vmem:[%s7072_s24 + $0x1f] sm:$0x1]  ;;  %v6558_v20 = vld [vmem:[%s7072_s24 + $0x27] sm:$0x1]  ;;  %v4101_v49 = vsel %vm1810_vm4, %v4100_v41, %v4062_v29  ;;  %v4045_v46 = vsel %vm1822_vm8, %v4044_v19, %v4043_v56 }
 0x2f6   : > { %v5580_v26 = vadd.f32 %v6556_v0, %v5549_v13  ;;  %v5581_v55 = vadd.f32 %v6557_v25, %v5550_v5  ;;  %v5582_v14 = vadd.f32 %v6558_v20, %v5551_v42  ;;  %v4067_v50 = vld [vmem:[%s7080_s26 + $0x6c] sm:$0x1]  ;;  %v6559_v15 = vld [vmem:[%s7072_s24 + $0x2f] sm:$0x1]  ;;  %v6560_v59 = vld [vmem:[%s7072_s24 + $0x37] sm:$0x1]  ;;  %v3989_v61 = vadd.f32 %v8826_v40, %v3987_v23 }
 0x2f7   : > { %v5583_v43 = vadd.f32 %v6559_v15, %v5552_v11  ;;  %v5584_v8 = vadd.f32 %v6560_v59, %v5553_v21  ;;  %v6561_v37 = vld [vmem:[%s7072_s24 + $0x3f] sm:$0x1]  ;;  %5594 = vst.msk [vmem:[%s8572_s19 + $0x7] sm:$0x1] %vm2261_vm12, %v5578_v18  ;;  %v4068_v2 = vld [vmem:[%s7080_s26 + $0x74] sm:$0x1]  ;;  %v4103_v34 = vsel %vm1813_vm5, %v4102_v12, %v4101_v49  ;;  %v4047_v45 = vsel %vm1825_vm9, %v4046_v62, %v4045_v46 }
 0x2f8   : > { %v5585_v44 = vadd.f32 %v6561_v37, %v5554_v60  ;;  %v4069_v7 = vld [vmem:[%s7080_s26 + $0x7c] sm:$0x1]  ;;  %5595 = vst.msk [vmem:[%s8572_s19 + $0xf] sm:$0x1] %vm2261_vm12, %v5579_v24  ;;  %5596 = vst.msk [vmem:[%s8572_s19 + $0x17] sm:$0x1] %vm2261_vm12, %v5580_v26  ;;  %v4049_v54 = vsel %vm1828_vm10, %v4048_v39, %v4047_v45 }
 0x2f9   : > { %5597 = vst.msk [vmem:[%s8572_s19 + $0x1f] sm:$0x1] %vm2261_vm12, %v5581_v55  ;;  %5598 = vst.msk [vmem:[%s8572_s19 + $0x27] sm:$0x1] %vm2261_vm12, %v5582_v14  ;;  %v4104_v30 = vrot.slane %v4065_v6, 5  ;;  %v4106_v51 = vrot.slane %v4066_v53, 4  ;;  %v4053_v62 = vadd.f32 %v4049_v54, %v3989_v61 }
 0x2fa   : > { %5599 = vst.msk [vmem:[%s8572_s19 + $0x2f] sm:$0x1] %vm2261_vm12, %v5583_v43  ;;  %5600 = vst.msk [vmem:[%s8572_s19 + $0x37] sm:$0x1] %vm2261_vm12, %v5584_v8  ;;  %v4108_v52 = vrot.slane %v4067_v50, 3  ;;  %v4110_v16 = vrot.slane %v4068_v2, 2 }
 0x2fb   : > { %5601 = vst.msk [vmem:[%s8572_s19 + $0x3f] sm:$0x1] %vm2261_vm12, %v5585_v44  ;;  %v4105_v38 = vsel %vm1816_vm6, %v4104_v30, %v4103_v34  ;;  %v4112_v9 = vrot.slane %v4069_v7, 1  ;;  %v9245_v40 = vld [vmem:[%s7072_s24 + $0x4] sm:$0x1] }
 0x2fc   : > { %v4107_v35 = vsel %vm1819_vm7, %v4106_v51, %v4105_v38  ;;  %v3924_v19 = vmul.f32 3.0, %v9245_v40  ;;  %v9249_v1 = vld [vmem:[%s7072_s24 + $0xc] sm:$0x1]  ;;  %v9254_v31 = vld [vmem:[%s7072_s24 + $0x14] sm:$0x1] }
 0x2fd   : > { %v3925_v27 = vmul.f32 3.0, %v9249_v1  ;;  %v4109_v33 = vsel %vm1822_vm8, %v4108_v52, %v4107_v35  ;;  %v3926_v63 = vmul.f32 3.0, %v9254_v31  ;;  %v9258_v39 = vld [vmem:[%s7072_s24 + $0x1c] sm:$0x1]  ;;  %v9263_v41 = vld [vmem:[%s7072_s24 + $0x24] sm:$0x1] }
 0x2fe   : > { %v3927_v57 = vmul.f32 3.0, %v9258_v39  ;;  %v4111_v29 = vsel %vm1825_vm9, %v4110_v16, %v4109_v33  ;;  %v9266_v12 = vmul.f32 3.0, %v9263_v41  ;;  %v9269_v10 = vld [vmem:[%s7072_s24 + $0x2c] sm:$0x1]  ;;  %v9275_v5 = vld [vmem:[%s7072_s24 + $0x34] sm:$0x1] }
 0x2ff   : > { %v9272_v13 = vmul.f32 3.0, %v9269_v10  ;;  %v9278_v42 = vmul.f32 3.0, %v9275_v5  ;;  %v3991_v6 = vld [vmem:[#allocation2 + $0xc] sm:$0x1]  ;;  %v4113_v11 = vsel %vm1828_vm10, %v4112_v9, %v4111_v29  ;;  %v9282_v21 = vld [vmem:[%s7072_s24 + $0x3c] sm:$0x1] }
 0x300   : > { %v9285_v60 = vmul.f32 3.0, %v9282_v21  ;;  %v3956_v22 = vrot.slane %v3925_v27, 7  ;;  %v3958_v18 = vrot.slane %v3926_v63, 6  ;;  %v4117_v53 = vadd.f32 %v4113_v11, %v4053_v62  ;;  %v3992_v59 = vld [vmem:[#allocation2 + $0x14] sm:$0x1] }
 0x301   : > { %v3960_v17 = vrot.slane %v3927_v57, 5  ;;  %v3962_v24 = vrot.slane %v9266_v12, 4  ;;  %v3964_v0 = vrot.slane %v9272_v13, 3  ;;  %v3966_v25 = vrot.slane %v9278_v42, 2  ;;  %v6570_v23 = vld [vmem:[%s7072_s24 + $0x44] sm:$0x1] }
 0x302   : > { %v3957_v26 = vsel %vm1810_vm4, %v3956_v22, %v3924_v19  ;;  %v3968_v55 = vrot.slane %v9285_v60, 1  ;;  %v4022_v20 = vrot.slane %v3991_v6, 7  ;;  %v4127_v14 = vrot.slane %v4117_v53, 1  ;;  %v3990_v7 = vld [vmem:[#allocation2 + $0x4] sm:$0x1] }
 0x303   : > { %v4128_v50 = vrot.slane %v4117_v53, 2  ;;  %v4129_v15 = vrot.slane %v4117_v53, 3  ;;  %v4130_v43 = vrot.slane %v4117_v53, 4  ;;  %v4131_v8 = vrot.slane %v4117_v53, 5  ;;  %v3993_v56 = vld [vmem:[#allocation2 + $0x1c] sm:$0x1] }
 0x304   : > { %v4132_v37 = vrot.slane %v4117_v53, 6  ;;  %v4133_v44 = vrot.slane %v4117_v53, 7  ;;  %v4158_v2 = vadd.f32 %v6570_v23, %v4117_v53  ;;  %v6571_v49 = vld [vmem:[%s7072_s24 + $0x4c] sm:$0x1]  ;;  %v6572_v51 = vld [vmem:[%s7072_s24 + $0x54] sm:$0x1]  ;;  %v3959_v63 = vsel %vm1813_vm5, %v3958_v18, %v3957_v26 }
 0x305   : > { %v4159_v30 = vadd.f32 %v6571_v49, %v4127_v14  ;;  %v4160_v61 = vadd.f32 %v6572_v51, %v4128_v50  ;;  %v6573_v46 = vld [vmem:[%s7072_s24 + $0x5c] sm:$0x1]  ;;  %v6574_v52 = vld [vmem:[%s7072_s24 + $0x64] sm:$0x1]  ;;  %v3995_v16 = vld [vmem:[#allocation2 + $0x2c] sm:$0x1]  ;;  %v3961_v13 = vsel %vm1816_vm6, %v3960_v17, %v3959_v63  ;;  %v4023_v42 = vsel %vm1810_vm4, %v4022_v20, %v3990_v7 }
 0x306   : > { %v4161_v34 = vadd.f32 %v6573_v46, %v4129_v15  ;;  %v4162_v45 = vadd.f32 %v6574_v52, %v4130_v43  ;;  %v3994_v38 = vld [vmem:[#allocation2 + $0x24] sm:$0x1]  ;;  %v3996_v9 = vld [vmem:[#allocation2 + $0x34] sm:$0x1]  ;;  %v6575_v54 = vld [vmem:[%s7072_s24 + $0x6c] sm:$0x1]  ;;  %v3963_v53 = vsel %vm1819_vm7, %v3962_v24, %v3961_v13 }
 0x307   : > { %v4163_v35 = vadd.f32 %v6575_v54, %v4131_v8  ;;  %v6576_v19 = vld [vmem:[%s7072_s24 + $0x74] sm:$0x1]  ;;  %v6577_v62 = vld [vmem:[%s7072_s24 + $0x7c] sm:$0x1]  ;;  %4174 = vst.msk [vmem:[%s8572_s19 + $0x44] sm:$0x1] %vm2261_vm12, %v4158_v2  ;;  %v3965_v20 = vsel %vm1822_vm8, %v3964_v0, %v3963_v53  ;;  %v9352_v54 = vmul.f32 %v8900_v4, %v8357_v28 }
 0x308   : > { %v4164_v27 = vadd.f32 %v6576_v19, %v4132_v37  ;;  %v4165_v33 = vadd.f32 %v6577_v62, %v4133_v44  ;;  %v3997_v57 = vld [vmem:[#allocation2 + $0x3c] sm:$0x1]  ;;  %v4054_v29 = vld [vmem:[%s7080_s26 + $0x4] sm:$0x1]  ;;  %v4055_v12 = vld [vmem:[%s7080_s26 + $0xc] sm:$0x1]  ;;  %v3967_v37 = vsel %vm1825_vm9, %v3966_v25, %v3965_v20 }
 0x309   : > { %4175 = vst.msk [vmem:[%s8572_s19 + $0x4c] sm:$0x1] %vm2261_vm12, %v4159_v30  ;;  %4176 = vst.msk [vmem:[%s8572_s19 + $0x54] sm:$0x1] %vm2261_vm12, %v4160_v61  ;;  %v4024_v6 = vrot.slane %v3992_v59, 6  ;;  %v4026_v11 = vrot.slane %v3993_v56, 5  ;;  %v3969_v24 = vsel %vm1828_vm10, %v3968_v55, %v3967_v37 }
 0x30a   : > { %4177 = vst.msk [vmem:[%s8572_s19 + $0x5c] sm:$0x1] %vm2261_vm12, %v4161_v34  ;;  %4178 = vst.msk [vmem:[%s8572_s19 + $0x64] sm:$0x1] %vm2261_vm12, %v4162_v45  ;;  %v4056_v22 = vld [vmem:[%s7080_s26 + $0x14] sm:$0x1]  ;;  %v3986_v51 = vsub.f32 %v9039_v36, %v3969_v24 }
 0x30b   : > { %v4057_v18 = vld [vmem:[%s7080_s26 + $0x1c] sm:$0x1]  ;;  %4179 = vst.msk [vmem:[%s8572_s19 + $0x6c] sm:$0x1] %vm2261_vm12, %v4163_v35  ;;  %4180 = vst.msk [vmem:[%s8572_s19 + $0x74] sm:$0x1] %vm2261_vm12, %v4164_v27  ;;  %v4025_v15 = vsel %vm1813_vm5, %v4024_v6, %v4023_v42 }
 0x30c   : > { %4181 = vst.msk [vmem:[%s8572_s19 + $0x7c] sm:$0x1] %vm2261_vm12, %v4165_v33  ;;  %v4028_v26 = vrot.slane %v3994_v38, 4  ;;  %v4030_v14 = vrot.slane %v3995_v16, 3  ;;  %v4032_v17 = vrot.slane %v3996_v9, 2  ;;  %v4034_v43 = vrot.slane %v3997_v57, 1 }
 0x30d   : > { %v4058_v50 = vld [vmem:[%s7080_s26 + $0x24] sm:$0x1]  ;;  %v4059_v59 = vld [vmem:[%s7080_s26 + $0x2c] sm:$0x1]  ;;  %v4086_v8 = vrot.slane %v4055_v12, 7  ;;  %v4027_v44 = vsel %vm1816_vm6, %v4026_v11, %v4025_v15  ;;  %v4088_v7 = vrot.slane %v4056_v22, 6  ;;  %v3988_v45 = vadd.f32 %v3986_v51, %v8841_v32 }
 0x30e   : > { %v4060_v23 = vld [vmem:[%s7080_s26 + $0x34] sm:$0x1]  ;;  %v4061_v2 = vld [vmem:[%s7080_s26 + $0x3c] sm:$0x1]  ;;  %v4090_v56 = vrot.slane %v4057_v18, 5  ;;  %v4029_v49 = vsel %vm1819_vm7, %v4028_v26, %v4027_v44  ;;  %v4092_v30 = vrot.slane %v4058_v50, 4  ;;  %v9347_v16 = vmul.f32 %v8884_v3, %v8419_v47 }
 0x30f   : > { %v4087_v0 = vsel %vm1810_vm4, %v4086_v8, %v4054_v29  ;;  %v4031_v25 = vsel %vm1822_vm8, %v4030_v14, %v4029_v49  ;;  %v4094_v46 = vrot.slane %v4059_v59, 3  ;;  %v4096_v55 = vrot.slane %v4060_v23, 2  ;;  %v9355_v35 = vld [vmem:[%s7072_s24 + $0x46] sm:$0x1]  ;;  %v9359_v19 = vld [vmem:[%s7072_s24 + $0x4e] sm:$0x1] }
 0x310   : > { %v4089_v61 = vsel %vm1813_vm5, %v4088_v7, %v4087_v0  ;;  %v4033_v34 = vsel %vm1825_vm9, %v4032_v17, %v4031_v25  ;;  %v4098_v52 = vrot.slane %v4061_v2, 1  ;;  %v4884_v32 = vmul.f32 3.0, %v9355_v35  ;;  %v9364_v3 = vld [vmem:[%s7072_s24 + $0x56] sm:$0x1]  ;;  %v9368_v63 = vld [vmem:[%s7072_s24 + $0x5e] sm:$0x1] }
 0x311   : > { %v4091_v60 = vsel %vm1816_vm6, %v4090_v56, %v4089_v61  ;;  %v4035_v38 = vsel %vm1828_vm10, %v4034_v43, %v4033_v34  ;;  %v4885_v27 = vmul.f32 3.0, %v9359_v19  ;;  %v4886_v33 = vmul.f32 3.0, %v9364_v3  ;;  %v9373_v57 = vld [vmem:[%s7072_s24 + $0x66] sm:$0x1]  ;;  %v9377_v12 = vld [vmem:[%s7072_s24 + $0x6e] sm:$0x1] }
 0x312   : > { %v4093_v36 = vsel %vm1819_vm7, %v4092_v30, %v4091_v60  ;;  %v4052_v62 = vadd.f32 %v4035_v38, %v3988_v45  ;;  %v4887_v28 = vmul.f32 3.0, %v9368_v63  ;;  %v4888_v29 = vmul.f32 3.0, %v9373_v57  ;;  %v9383_v42 = vld [vmem:[%s7072_s24 + $0x76] sm:$0x1]  ;;  %v9389_v22 = vld [vmem:[%s7072_s24 + $0x7e] sm:$0x1] }
 0x313   : > { %v4095_v9 = vsel %vm1822_vm8, %v4094_v46, %v4093_v36  ;;  %v9380_v13 = vmul.f32 3.0, %v9377_v12  ;;  %v9386_v6 = vmul.f32 3.0, %v9383_v42  ;;  %v9392_v18 = vmul.f32 3.0, %v9389_v22  ;;  %v4951_v15 = vld [vmem:[#allocation2 + $0x4e] sm:$0x1] }
 0x314   : > { %v4097_v47 = vsel %vm1825_vm9, %v4096_v55, %v4095_v9  ;;  %v4922_v53 = vrot.slane %v4885_v27, 7  ;;  %v4924_v26 = vrot.slane %v4886_v33, 6  ;;  %v4926_v14 = vrot.slane %v4887_v28, 5  ;;  %v4952_v44 = vld [vmem:[#allocation2 + $0x56] sm:$0x1] }
 0x315   : > { %v4099_v4 = vsel %vm1828_vm10, %v4098_v52, %v4097_v47  ;;  %v4928_v17 = vrot.slane %v4888_v29, 4  ;;  %v4930_v50 = vrot.slane %v9380_v13, 3  ;;  %v4932_v20 = vrot.slane %v9386_v6, 2  ;;  %v4953_v24 = vld [vmem:[#allocation2 + $0x5e] sm:$0x1] }
 0x316   : > { %v4116_v11 = vadd.f32 %v4099_v4, %v4052_v62  ;;  %v4954_v25 = vld [vmem:[#allocation2 + $0x66] sm:$0x1]  ;;  %v4955_v61 = vld [vmem:[#allocation2 + $0x6e] sm:$0x1]  ;;  %v4956_v46 = vld [vmem:[#allocation2 + $0x76] sm:$0x1] }
 0x317   : > { %v5015_v60 = vld [vmem:[%s7080_s26 + $0x4e] sm:$0x1]  ;;  %v5016_v55 = vld [vmem:[%s7080_s26 + $0x56] sm:$0x1]  ;;  %v4990_v52 = vrot.slane %v4952_v44, 6  ;;  %v4992_v36 = vrot.slane %v4953_v24, 5 }
 0x318   : > { %v4120_v43 = vrot.slane %v4116_v11, 1  ;;  %v4121_v59 = vrot.slane %v4116_v11, 2  ;;  %v4122_v8 = vrot.slane %v4116_v11, 3  ;;  %v4123_v37 = vrot.slane %v4116_v11, 4  ;;  %v5017_v45 = vld [vmem:[%s7080_s26 + $0x5e] sm:$0x1] }
 0x319   : > { %v4124_v23 = vrot.slane %v4116_v11, 5  ;;  %v4125_v2 = vrot.slane %v4116_v11, 6  ;;  %v4126_v7 = vrot.slane %v4116_v11, 7  ;;  %v4150_v56 = vadd.f32 %v9245_v40, %v4116_v11  ;;  %v5018_v27 = vld [vmem:[%s7080_s26 + $0x66] sm:$0x1] }
 0x31a   : > { %v4151_v49 = vadd.f32 %v9249_v1, %v4120_v43  ;;  %v4152_v0 = vadd.f32 %v9254_v31, %v4121_v59  ;;  %v4153_v30 = vadd.f32 %v9258_v39, %v4122_v8  ;;  %v4154_v51 = vadd.f32 %v9263_v41, %v4123_v37  ;;  %v4950_v39 = vld [vmem:[#allocation2 + $0x46] sm:$0x1]  ;;  %v4957_v41 = vld [vmem:[#allocation2 + $0x7e] sm:$0x1]  ;;  %v5019_v29 = vld [vmem:[%s7080_s26 + $0x6e] sm:$0x1] }
 0x31b   : > { %v4155_v40 = vadd.f32 %v9269_v10, %v4124_v23  ;;  %v4156_v34 = vadd.f32 %v9275_v5, %v4125_v2  ;;  %v4157_v1 = vadd.f32 %v9282_v21, %v4126_v7  ;;  %4166 = vst.msk [vmem:[%s8572_s19 + $0x4] sm:$0x1] %vm2261_vm12, %v4150_v56  ;;  %v4923_v31 = vsel %vm1810_vm4, %v4922_v53, %v4884_v32  ;;  %v5014_v4 = vld [vmem:[%s7080_s26 + $0x46] sm:$0x1]  ;;  %v5020_v11 = vld [vmem:[%s7080_s26 + $0x76] sm:$0x1] }
 0x31c   : > { %4167 = vst.msk [vmem:[%s8572_s19 + $0xc] sm:$0x1] %vm2261_vm12, %v4151_v49  ;;  %4168 = vst.msk [vmem:[%s8572_s19 + $0x14] sm:$0x1] %vm2261_vm12, %v4152_v0  ;;  %v4925_v10 = vsel %vm1813_vm5, %v4924_v26, %v4923_v31  ;;  %v4934_v5 = vrot.slane %v9392_v18, 1  ;;  %v4988_v21 = vrot.slane %v4951_v15, 7 }
 0x31d   : > { %4169 = vst.msk [vmem:[%s8572_s19 + $0x1c] sm:$0x1] %vm2261_vm12, %v4153_v30  ;;  %4170 = vst.msk [vmem:[%s8572_s19 + $0x24] sm:$0x1] %vm2261_vm12, %v4154_v51  ;;  %v4927_v38 = vsel %vm1816_vm6, %v4926_v14, %v4925_v10  ;;  %v4994_v9 = vrot.slane %v4954_v25, 4  ;;  %v4996_v32 = vrot.slane %v4955_v61, 3 }
 0x31e   : > { %4171 = vst.msk [vmem:[%s8572_s19 + $0x2c] sm:$0x1] %vm2261_vm12, %v4155_v40  ;;  %4172 = vst.msk [vmem:[%s8572_s19 + $0x34] sm:$0x1] %vm2261_vm12, %v4156_v34  ;;  %v4929_v62 = vsel %vm1819_vm7, %v4928_v17, %v4927_v38  ;;  %v4989_v47 = vsel %vm1810_vm4, %v4988_v21, %v4950_v39  ;;  %v4998_v33 = vrot.slane %v4956_v46, 2  ;;  %v5000_v28 = vrot.slane %v4957_v41, 1 }
 0x31f   : > { %4173 = vst.msk [vmem:[%s8572_s19 + $0x3c] sm:$0x1] %vm2261_vm12, %v4157_v1  ;;  %v4931_v13 = vsel %vm1822_vm8, %v4930_v50, %v4929_v62  ;;  %v4991_v6 = vsel %vm1813_vm5, %v4990_v52, %v4989_v47  ;;  %v5052_v18 = vrot.slane %v5015_v60, 7  ;;  %v5054_v53 = vrot.slane %v5016_v55, 6  ;;  %v5021_v15 = vld [vmem:[%s7080_s26 + $0x7e] sm:$0x1] }
 0x320   : > { %v4933_v26 = vsel %vm1825_vm9, %v4932_v20, %v4931_v13  ;;  %v4993_v14 = vsel %vm1816_vm6, %v4992_v36, %v4991_v6  ;;  %v5056_v17 = vrot.slane %v5017_v45, 5  ;;  %v5058_v43 = vrot.slane %v5018_v27, 4  ;;  %v9447_v49 = vld [vmem:[%s7072_s24 + $0x6] sm:$0x1]  ;;  %v9454_v25 = vld [vmem:[%s7072_s24 + $0xe] sm:$0x1] }
 0x321   : > { %v4935_v59 = vsel %vm1828_vm10, %v4934_v5, %v4933_v26  ;;  %v4995_v8 = vsel %vm1819_vm7, %v4994_v9, %v4993_v14  ;;  %v5053_v50 = vsel %vm1810_vm4, %v5052_v18, %v5014_v4  ;;  %v5060_v37 = vrot.slane %v5019_v29, 3  ;;  %v9459_v40 = vld [vmem:[%s7072_s24 + $0x16] sm:$0x1]  ;;  %v9463_v1 = vld [vmem:[%s7072_s24 + $0x1e] sm:$0x1] }
 0x322   : > { %v4939_v44 = vsub.f32 %v9347_v16, %v4935_v59  ;;  %v4997_v23 = vsel %vm1822_vm8, %v4996_v32, %v4995_v8  ;;  %v5055_v20 = vsel %vm1813_vm5, %v5054_v53, %v5053_v50  ;;  %v5062_v2 = vrot.slane %v5020_v11, 2  ;;  %v9467_v31 = vld [vmem:[%s7072_s24 + $0x26] sm:$0x1]  ;;  %v9472_v55 = vld [vmem:[%s7072_s24 + $0x2e] sm:$0x1] }
 0x323   : > { %v4999_v7 = vsel %vm1825_vm9, %v4998_v33, %v4997_v23  ;;  %v5057_v56 = vsel %vm1816_vm6, %v5056_v17, %v5055_v20  ;;  %v5064_v24 = vrot.slane %v5021_v15, 1  ;;  %v4876_v0 = vmul.f32 3.0, %v9447_v49  ;;  %v9478_v5 = vld [vmem:[%s7072_s24 + $0x36] sm:$0x1]  ;;  %v4943_v52 = vld [vmem:[#allocation2 + $0xe] sm:$0x1] }
 0x324   : > { %v4941_v30 = vadd.f32 %v8939_v48, %v4939_v44  ;;  %v5001_v16 = vsel %vm1828_vm10, %v5000_v28, %v4999_v7  ;;  %v5059_v51 = vsel %vm1819_vm7, %v5058_v43, %v5057_v56  ;;  %v4877_v61 = vmul.f32 3.0, %v9454_v25  ;;  %v9485_v38 = vld [vmem:[%s7072_s24 + $0x3e] sm:$0x1]  ;;  %v4944_v26 = vld [vmem:[#allocation2 + $0x16] sm:$0x1]  ;;  %s5624_s24 = sshll.u32 %s8572_s19, 4  ;;  %s9560_s24 = int_to_ptr.vmem [resolvable:$true] %s5624_s24 }
 0x325   : > { %v5061_v46 = vsel %vm1822_vm8, %v5060_v37, %v5059_v51  ;;  %v4878_v34 = vmul.f32 3.0, %v9459_v40  ;;  %v4879_v48 = vmul.f32 3.0, %v9463_v1  ;;  %v4880_v39 = vmul.f32 3.0, %v9467_v31  ;;  %v4942_v59 = vld [vmem:[#allocation2 + $0x6] sm:$0x1]  ;;  %s6710_s23 = scalar_lea.vmem %s9560_s24, 2048  ;;  %p6717_p4 = scmp.lt.s32.totalorder %s9560_s24, %s6715_s6 }
 0x326   : > { %v5005_v41 = vadd.f32 %v5001_v16, %v4941_v30  ;;  %v5063_v60 = vsel %vm1825_vm9, %v5062_v2, %v5061_v46  ;;  %v9475_v10 = vmul.f32 3.0, %v9472_v55  ;;  %v9481_v21 = vmul.f32 3.0, %v9478_v5  ;;  %v4945_v8 = vld [vmem:[#allocation2 + $0x1e] sm:$0x1]  ;;  %v4946_v20 = vld [vmem:[#allocation2 + $0x26] sm:$0x1]  ;;  %p6711_p1 = scmp.ne.s32.totalorder %s9560_s24, %s6710_s23  ;;  %p6718_p5 = scmp.lt.s32.totalorder %s6716_s17, %s6710_s23 }
 0x327   : > { %v5065_v45 = vsel %vm1828_vm10, %v5064_v24, %v5063_v60  ;;  %v9488_v36 = vmul.f32 3.0, %v9485_v38  ;;  %v4908_v9 = vrot.slane %v4877_v61, 7  ;;  %v4910_v32 = vrot.slane %v4878_v34, 6  ;;  %v4947_v2 = vld [vmem:[#allocation2 + $0x2e] sm:$0x1] }
 0x328   : > { %v5069_v27 = vadd.f32 %v5065_v45, %v5005_v41  ;;  %v4912_v62 = vrot.slane %v4879_v48, 5  ;;  %v4914_v47 = vrot.slane %v4880_v39, 4  ;;  %v4916_v33 = vrot.slane %v9475_v10, 3  ;;  %v4948_v7 = vld [vmem:[#allocation2 + $0x36] sm:$0x1]  ;;  %p6712_p6 = pnand %p6711_p1, %p9775_p13  ;;  %p6719_p3 = por %p6718_p5, %p6717_p4 }
 0x329   : > { %v4909_v28 = vsel %vm1810_vm4, %v4908_v9, %v4876_v0  ;;  %v4918_v4 = vrot.slane %v9481_v21, 2  ;;  %v4920_v29 = vrot.slane %v9488_v36, 1  ;;  %v4974_v13 = vrot.slane %v4943_v52, 7  ;;  %v5007_v24 = vld [vmem:[%s7080_s26 + $0xe] sm:$0x1] }
 0x32a   : > { %v5079_v6 = vrot.slane %v5069_v27, 1  ;;  %v5080_v11 = vrot.slane %v5069_v27, 2  ;;  %v5081_v18 = vrot.slane %v5069_v27, 3  ;;  %v5082_v53 = vrot.slane %v5069_v27, 4  ;;  %v5008_v30 = vld [vmem:[%s7080_s26 + $0x16] sm:$0x1]  ;;  %p6713_p10 = pneg %p6712_p6 }
 0x32b   : > { %v5083_v14 = vrot.slane %v5069_v27, 5  ;;  %v5084_v15 = vrot.slane %v5069_v27, 6  ;;  %v5085_v17 = vrot.slane %v5069_v27, 7  ;;  %v5110_v43 = vadd.f32 %v9355_v35, %v5069_v27  ;;  %v5009_v16 = vld [vmem:[%s7080_s26 + $0x1e] sm:$0x1] }
 0x32c   : > { %v5111_v50 = vadd.f32 %v9359_v19, %v5079_v6  ;;  %v5112_v37 = vadd.f32 %v9364_v3, %v5080_v11  ;;  %v5113_v44 = vadd.f32 %v9368_v63, %v5081_v18  ;;  %v5114_v23 = vadd.f32 %v9373_v57, %v5082_v53  ;;  %v4949_v63 = vld [vmem:[#allocation2 + $0x3e] sm:$0x1]  ;;  %v5006_v57 = vld [vmem:[%s7080_s26 + $0x6] sm:$0x1]  ;;  %v5011_v10 = vld [vmem:[%s7080_s26 + $0x2e] sm:$0x1]  ;;  %p6720_p7 = pnand %p6719_p3, %p6713_p10 }
 0x32d   : > { %v5115_v35 = vadd.f32 %v9377_v12, %v5083_v14  ;;  %v5116_v56 = vadd.f32 %v9383_v42, %v5084_v15  ;;  %v5117_v19 = vadd.f32 %v9389_v22, %v5085_v17  ;;  %5126 = vst.msk [vmem:[%s8572_s19 + $0x46] sm:$0x1] %vm2261_vm12, %v5110_v43  ;;  %v4911_v3 = vsel %vm1813_vm5, %v4910_v32, %v4909_v28  ;;  %v5010_v48 = vld [vmem:[%s7080_s26 + $0x26] sm:$0x1]  ;;  %v5012_v36 = vld [vmem:[%s7080_s26 + $0x36] sm:$0x1] }
 0x32e   : > { %5127 = vst.msk [vmem:[%s8572_s19 + $0x4e] sm:$0x1] %vm2261_vm12, %v5111_v50  ;;  %5128 = vst.msk [vmem:[%s8572_s19 + $0x56] sm:$0x1] %vm2261_vm12, %v5112_v37  ;;  %v4913_v12 = vsel %vm1816_vm6, %v4912_v62, %v4911_v3  ;;  %v4975_v42 = vsel %vm1810_vm4, %v4974_v13, %v4942_v59  ;;  %v4976_v22 = vrot.slane %v4944_v26, 6  ;;  %v4978_v0 = vrot.slane %v4945_v8, 5 }
 0x32f   : > { %5129 = vst.msk [vmem:[%s8572_s19 + $0x5e] sm:$0x1] %vm2261_vm12, %v5113_v44  ;;  %5130 = vst.msk [vmem:[%s8572_s19 + $0x66] sm:$0x1] %vm2261_vm12, %v5114_v23  ;;  %v4915_v51 = vsel %vm1819_vm7, %v4914_v47, %v4913_v12  ;;  %v4980_v61 = vrot.slane %v4946_v20, 4  ;;  %v4982_v46 = vrot.slane %v4947_v2, 3 }
 0x330   : > { %5131 = vst.msk [vmem:[%s8572_s19 + $0x6e] sm:$0x1] %vm2261_vm12, %v5115_v35  ;;  %5132 = vst.msk [vmem:[%s8572_s19 + $0x76] sm:$0x1] %vm2261_vm12, %v5116_v56  ;;  %v4984_v34 = vrot.slane %v4948_v7, 2  ;;  %v4917_v39 = vsel %vm1822_vm8, %v4916_v33, %v4915_v51  ;;  %v4977_v41 = vsel %vm1813_vm5, %v4976_v22, %v4975_v42  ;;  %v4986_v60 = vrot.slane %v4949_v63, 1 }
 0x331   : > { %5133 = vst.msk [vmem:[%s8572_s19 + $0x7e] sm:$0x1] %vm2261_vm12, %v5117_v19  ;;  %v5038_v21 = vrot.slane %v5007_v24, 7  ;;  %v4919_v52 = vsel %vm1825_vm9, %v4918_v4, %v4917_v39  ;;  %v4979_v45 = vsel %vm1816_vm6, %v4978_v0, %v4977_v41  ;;  %v5013_v9 = vld [vmem:[%s7080_s26 + $0x3e] sm:$0x1]  ;;  %v5040_v32 = vrot.slane %v5008_v30, 6 }
 0x332   : > { %v5042_v27 = vrot.slane %v5009_v16, 5  ;;  %v4921_v62 = vsel %vm1828_vm10, %v4920_v29, %v4919_v52  ;;  %v4981_v47 = vsel %vm1819_vm7, %v4980_v61, %v4979_v45  ;;  %v5044_v33 = vrot.slane %v5010_v48, 4 }
 0x333   : > { %v5039_v28 = vsel %vm1810_vm4, %v5038_v21, %v5006_v57  ;;  %v4938_v13 = vsub.f32 %v9352_v54, %v4921_v62  ;;  %v4983_v6 = vsel %vm1822_vm8, %v4982_v46, %v4981_v47  ;;  %v5046_v11 = vrot.slane %v5011_v10, 3 }
 0x334   : > { %v5041_v4 = vsel %vm1813_vm5, %v5040_v32, %v5039_v28  ;;  %v5048_v53 = vrot.slane %v5012_v36, 2  ;;  %v5050_v26 = vrot.slane %v5013_v9, 1  ;;  %v4985_v14 = vsel %vm1825_vm9, %v4984_v34, %v4983_v6 }
 0x335   : > { %v5043_v18 = vsel %vm1816_vm6, %v5042_v27, %v5041_v4  ;;  %v4940_v29 = vadd.f32 %v4938_v13, %v8942_v58  ;;  %v4987_v17 = vsel %vm1828_vm10, %v4986_v60, %v4985_v14 }
 0x336   : > { %v5045_v15 = vsel %vm1819_vm7, %v5044_v33, %v5043_v18 }
 0x337   : > { %v5047_v54 = vsel %vm1822_vm8, %v5046_v11, %v5045_v15  ;;  %v5004_v43 = vadd.f32 %v4987_v17, %v4940_v29 }
 0x338   : > { %v5049_v59 = vsel %vm1825_vm9, %v5048_v53, %v5047_v54 }
 0x339   : > { %v5051_v8 = vsel %vm1828_vm10, %v5050_v26, %v5049_v59 }
 0x33a   : > { %v5068_v50 = vadd.f32 %v5051_v8, %v5004_v43 }
 0x33c   : > { %v5072_v37 = vrot.slane %v5068_v50, 1  ;;  %v5073_v44 = vrot.slane %v5068_v50, 2  ;;  %v5074_v58 = vrot.slane %v5068_v50, 3  ;;  %v5075_v23 = vrot.slane %v5068_v50, 4 }
 0x33d   : > { %v5076_v20 = vrot.slane %v5068_v50, 5  ;;  %v5077_v2 = vrot.slane %v5068_v50, 6  ;;  %v5078_v7 = vrot.slane %v5068_v50, 7  ;;  %v5102_v35 = vadd.f32 %v9447_v49, %v5068_v50 }
 0x33e   : > { %v5103_v56 = vadd.f32 %v9454_v25, %v5072_v37  ;;  %v5104_v19 = vadd.f32 %v9459_v40, %v5073_v44  ;;  %v5105_v3 = vadd.f32 %v9463_v1, %v5074_v58  ;;  %v5106_v63 = vadd.f32 %v9467_v31, %v5075_v23 }
 0x33f   : > { %v5107_v49 = vadd.f32 %v9472_v55, %v5076_v20  ;;  %v5108_v25 = vadd.f32 %v9478_v5, %v5077_v2  ;;  %v5109_v40 = vadd.f32 %v9485_v38, %v5078_v7  ;;  %5118 = vst.msk [vmem:[%s8572_s19 + $0x6] sm:$0x1] %vm2261_vm12, %v5102_v35 }
 0x340   : > { %5119 = vst.msk [vmem:[%s8572_s19 + $0xe] sm:$0x1] %vm2261_vm12, %v5103_v56  ;;  %5120 = vst.msk [vmem:[%s8572_s19 + $0x16] sm:$0x1] %vm2261_vm12, %v5104_v19 }
 0x341   : > { %5121 = vst.msk [vmem:[%s8572_s19 + $0x1e] sm:$0x1] %vm2261_vm12, %v5105_v3  ;;  %5122 = vst.msk [vmem:[%s8572_s19 + $0x26] sm:$0x1] %vm2261_vm12, %v5106_v63 }
 0x342   : > { %5123 = vst.msk [vmem:[%s8572_s19 + $0x2e] sm:$0x1] %vm2261_vm12, %v5107_v49  ;;  %5124 = vst.msk [vmem:[%s8572_s19 + $0x36] sm:$0x1] %vm2261_vm12, %v5108_v25 }
 0x343   : > { %5125 = vst.msk [vmem:[%s8572_s19 + $0x3e] sm:$0x1] %vm2261_vm12, %v5109_v40 }
 0x344   : > { %6723 = shalt.err (!%p6720_p7)
}
 0x345   : > { %s6724_s21 = scalar_lea.hbm %s9558_s14, 2048  ;;  %s6728_s2 = scalar_lea.hbm %s9631_s8, 4096 }
 0x346   : > { %p6725_p9 = scmp.ne.s32.totalorder %s9558_s14, %s6724_s21  ;;  %p6729_p11 = scmp.lt.u32.totalorder %s9558_s14, %s9631_s8 }
 0x347   : > { %p6730_p2 = scmp.lt.u32.totalorder %s6728_s2, %s6724_s21  ;;  %p6732_p1 = scmp.lt.u32.totalorder %s6724_s21, %s9558_s14 }
 0x348   : > { %p6726_p0 = pnand %p6725_p9, %p9775_p13 }
 0x349   : > { %p6731_p12 = por %p6730_p2, %p6729_p11 }
 0x34a   : > { %p6727_p8 = pneg %p6726_p0 }
 0x34b   : > { %p6733_p6 = por %p6732_p1, %p6731_p12 }
 0x34d   : > { %p6734_p10 = pnand %p6733_p6, %p6727_p8 }
 0x34f   : > { %6737 = shalt.err (!%p6734_p10)
}
 0x350   : > { %s6800_s15 = smov 128   ;;  %s6801_s19 = smov 8  }
 0x351   : > { %6307 = dma.vmem_to_hbm [thread:$0]  (%p9775_p13), %s9560_s24, 2048, %s9558_s14, %s5611_s29, %s6800_s15, %s6800_s15, %s6801_s19  }
 0x352 PF: > { %s5639_s18 = sand.u32 1, %s6776_s27   ;;  %p9776_p4 = scmp.ne.s32.totalorder %s9653_s12, 0 }
 0x353   : > { %p9777_p5 = scmp.ge.s32.totalorder %s6788_s30, 2  ;;  %s5640_s9 = scalar_lea.sflag [#allocation5], %s5639_s18 }
 0x355   : > { %p6324_p3 = pnand %p9777_p5, %p9776_p4 }
 0x357   : > { %6771 = dma.done.wait (!%p6324_p3), %s5640_s9, 2048  }
 0x358   : > { %6773 = vsyncadd (!%p6324_p3), %s5640_s9, 4294965248  ;;  %s9778_s26 = sld [smem:[#allocation17_spill]]  ;;  %s9779_s29 = sld [smem:[#allocation18_spill]] }
 0x359   : > { %p25_p7 = scmp.ge.s32.totalorder %s6960_s20, 4   ;;  %s9780_s27 = smov %s6780_s28 }
 0x35a   : > { %s9782_s30 = smov %s6960_s20 }
 0x35b   :  { %27 = sbr.rel (!%p25_p7) target bundleno = 12 (0xc), region = 118 }
 0x35e   : > { %s9781_s28 = smov %s9778_s26 }
 0x362   :  { %5645 = vsyncpa [#allocation4], 1 }
 0x363   :  { %5647 = vsyncpa [#allocation4 + $0x1], 1 }
 0x364   :  { %5648 = vsyncpa [#allocation7], 1 }
 0x365   :  { %5650 = vsyncpa [#allocation7 + $0x1], 1 }
 0x366   :  { %5651 = vsyncpa [#allocation10], 1 }
 0x367   :  { %5652 = vsyncpa [#allocation5], 1 }
 0x368   :  { %5654 = vsyncpa [#allocation5 + $0x1], 1 }

</bundles_post_ra>
